<compile_context>
chip_gen: v5e
topology: v5e:2x2
jax: 0.10.0
libtpu: 0.0.40
codegen_flags: <defaults>
</compile_context>

<pallas_src>
import functools
import math

import jax
import jax.numpy as jnp
from jax import lax
from jax.experimental import pallas as pl
from jax.experimental.pallas import tpu as pltpu

D_MODEL = 64
N_HEADS = 4
D_FF = 128
NUM_CLASSES = 2
NUM_PATHS = 3
LN_EPS = 1e-5
MATMUL_DTYPE = jnp.bfloat16        # MXU operand dtype; accumulation stays f32.


# ---------------------------------------------------------------------------
# One post-LN TransformerEncoderLayer (self-attn + ReLU FFN), eval mode, applied
# to a (num_seqs * seq_len, D) row block (rows grouped contiguously by sequence).
# Row-wise ops run once on the whole block; only the (S, S) score/softmax/PV step
# is per (sequence, head).  vec rows: [bo, ln1_g, ln1_b, bff2, ln2_g, ln2_b].
# ---------------------------------------------------------------------------
def _encoder_layer_rows(h, num_seqs, seq_len, wqkv, bqkv, wo, vec,
                        wff1, bff1, wff2, n_heads):
    N, D = h.shape
    hd = D // n_heads
    scale = 1.0 / math.sqrt(hd)
    bo, g1, be1, bf2, g2, be2 = (vec[i:i + 1, :] for i in range(6))

    # fused full-width QKV projection, one matmul for every row in the block
    qkv = jnp.dot(h.astype(MATMUL_DTYPE), wqkv,
                  preferred_element_type=jnp.float32) + bqkv            # (N, 3D) f32

    attn_blocks = []
    for s in range(num_seqs):
        blk = qkv[s * seq_len:(s + 1) * seq_len, :]                     # (S, 3D)
        acc = None
        for i in range(n_heads):
            q = blk[:, i * hd:(i + 1) * hd].astype(MATMUL_DTYPE)
            k = blk[:, D + i * hd:D + (i + 1) * hd].astype(MATMUL_DTYPE)
            v = blk[:, 2 * D + i * hd:2 * D + (i + 1) * hd].astype(MATMUL_DTYPE)
            sc = lax.dot_general(q, k, (((1,), (1,)), ((), ())),
                                 preferred_element_type=jnp.float32) * scale
            sc = sc - jnp.max(sc, axis=-1, keepdims=True)
            pr = jnp.exp(sc)
            pr = pr * pl.reciprocal(jnp.sum(pr, axis=-1, keepdims=True), approx=True)
            head = jnp.dot(pr.astype(MATMUL_DTYPE), v,
                           preferred_element_type=jnp.float32)          # (S, hd)
            # fold the head concat into the out-projection (per-head accumulate)
            contrib = jnp.dot(head.astype(MATMUL_DTYPE),
                              wo[i * hd:(i + 1) * hd, :],
                              preferred_element_type=jnp.float32)       # (S, D)
            acc = contrib if acc is None else acc + contrib
        attn_blocks.append(acc)
    attn = attn_blocks[0] if num_seqs == 1 else jnp.concatenate(attn_blocks, axis=0)
    attn = attn + bo

    # residual + LayerNorm 1 (f32)
    y = h + attn
    mu = jnp.mean(y, axis=-1, keepdims=True)
    var = jnp.mean((y - mu) ** 2, axis=-1, keepdims=True)
    y = (y - mu) * lax.rsqrt(var + LN_EPS) * g1 + be1

    # feed-forward (ReLU) + residual + LayerNorm 2
    f = jnp.dot(y.astype(MATMUL_DTYPE), wff1, preferred_element_type=jnp.float32) + bff1
    f = jnp.maximum(f, 0.0)
    f = jnp.dot(f.astype(MATMUL_DTYPE), wff2, preferred_element_type=jnp.float32) + bf2
    z = y + f
    mu2 = jnp.mean(z, axis=-1, keepdims=True)
    var2 = jnp.mean((z - mu2) ** 2, axis=-1, keepdims=True)
    return (z - mu2) * lax.rsqrt(var2 + LN_EPS) * g2 + be2


# ---------------------------------------------------------------------------
# Fully fused NeuroPathNet kernel.
#   grid step p    : PathEncoder p on the whole batch -> pooled rows into scratch
#   last grid step : cross-path attention + attention pooling + classifier
# ---------------------------------------------------------------------------
def _neuropathnet_kernel(xe_ref, pe_ref, emb_ref, wqkv_ref, bqkv_ref, wo_ref,
                         vec_ref, wff1_ref, bff1_ref, wff2_ref,
                         cwqkv_ref, cbqkv_ref, cwo_ref, cvec_ref,
                         cwff1_ref, cbff1_ref, cwff2_ref,
                         wp1_ref, bp1_ref, wp2_ref, bp2_ref, wc_ref, bc_ref,
                         o_ref, h_scratch,
                         *, n_heads, n_layers, batch, seq_len, num_paths):
    p = pl.program_id(0)
    B, T, P = batch, seq_len, num_paths

    # ----- PathEncoder p, whole batch as one (B*T, D) row block -----
    pe = pe_ref[0]                                   # (T, D)
    emb = emb_ref[0]                                 # (2, D): [emb_w, emb_b]
    emb_w = emb[0:1, :]
    emb_b = emb[1:2, :]
    xe = xe_ref[0]                                   # (B*T, 1)

    pe_rep = jnp.concatenate([pe] * B, axis=0)       # (B*T, D)
    h = xe * emb_w + emb_b + pe_rep                  # Linear(1,D) + pos-enc, one shot

    for l in range(n_layers):
        h = _encoder_layer_rows(h, B, T,
                                wqkv_ref[0, l], bqkv_ref[0, l], wo_ref[0, l],
                                vec_ref[0, l], wff1_ref[0, l], bff1_ref[0, l],
                                wff2_ref[0, l], n_heads)

    # AdaptiveAvgPool1d(1) over time; scatter rows into (B*P, D) scratch, b-major.
    for b in range(B):
        pooled_b = jnp.mean(h[b * T:(b + 1) * T, :], axis=0, keepdims=True)   # (1, D)
        h_scratch[pl.ds(b * P + p, 1), :] = pooled_b

    # ----- last step: cross-path attention + attention pooling + classifier -----
    @pl.when(p == pl.num_programs(0) - 1)
    def _():
        Hb = h_scratch[...]                          # (B*P, D), rows grouped per b
        hp = _encoder_layer_rows(Hb, B, P,
                                 cwqkv_ref[...], cbqkv_ref[...], cwo_ref[...],
                                 cvec_ref[...], cwff1_ref[...], cbff1_ref[...],
                                 cwff2_ref[...], n_heads)                      # (B*P, D)

        # att_pool: Linear(D,D) -> tanh -> Linear(D,1), once for all B*P rows
        t = jnp.tanh(jnp.dot(hp.astype(MATMUL_DTYPE), wp1_ref[...],
                             preferred_element_type=jnp.float32) + bp1_ref[...])
        scores = jnp.sum(t * wp2_ref[...], axis=-1, keepdims=True) + bp2_ref[...]  # (B*P,1)

        # softmax over paths + weighted sum, per batch element
        z_rows = []
        for b in range(B):
            s_b = scores[b * P:(b + 1) * P, :]
            s_b = s_b - jnp.max(s_b, axis=0, keepdims=True)
            e_b = jnp.exp(s_b)
            alpha = e_b * pl.reciprocal(jnp.sum(e_b, axis=0, keepdims=True), approx=True)
            z_rows.append(jnp.sum(alpha * hp[b * P:(b + 1) * P, :],
                                  axis=0, keepdims=True))                      # (1, D)
        z = z_rows[0] if B == 1 else jnp.concatenate(z_rows, axis=0)            # (B, D)

        logits = jnp.dot(z.astype(MATMUL_DTYPE), wc_ref[...],
                         preferred_element_type=jnp.float32) + bc_ref[...]
        o_ref[...] = logits.astype(o_ref.dtype)       # single lane-narrow store


# ---------------------------------------------------------------------------
# Wrapper: one pallas_call for the whole forward pass.
# ---------------------------------------------------------------------------
def neuropathnet_forward(X_paths, params):
    # X_paths: (P, B, T)
    P, B, T = X_paths.shape
    pp, cp = params['path'], params['cross']
    pool, cls = params['pool'], params['cls']
    D = pp['emb'].shape[-1]
    C = cls['w'].shape[-1]
    L = pp['wqkv'].shape[1]
    assert T <= pp['pe'].shape[-2], "sequence length exceeds positional encoding (100)"

    xe = X_paths.reshape(P, B * T, 1)                # b-major rows, single lane
    pe = pp['pe'][:, :T]                             # (P, T, D)

    path_ops = [xe, pe, pp['emb'], pp['wqkv'], pp['bqkv'], pp['wo'], pp['vec'],
                pp['wff1'], pp['bff1'], pp['wff2']]
    shared_ops = [cp['wqkv'], cp['bqkv'], cp['wo'], cp['vec'],
                  cp['wff1'], cp['bff1'], cp['wff2'],
                  pool['w1'], pool['b1'], pool['w2'], pool['b2'],
                  cls['w'], cls['b']]

    def pspec(arr):   # per-path operand: block over the leading P axis
        return pl.BlockSpec((1,) + arr.shape[1:],
                            lambda p, _nd=arr.ndim: (p,) + (0,) * (_nd - 1))

    def fspec(arr):   # shared operand: full array, fetched once
        return pl.BlockSpec(arr.shape, lambda p, _nd=arr.ndim: (0,) * _nd)

    kern = functools.partial(_neuropathnet_kernel, n_heads=N_HEADS, n_layers=L,
                             batch=B, seq_len=T, num_paths=P)
    return pl.pallas_call(
        kern,
        out_shape=jax.ShapeDtypeStruct((B, C), jnp.float32),
        grid=(P,),
        in_specs=[pspec(a) for a in path_ops] + [fspec(a) for a in shared_ops],
        out_specs=pl.BlockSpec((B, C), lambda p: (0, 0)),
        scratch_shapes=[pltpu.VMEM((B * P, D), jnp.float32)],   # persistent H buffer
        compiler_params=pltpu.CompilerParams(dimension_semantics=("arbitrary",)),
    )(*path_ops, *shared_ops)


# ---------------------------------------------------------------------------
# Deterministic synthetic parameter init (shapes from the module's __init__),
# stored directly in the packed / stacked kernel layout.  Matmul weights are
# kept in bf16; biases / LayerNorm vectors / pos-enc stay f32.
# ---------------------------------------------------------------------------
def _normal(key, shape, scale=0.05):
    return scale * jax.random.normal(key, shape, jnp.float32)


def init_encoder_layer_params(key, d_model, d_ff):
    k = jax.random.split(key, 8)
    bo = _normal(k[3], (1, d_model), 0.01)
    bff2 = _normal(k[7], (1, d_model), 0.01)
    ones = jnp.ones((1, d_model), jnp.float32)
    zeros = jnp.zeros((1, d_model), jnp.float32)
    return dict(
        wqkv=_normal(k[0], (d_model, 3 * d_model)).astype(MATMUL_DTYPE),  # fused Q|K|V
        bqkv=_normal(k[1], (1, 3 * d_model), 0.01),
        wo=_normal(k[2], (d_model, d_model)).astype(MATMUL_DTYPE),        # out-proj
        vec=jnp.concatenate([bo, ones, zeros, bff2, ones, zeros], axis=0),  # (6, D)
        wff1=_normal(k[4], (d_model, d_ff)).astype(MATMUL_DTYPE),
        bff1=_normal(k[5], (1, d_ff), 0.01),
        wff2=_normal(k[6], (d_ff, d_model)).astype(MATMUL_DTYPE),
    )


def init_path_encoder_params(key, d_model, d_ff, n_layers=2):
    k = jax.random.split(key, 3 + n_layers)
    layers = [init_encoder_layer_params(k[3 + l], d_model, d_ff) for l in range(n_layers)]
    packed = {name: jnp.stack([lp[name] for lp in layers], axis=0) for name in layers[0]}
    packed['emb'] = jnp.concatenate(
        [_normal(k[0], (1, d_model)),                  # nn.Linear(1, d_model) weight
         _normal(k[1], (1, d_model), 0.01)], axis=0)   # bias -> (2, D)
    packed['pe'] = _normal(k[2], (100, d_model), 1.0)  # nn.Parameter(randn(1,100,D))
    return packed


def init_model_params(key, num_paths, d_model, n_heads, d_ff, num_classes):
    del n_heads  # head count only affects the kernel, not the parameter shapes
    keys = jax.random.split(key, num_paths + 3)
    per_path = [init_path_encoder_params(keys[i], d_model, d_ff) for i in range(num_paths)]
    path = {name: jnp.stack([p[name] for p in per_path], axis=0) for name in per_path[0]}
    cross = init_encoder_layer_params(keys[num_paths], d_model, d_ff)
    kp = jax.random.split(keys[num_paths + 1], 4)
    pool = dict(
        w1=_normal(kp[0], (d_model, d_model)).astype(MATMUL_DTYPE),  # att_pool Linear(D,D)
        b1=_normal(kp[1], (1, d_model), 0.01),
        w2=_normal(kp[2], (1, d_model)),                             # att_pool Linear(D,1) row
        b2=_normal(kp[3], (1, 1), 0.01),
    )
    kc = jax.random.split(keys[num_paths + 2], 2)
    cls = dict(
        w=_normal(kc[0], (d_model, num_classes)).astype(MATMUL_DTYPE),  # classifier
        b=_normal(kc[1], (1, num_classes), 0.01),
    )
    return dict(path=path, cross=cross, pool=pool, cls=cls)


if __name__ == "__main__":
    key = jax.random.PRNGKey(0)
    kx, kp = jax.random.split(key)
    B, T = 2, 8
    X_paths = jax.random.normal(kx, (NUM_PATHS, B, T), jnp.float32)
    params = init_model_params(kp, NUM_PATHS, D_MODEL, N_HEADS, D_FF, NUM_CLASSES)

    logits = jax.jit(neuropathnet_forward)(X_paths, params)
    logits = jax.block_until_ready(logits)

    assert logits.shape == (B, NUM_CLASSES)
    assert bool(jnp.all(jnp.isfinite(logits)))
    print("KERNEL_OK")
</pallas_src>

<mosaic_0001>
module attributes {stable_mosaic.version = 11 : i64} {
  func.func @_neuropathnet_kernel(%arg0: i32, %arg1: memref<1x16x1xf32, #tpu.memory_space<vmem>>, %arg2: memref<1x8x64xf32, #tpu.memory_space<vmem>>, %arg3: memref<1x2x64xf32, #tpu.memory_space<vmem>>, %arg4: memref<1x2x64x192xbf16, #tpu.memory_space<vmem>>, %arg5: memref<1x2x1x192xf32, #tpu.memory_space<vmem>>, %arg6: memref<1x2x64x64xbf16, #tpu.memory_space<vmem>>, %arg7: memref<1x2x6x64xf32, #tpu.memory_space<vmem>>, %arg8: memref<1x2x64x128xbf16, #tpu.memory_space<vmem>>, %arg9: memref<1x2x1x128xf32, #tpu.memory_space<vmem>>, %arg10: memref<1x2x128x64xbf16, #tpu.memory_space<vmem>>, %arg11: memref<64x192xbf16, #tpu.memory_space<vmem>>, %arg12: memref<1x192xf32, #tpu.memory_space<vmem>>, %arg13: memref<64x64xbf16, #tpu.memory_space<vmem>>, %arg14: memref<6x64xf32, #tpu.memory_space<vmem>>, %arg15: memref<64x128xbf16, #tpu.memory_space<vmem>>, %arg16: memref<1x128xf32, #tpu.memory_space<vmem>>, %arg17: memref<128x64xbf16, #tpu.memory_space<vmem>>, %arg18: memref<64x64xbf16, #tpu.memory_space<vmem>>, %arg19: memref<1x64xf32, #tpu.memory_space<vmem>>, %arg20: memref<1x64xf32, #tpu.memory_space<vmem>>, %arg21: memref<1x1xf32, #tpu.memory_space<vmem>>, %arg22: memref<64x2xbf16, #tpu.memory_space<vmem>>, %arg23: memref<1x2xf32, #tpu.memory_space<vmem>>, %arg24: memref<2x2xf32, #tpu.memory_space<vmem>>, %arg25: memref<6x64xf32, #tpu.memory_space<vmem>>) attributes {dimension_semantics = [#tpu.dimension_semantics<arbitrary>], iteration_bounds = array<i64: 3>, scalar_prefetch = 0 : i64, scratch_operands = 1 : i64, tpu.core_type = #tpu.core_type<tc>, window_params = [{transform_indices = @transform_0, window_bounds = array<i64: 1, 16, 1>}, {transform_indices = @transform_1, window_bounds = array<i64: 1, 8, 64>}, {transform_indices = @transform_2, window_bounds = array<i64: 1, 2, 64>}, {transform_indices = @transform_3, window_bounds = array<i64: 1, 2, 64, 192>}, {transform_indices = @transform_4, window_bounds = array<i64: 1, 2, 1, 192>}, {transform_indices = @transform_5, window_bounds = array<i64: 1, 2, 64, 64>}, {transform_indices = @transform_6, window_bounds = array<i64: 1, 2, 6, 64>}, {transform_indices = @transform_7, window_bounds = array<i64: 1, 2, 64, 128>}, {transform_indices = @transform_8, window_bounds = array<i64: 1, 2, 1, 128>}, {transform_indices = @transform_9, window_bounds = array<i64: 1, 2, 128, 64>}, {pipeline_mode = #tpu.pipeline_mode<synchronous>, transform_indices = @transform_10, window_bounds = array<i64: 64, 192>}, {pipeline_mode = #tpu.pipeline_mode<synchronous>, transform_indices = @transform_11, window_bounds = array<i64: 1, 192>}, {pipeline_mode = #tpu.pipeline_mode<synchronous>, transform_indices = @transform_12, window_bounds = array<i64: 64, 64>}, {pipeline_mode = #tpu.pipeline_mode<synchronous>, transform_indices = @transform_13, window_bounds = array<i64: 6, 64>}, {pipeline_mode = #tpu.pipeline_mode<synchronous>, transform_indices = @transform_14, window_bounds = array<i64: 64, 128>}, {pipeline_mode = #tpu.pipeline_mode<synchronous>, transform_indices = @transform_15, window_bounds = array<i64: 1, 128>}, {pipeline_mode = #tpu.pipeline_mode<synchronous>, transform_indices = @transform_16, window_bounds = array<i64: 128, 64>}, {pipeline_mode = #tpu.pipeline_mode<synchronous>, transform_indices = @transform_17, window_bounds = array<i64: 64, 64>}, {pipeline_mode = #tpu.pipeline_mode<synchronous>, transform_indices = @transform_18, window_bounds = array<i64: 1, 64>}, {pipeline_mode = #tpu.pipeline_mode<synchronous>, transform_indices = @transform_19, window_bounds = array<i64: 1, 64>}, {pipeline_mode = #tpu.pipeline_mode<synchronous>, transform_indices = @transform_20, window_bounds = array<i64: 1, 1>}, {pipeline_mode = #tpu.pipeline_mode<synchronous>, transform_indices = @transform_21, window_bounds = array<i64: 64, 2>}, {pipeline_mode = #tpu.pipeline_mode<synchronous>, transform_indices = @transform_22, window_bounds = array<i64: 1, 2>}, {pipeline_mode = #tpu.pipeline_mode<synchronous>, transform_indices = @transform_23, window_bounds = array<i64: 2, 2>}]} {
    %c0 = arith.constant 0 : index
    %c0_0 = arith.constant 0 : index
    %c0_1 = arith.constant 0 : index
    %0 = vector.load %arg2[%c0, %c0_0, %c0_1] : memref<1x8x64xf32, #tpu.memory_space<vmem>>, vector<1x8x64xf32>
    %1 = vector.shape_cast %0 : vector<1x8x64xf32> to vector<8x64xf32>
    %c0_2 = arith.constant 0 : index
    %c0_3 = arith.constant 0 : index
    %c0_4 = arith.constant 0 : index
    %2 = vector.load %arg3[%c0_2, %c0_3, %c0_4] : memref<1x2x64xf32, #tpu.memory_space<vmem>>, vector<1x2x64xf32>
    %3 = vector.shape_cast %2 : vector<1x2x64xf32> to vector<2x64xf32>
    %4 = vector.extract_strided_slice %3 {offsets = [0, 0], sizes = [1, 64], strides = [1, 1]} : vector<2x64xf32> to vector<1x64xf32>
    %5 = vector.extract_strided_slice %3 {offsets = [1, 0], sizes = [1, 64], strides = [1, 1]} : vector<2x64xf32> to vector<1x64xf32>
    %c0_5 = arith.constant 0 : index
    %c0_6 = arith.constant 0 : index
    %c0_7 = arith.constant 0 : index
    %6 = vector.load %arg1[%c0_5, %c0_6, %c0_7] : memref<1x16x1xf32, #tpu.memory_space<vmem>>, vector<1x16x1xf32>
    %7 = vector.shape_cast %6 : vector<1x16x1xf32> to vector<16x1xf32>
    %8 = tpu.concatenate %1, %1 in 0 : vector<8x64xf32>, vector<8x64xf32> -> vector<16x64xf32>
    %9 = vector.broadcast %7 : vector<16x1xf32> to vector<16x64xf32>
    %10 = vector.broadcast %4 : vector<1x64xf32> to vector<16x64xf32>
    %11 = arith.mulf %9, %10 : vector<16x64xf32>
    %12 = vector.broadcast %5 : vector<1x64xf32> to vector<16x64xf32>
    %13 = arith.addf %11, %12 : vector<16x64xf32>
    %14 = arith.addf %13, %8 : vector<16x64xf32>
    %c0_8 = arith.constant 0 : index
    %c0_9 = arith.constant 0 : index
    %c0_10 = arith.constant 0 : index
    %c0_11 = arith.constant 0 : index
    %15 = vector.load %arg4[%c0_8, %c0_9, %c0_10, %c0_11] : memref<1x2x64x192xbf16, #tpu.memory_space<vmem>>, vector<1x1x64x192xbf16>
    %16 = vector.shape_cast %15 : vector<1x1x64x192xbf16> to vector<64x192xbf16>
    %c0_12 = arith.constant 0 : index
    %c0_13 = arith.constant 0 : index
    %c0_14 = arith.constant 0 : index
    %c0_15 = arith.constant 0 : index
    %17 = vector.load %arg5[%c0_12, %c0_13, %c0_14, %c0_15] : memref<1x2x1x192xf32, #tpu.memory_space<vmem>>, vector<1x1x1x192xf32>
    %18 = vector.shape_cast %17 : vector<1x1x1x192xf32> to vector<1x192xf32>
    %c0_16 = arith.constant 0 : index
    %c0_17 = arith.constant 0 : index
    %c0_18 = arith.constant 0 : index
    %c0_19 = arith.constant 0 : index
    %19 = vector.load %arg6[%c0_16, %c0_17, %c0_18, %c0_19] : memref<1x2x64x64xbf16, #tpu.memory_space<vmem>>, vector<1x1x64x64xbf16>
    %20 = vector.shape_cast %19 : vector<1x1x64x64xbf16> to vector<64x64xbf16>
    %c0_20 = arith.constant 0 : index
    %c0_21 = arith.constant 0 : index
    %c0_22 = arith.constant 0 : index
    %c0_23 = arith.constant 0 : index
    %21 = vector.load %arg7[%c0_20, %c0_21, %c0_22, %c0_23] : memref<1x2x6x64xf32, #tpu.memory_space<vmem>>, vector<1x1x6x64xf32>
    %22 = vector.shape_cast %21 : vector<1x1x6x64xf32> to vector<6x64xf32>
    %c0_24 = arith.constant 0 : index
    %c0_25 = arith.constant 0 : index
    %c0_26 = arith.constant 0 : index
    %c0_27 = arith.constant 0 : index
    %23 = vector.load %arg8[%c0_24, %c0_25, %c0_26, %c0_27] : memref<1x2x64x128xbf16, #tpu.memory_space<vmem>>, vector<1x1x64x128xbf16>
    %24 = vector.shape_cast %23 : vector<1x1x64x128xbf16> to vector<64x128xbf16>
    %c0_28 = arith.constant 0 : index
    %c0_29 = arith.constant 0 : index
    %c0_30 = arith.constant 0 : index
    %c0_31 = arith.constant 0 : index
    %25 = vector.load %arg9[%c0_28, %c0_29, %c0_30, %c0_31] : memref<1x2x1x128xf32, #tpu.memory_space<vmem>>, vector<1x1x1x128xf32>
    %26 = vector.shape_cast %25 : vector<1x1x1x128xf32> to vector<1x128xf32>
    %c0_32 = arith.constant 0 : index
    %c0_33 = arith.constant 0 : index
    %c0_34 = arith.constant 0 : index
    %c0_35 = arith.constant 0 : index
    %27 = vector.load %arg10[%c0_32, %c0_33, %c0_34, %c0_35] : memref<1x2x128x64xbf16, #tpu.memory_space<vmem>>, vector<1x1x128x64xbf16>
    %28 = vector.shape_cast %27 : vector<1x1x128x64xbf16> to vector<128x64xbf16>
    %29 = vector.extract_strided_slice %22 {offsets = [0, 0], sizes = [1, 64], strides = [1, 1]} : vector<6x64xf32> to vector<1x64xf32>
    %30 = vector.extract_strided_slice %22 {offsets = [1, 0], sizes = [1, 64], strides = [1, 1]} : vector<6x64xf32> to vector<1x64xf32>
    %31 = vector.extract_strided_slice %22 {offsets = [2, 0], sizes = [1, 64], strides = [1, 1]} : vector<6x64xf32> to vector<1x64xf32>
    %32 = vector.extract_strided_slice %22 {offsets = [3, 0], sizes = [1, 64], strides = [1, 1]} : vector<6x64xf32> to vector<1x64xf32>
    %33 = vector.extract_strided_slice %22 {offsets = [4, 0], sizes = [1, 64], strides = [1, 1]} : vector<6x64xf32> to vector<1x64xf32>
    %34 = vector.extract_strided_slice %22 {offsets = [5, 0], sizes = [1, 64], strides = [1, 1]} : vector<6x64xf32> to vector<1x64xf32>
    %35 = arith.truncf %14 : vector<16x64xf32> to vector<16x64xbf16>
    %cst = arith.constant dense<0.000000e+00> : vector<16x192xf32>
    %36 = tpu.matmul %35, %16, %cst {dimension_numbers = #tpu.dot_dimension_numbers<[1], [0], [0], [1], [0, 0, 1, 1], [], []>} : vector<16x64xbf16>, vector<64x192xbf16>, vector<16x192xf32> -> vector<16x192xf32>
    %37 = vector.broadcast %18 : vector<1x192xf32> to vector<16x192xf32>
    %38 = arith.addf %36, %37 : vector<16x192xf32>
    %39 = vector.extract_strided_slice %38 {offsets = [0, 0], sizes = [8, 192], strides = [1, 1]} : vector<16x192xf32> to vector<8x192xf32>
    %40 = vector.extract_strided_slice %39 {offsets = [0, 0], sizes = [8, 16], strides = [1, 1]} : vector<8x192xf32> to vector<8x16xf32>
    %41 = arith.truncf %40 : vector<8x16xf32> to vector<8x16xbf16>
    %42 = vector.extract_strided_slice %39 {offsets = [0, 64], sizes = [8, 16], strides = [1, 1]} : vector<8x192xf32> to vector<8x16xf32>
    %43 = arith.truncf %42 : vector<8x16xf32> to vector<8x16xbf16>
    %44 = vector.extract_strided_slice %39 {offsets = [0, 128], sizes = [8, 16], strides = [1, 1]} : vector<8x192xf32> to vector<8x16xf32>
    %45 = arith.truncf %44 : vector<8x16xf32> to vector<8x16xbf16>
    %cst_36 = arith.constant dense<0.000000e+00> : vector<8x8xf32>
    %46 = tpu.matmul %41, %43, %cst_36 {dimension_numbers = #tpu.dot_dimension_numbers<[1], [1], [0], [0], [0, 0, 1, 0], [], []>} : vector<8x16xbf16>, vector<8x16xbf16>, vector<8x8xf32> -> vector<8x8xf32>
    %cst_37 = arith.constant 2.500000e-01 : f32
    %47 = vector.broadcast %cst_37 : f32 to vector<8x8xf32>
    %48 = arith.mulf %46, %47 : vector<8x8xf32>
    %cst_38 = arith.constant dense<0xFF800000> : vector<8xf32>
    %49 = vector.multi_reduction <maximumf>, %48, %cst_38 [1] : vector<8x8xf32> to vector<8xf32>
    %50 = vector.shape_cast %49 : vector<8xf32> to vector<8x1xf32>
    %51 = vector.broadcast %50 : vector<8x1xf32> to vector<8x8xf32>
    %52 = arith.subf %48, %51 : vector<8x8xf32>
    %53 = math.exp %52 : vector<8x8xf32>
    %cst_39 = arith.constant dense<0.000000e+00> : vector<8xf32>
    %54 = vector.multi_reduction <add>, %53, %cst_39 [1] : vector<8x8xf32> to vector<8xf32>
    %55 = vector.shape_cast %54 : vector<8xf32> to vector<8x1xf32>
    %56 = tpu.reciprocal %55 {approx = true} : vector<8x1xf32> -> vector<8x1xf32>
    %57 = vector.broadcast %56 : vector<8x1xf32> to vector<8x8xf32>
    %58 = arith.mulf %53, %57 : vector<8x8xf32>
    %59 = arith.truncf %58 : vector<8x8xf32> to vector<8x8xbf16>
    %cst_40 = arith.constant dense<0.000000e+00> : vector<8x16xf32>
    %60 = tpu.matmul %59, %45, %cst_40 {dimension_numbers = #tpu.dot_dimension_numbers<[1], [0], [0], [1], [0, 0, 1, 1], [], []>} : vector<8x8xbf16>, vector<8x16xbf16>, vector<8x16xf32> -> vector<8x16xf32>
    %61 = arith.truncf %60 : vector<8x16xf32> to vector<8x16xbf16>
    %62 = vector.extract_strided_slice %20 {offsets = [0, 0], sizes = [16, 64], strides = [1, 1]} : vector<64x64xbf16> to vector<16x64xbf16>
    %cst_41 = arith.constant dense<0.000000e+00> : vector<8x64xf32>
    %63 = tpu.matmul %61, %62, %cst_41 {dimension_numbers = #tpu.dot_dimension_numbers<[1], [0], [0], [1], [0, 0, 1, 1], [], []>} : vector<8x16xbf16>, vector<16x64xbf16>, vector<8x64xf32> -> vector<8x64xf32>
    %64 = vector.extract_strided_slice %39 {offsets = [0, 16], sizes = [8, 16], strides = [1, 1]} : vector<8x192xf32> to vector<8x16xf32>
    %65 = arith.truncf %64 : vector<8x16xf32> to vector<8x16xbf16>
    %66 = vector.extract_strided_slice %39 {offsets = [0, 80], sizes = [8, 16], strides = [1, 1]} : vector<8x192xf32> to vector<8x16xf32>
    %67 = arith.truncf %66 : vector<8x16xf32> to vector<8x16xbf16>
    %68 = vector.extract_strided_slice %39 {offsets = [0, 144], sizes = [8, 16], strides = [1, 1]} : vector<8x192xf32> to vector<8x16xf32>
    %69 = arith.truncf %68 : vector<8x16xf32> to vector<8x16xbf16>
    %cst_42 = arith.constant dense<0.000000e+00> : vector<8x8xf32>
    %70 = tpu.matmul %65, %67, %cst_42 {dimension_numbers = #tpu.dot_dimension_numbers<[1], [1], [0], [0], [0, 0, 1, 0], [], []>} : vector<8x16xbf16>, vector<8x16xbf16>, vector<8x8xf32> -> vector<8x8xf32>
    %cst_43 = arith.constant 2.500000e-01 : f32
    %71 = vector.broadcast %cst_43 : f32 to vector<8x8xf32>
    %72 = arith.mulf %70, %71 : vector<8x8xf32>
    %cst_44 = arith.constant dense<0xFF800000> : vector<8xf32>
    %73 = vector.multi_reduction <maximumf>, %72, %cst_44 [1] : vector<8x8xf32> to vector<8xf32>
    %74 = vector.shape_cast %73 : vector<8xf32> to vector<8x1xf32>
    %75 = vector.broadcast %74 : vector<8x1xf32> to vector<8x8xf32>
    %76 = arith.subf %72, %75 : vector<8x8xf32>
    %77 = math.exp %76 : vector<8x8xf32>
    %cst_45 = arith.constant dense<0.000000e+00> : vector<8xf32>
    %78 = vector.multi_reduction <add>, %77, %cst_45 [1] : vector<8x8xf32> to vector<8xf32>
    %79 = vector.shape_cast %78 : vector<8xf32> to vector<8x1xf32>
    %80 = tpu.reciprocal %79 {approx = true} : vector<8x1xf32> -> vector<8x1xf32>
    %81 = vector.broadcast %80 : vector<8x1xf32> to vector<8x8xf32>
    %82 = arith.mulf %77, %81 : vector<8x8xf32>
    %83 = arith.truncf %82 : vector<8x8xf32> to vector<8x8xbf16>
    %cst_46 = arith.constant dense<0.000000e+00> : vector<8x16xf32>
    %84 = tpu.matmul %83, %69, %cst_46 {dimension_numbers = #tpu.dot_dimension_numbers<[1], [0], [0], [1], [0, 0, 1, 1], [], []>} : vector<8x8xbf16>, vector<8x16xbf16>, vector<8x16xf32> -> vector<8x16xf32>
    %85 = arith.truncf %84 : vector<8x16xf32> to vector<8x16xbf16>
    %86 = vector.extract_strided_slice %20 {offsets = [16, 0], sizes = [16, 64], strides = [1, 1]} : vector<64x64xbf16> to vector<16x64xbf16>
    %cst_47 = arith.constant dense<0.000000e+00> : vector<8x64xf32>
    %87 = tpu.matmul %85, %86, %cst_47 {dimension_numbers = #tpu.dot_dimension_numbers<[1], [0], [0], [1], [0, 0, 1, 1], [], []>} : vector<8x16xbf16>, vector<16x64xbf16>, vector<8x64xf32> -> vector<8x64xf32>
    %88 = arith.addf %63, %87 : vector<8x64xf32>
    %89 = vector.extract_strided_slice %39 {offsets = [0, 32], sizes = [8, 16], strides = [1, 1]} : vector<8x192xf32> to vector<8x16xf32>
    %90 = arith.truncf %89 : vector<8x16xf32> to vector<8x16xbf16>
    %91 = vector.extract_strided_slice %39 {offsets = [0, 96], sizes = [8, 16], strides = [1, 1]} : vector<8x192xf32> to vector<8x16xf32>
    %92 = arith.truncf %91 : vector<8x16xf32> to vector<8x16xbf16>
    %93 = vector.extract_strided_slice %39 {offsets = [0, 160], sizes = [8, 16], strides = [1, 1]} : vector<8x192xf32> to vector<8x16xf32>
    %94 = arith.truncf %93 : vector<8x16xf32> to vector<8x16xbf16>
    %cst_48 = arith.constant dense<0.000000e+00> : vector<8x8xf32>
    %95 = tpu.matmul %90, %92, %cst_48 {dimension_numbers = #tpu.dot_dimension_numbers<[1], [1], [0], [0], [0, 0, 1, 0], [], []>} : vector<8x16xbf16>, vector<8x16xbf16>, vector<8x8xf32> -> vector<8x8xf32>
    %cst_49 = arith.constant 2.500000e-01 : f32
    %96 = vector.broadcast %cst_49 : f32 to vector<8x8xf32>
    %97 = arith.mulf %95, %96 : vector<8x8xf32>
    %cst_50 = arith.constant dense<0xFF800000> : vector<8xf32>
    %98 = vector.multi_reduction <maximumf>, %97, %cst_50 [1] : vector<8x8xf32> to vector<8xf32>
    %99 = vector.shape_cast %98 : vector<8xf32> to vector<8x1xf32>
    %100 = vector.broadcast %99 : vector<8x1xf32> to vector<8x8xf32>
    %101 = arith.subf %97, %100 : vector<8x8xf32>
    %102 = math.exp %101 : vector<8x8xf32>
    %cst_51 = arith.constant dense<0.000000e+00> : vector<8xf32>
    %103 = vector.multi_reduction <add>, %102, %cst_51 [1] : vector<8x8xf32> to vector<8xf32>
    %104 = vector.shape_cast %103 : vector<8xf32> to vector<8x1xf32>
    %105 = tpu.reciprocal %104 {approx = true} : vector<8x1xf32> -> vector<8x1xf32>
    %106 = vector.broadcast %105 : vector<8x1xf32> to vector<8x8xf32>
    %107 = arith.mulf %102, %106 : vector<8x8xf32>
    %108 = arith.truncf %107 : vector<8x8xf32> to vector<8x8xbf16>
    %cst_52 = arith.constant dense<0.000000e+00> : vector<8x16xf32>
    %109 = tpu.matmul %108, %94, %cst_52 {dimension_numbers = #tpu.dot_dimension_numbers<[1], [0], [0], [1], [0, 0, 1, 1], [], []>} : vector<8x8xbf16>, vector<8x16xbf16>, vector<8x16xf32> -> vector<8x16xf32>
    %110 = arith.truncf %109 : vector<8x16xf32> to vector<8x16xbf16>
    %111 = vector.extract_strided_slice %20 {offsets = [32, 0], sizes = [16, 64], strides = [1, 1]} : vector<64x64xbf16> to vector<16x64xbf16>
    %cst_53 = arith.constant dense<0.000000e+00> : vector<8x64xf32>
    %112 = tpu.matmul %110, %111, %cst_53 {dimension_numbers = #tpu.dot_dimension_numbers<[1], [0], [0], [1], [0, 0, 1, 1], [], []>} : vector<8x16xbf16>, vector<16x64xbf16>, vector<8x64xf32> -> vector<8x64xf32>
    %113 = arith.addf %88, %112 : vector<8x64xf32>
    %114 = vector.extract_strided_slice %39 {offsets = [0, 48], sizes = [8, 16], strides = [1, 1]} : vector<8x192xf32> to vector<8x16xf32>
    %115 = arith.truncf %114 : vector<8x16xf32> to vector<8x16xbf16>
    %116 = vector.extract_strided_slice %39 {offsets = [0, 112], sizes = [8, 16], strides = [1, 1]} : vector<8x192xf32> to vector<8x16xf32>
    %117 = arith.truncf %116 : vector<8x16xf32> to vector<8x16xbf16>
    %118 = vector.extract_strided_slice %39 {offsets = [0, 176], sizes = [8, 16], strides = [1, 1]} : vector<8x192xf32> to vector<8x16xf32>
    %119 = arith.truncf %118 : vector<8x16xf32> to vector<8x16xbf16>
    %cst_54 = arith.constant dense<0.000000e+00> : vector<8x8xf32>
    %120 = tpu.matmul %115, %117, %cst_54 {dimension_numbers = #tpu.dot_dimension_numbers<[1], [1], [0], [0], [0, 0, 1, 0], [], []>} : vector<8x16xbf16>, vector<8x16xbf16>, vector<8x8xf32> -> vector<8x8xf32>
    %cst_55 = arith.constant 2.500000e-01 : f32
    %121 = vector.broadcast %cst_55 : f32 to vector<8x8xf32>
    %122 = arith.mulf %120, %121 : vector<8x8xf32>
    %cst_56 = arith.constant dense<0xFF800000> : vector<8xf32>
    %123 = vector.multi_reduction <maximumf>, %122, %cst_56 [1] : vector<8x8xf32> to vector<8xf32>
    %124 = vector.shape_cast %123 : vector<8xf32> to vector<8x1xf32>
    %125 = vector.broadcast %124 : vector<8x1xf32> to vector<8x8xf32>
    %126 = arith.subf %122, %125 : vector<8x8xf32>
    %127 = math.exp %126 : vector<8x8xf32>
    %cst_57 = arith.constant dense<0.000000e+00> : vector<8xf32>
    %128 = vector.multi_reduction <add>, %127, %cst_57 [1] : vector<8x8xf32> to vector<8xf32>
    %129 = vector.shape_cast %128 : vector<8xf32> to vector<8x1xf32>
    %130 = tpu.reciprocal %129 {approx = true} : vector<8x1xf32> -> vector<8x1xf32>
    %131 = vector.broadcast %130 : vector<8x1xf32> to vector<8x8xf32>
    %132 = arith.mulf %127, %131 : vector<8x8xf32>
    %133 = arith.truncf %132 : vector<8x8xf32> to vector<8x8xbf16>
    %cst_58 = arith.constant dense<0.000000e+00> : vector<8x16xf32>
    %134 = tpu.matmul %133, %119, %cst_58 {dimension_numbers = #tpu.dot_dimension_numbers<[1], [0], [0], [1], [0, 0, 1, 1], [], []>} : vector<8x8xbf16>, vector<8x16xbf16>, vector<8x16xf32> -> vector<8x16xf32>
    %135 = arith.truncf %134 : vector<8x16xf32> to vector<8x16xbf16>
    %136 = vector.extract_strided_slice %20 {offsets = [48, 0], sizes = [16, 64], strides = [1, 1]} : vector<64x64xbf16> to vector<16x64xbf16>
    %cst_59 = arith.constant dense<0.000000e+00> : vector<8x64xf32>
    %137 = tpu.matmul %135, %136, %cst_59 {dimension_numbers = #tpu.dot_dimension_numbers<[1], [0], [0], [1], [0, 0, 1, 1], [], []>} : vector<8x16xbf16>, vector<16x64xbf16>, vector<8x64xf32> -> vector<8x64xf32>
    %138 = arith.addf %113, %137 : vector<8x64xf32>
    %139 = vector.extract_strided_slice %38 {offsets = [8, 0], sizes = [8, 192], strides = [1, 1]} : vector<16x192xf32> to vector<8x192xf32>
    %140 = vector.extract_strided_slice %139 {offsets = [0, 0], sizes = [8, 16], strides = [1, 1]} : vector<8x192xf32> to vector<8x16xf32>
    %141 = arith.truncf %140 : vector<8x16xf32> to vector<8x16xbf16>
    %142 = vector.extract_strided_slice %139 {offsets = [0, 64], sizes = [8, 16], strides = [1, 1]} : vector<8x192xf32> to vector<8x16xf32>
    %143 = arith.truncf %142 : vector<8x16xf32> to vector<8x16xbf16>
    %144 = vector.extract_strided_slice %139 {offsets = [0, 128], sizes = [8, 16], strides = [1, 1]} : vector<8x192xf32> to vector<8x16xf32>
    %145 = arith.truncf %144 : vector<8x16xf32> to vector<8x16xbf16>
    %cst_60 = arith.constant dense<0.000000e+00> : vector<8x8xf32>
    %146 = tpu.matmul %141, %143, %cst_60 {dimension_numbers = #tpu.dot_dimension_numbers<[1], [1], [0], [0], [0, 0, 1, 0], [], []>} : vector<8x16xbf16>, vector<8x16xbf16>, vector<8x8xf32> -> vector<8x8xf32>
    %cst_61 = arith.constant 2.500000e-01 : f32
    %147 = vector.broadcast %cst_61 : f32 to vector<8x8xf32>
    %148 = arith.mulf %146, %147 : vector<8x8xf32>
    %cst_62 = arith.constant dense<0xFF800000> : vector<8xf32>
    %149 = vector.multi_reduction <maximumf>, %148, %cst_62 [1] : vector<8x8xf32> to vector<8xf32>
    %150 = vector.shape_cast %149 : vector<8xf32> to vector<8x1xf32>
    %151 = vector.broadcast %150 : vector<8x1xf32> to vector<8x8xf32>
    %152 = arith.subf %148, %151 : vector<8x8xf32>
    %153 = math.exp %152 : vector<8x8xf32>
    %cst_63 = arith.constant dense<0.000000e+00> : vector<8xf32>
    %154 = vector.multi_reduction <add>, %153, %cst_63 [1] : vector<8x8xf32> to vector<8xf32>
    %155 = vector.shape_cast %154 : vector<8xf32> to vector<8x1xf32>
    %156 = tpu.reciprocal %155 {approx = true} : vector<8x1xf32> -> vector<8x1xf32>
    %157 = vector.broadcast %156 : vector<8x1xf32> to vector<8x8xf32>
    %158 = arith.mulf %153, %157 : vector<8x8xf32>
    %159 = arith.truncf %158 : vector<8x8xf32> to vector<8x8xbf16>
    %cst_64 = arith.constant dense<0.000000e+00> : vector<8x16xf32>
    %160 = tpu.matmul %159, %145, %cst_64 {dimension_numbers = #tpu.dot_dimension_numbers<[1], [0], [0], [1], [0, 0, 1, 1], [], []>} : vector<8x8xbf16>, vector<8x16xbf16>, vector<8x16xf32> -> vector<8x16xf32>
    %161 = arith.truncf %160 : vector<8x16xf32> to vector<8x16xbf16>
    %162 = vector.extract_strided_slice %20 {offsets = [0, 0], sizes = [16, 64], strides = [1, 1]} : vector<64x64xbf16> to vector<16x64xbf16>
    %cst_65 = arith.constant dense<0.000000e+00> : vector<8x64xf32>
    %163 = tpu.matmul %161, %162, %cst_65 {dimension_numbers = #tpu.dot_dimension_numbers<[1], [0], [0], [1], [0, 0, 1, 1], [], []>} : vector<8x16xbf16>, vector<16x64xbf16>, vector<8x64xf32> -> vector<8x64xf32>
    %164 = vector.extract_strided_slice %139 {offsets = [0, 16], sizes = [8, 16], strides = [1, 1]} : vector<8x192xf32> to vector<8x16xf32>
    %165 = arith.truncf %164 : vector<8x16xf32> to vector<8x16xbf16>
    %166 = vector.extract_strided_slice %139 {offsets = [0, 80], sizes = [8, 16], strides = [1, 1]} : vector<8x192xf32> to vector<8x16xf32>
    %167 = arith.truncf %166 : vector<8x16xf32> to vector<8x16xbf16>
    %168 = vector.extract_strided_slice %139 {offsets = [0, 144], sizes = [8, 16], strides = [1, 1]} : vector<8x192xf32> to vector<8x16xf32>
    %169 = arith.truncf %168 : vector<8x16xf32> to vector<8x16xbf16>
    %cst_66 = arith.constant dense<0.000000e+00> : vector<8x8xf32>
    %170 = tpu.matmul %165, %167, %cst_66 {dimension_numbers = #tpu.dot_dimension_numbers<[1], [1], [0], [0], [0, 0, 1, 0], [], []>} : vector<8x16xbf16>, vector<8x16xbf16>, vector<8x8xf32> -> vector<8x8xf32>
    %cst_67 = arith.constant 2.500000e-01 : f32
    %171 = vector.broadcast %cst_67 : f32 to vector<8x8xf32>
    %172 = arith.mulf %170, %171 : vector<8x8xf32>
    %cst_68 = arith.constant dense<0xFF800000> : vector<8xf32>
    %173 = vector.multi_reduction <maximumf>, %172, %cst_68 [1] : vector<8x8xf32> to vector<8xf32>
    %174 = vector.shape_cast %173 : vector<8xf32> to vector<8x1xf32>
    %175 = vector.broadcast %174 : vector<8x1xf32> to vector<8x8xf32>
    %176 = arith.subf %172, %175 : vector<8x8xf32>
    %177 = math.exp %176 : vector<8x8xf32>
    %cst_69 = arith.constant dense<0.000000e+00> : vector<8xf32>
    %178 = vector.multi_reduction <add>, %177, %cst_69 [1] : vector<8x8xf32> to vector<8xf32>
    %179 = vector.shape_cast %178 : vector<8xf32> to vector<8x1xf32>
    %180 = tpu.reciprocal %179 {approx = true} : vector<8x1xf32> -> vector<8x1xf32>
    %181 = vector.broadcast %180 : vector<8x1xf32> to vector<8x8xf32>
    %182 = arith.mulf %177, %181 : vector<8x8xf32>
    %183 = arith.truncf %182 : vector<8x8xf32> to vector<8x8xbf16>
    %cst_70 = arith.constant dense<0.000000e+00> : vector<8x16xf32>
    %184 = tpu.matmul %183, %169, %cst_70 {dimension_numbers = #tpu.dot_dimension_numbers<[1], [0], [0], [1], [0, 0, 1, 1], [], []>} : vector<8x8xbf16>, vector<8x16xbf16>, vector<8x16xf32> -> vector<8x16xf32>
    %185 = arith.truncf %184 : vector<8x16xf32> to vector<8x16xbf16>
    %186 = vector.extract_strided_slice %20 {offsets = [16, 0], sizes = [16, 64], strides = [1, 1]} : vector<64x64xbf16> to vector<16x64xbf16>
    %cst_71 = arith.constant dense<0.000000e+00> : vector<8x64xf32>
    %187 = tpu.matmul %185, %186, %cst_71 {dimension_numbers = #tpu.dot_dimension_numbers<[1], [0], [0], [1], [0, 0, 1, 1], [], []>} : vector<8x16xbf16>, vector<16x64xbf16>, vector<8x64xf32> -> vector<8x64xf32>
    %188 = arith.addf %163, %187 : vector<8x64xf32>
    %189 = vector.extract_strided_slice %139 {offsets = [0, 32], sizes = [8, 16], strides = [1, 1]} : vector<8x192xf32> to vector<8x16xf32>
    %190 = arith.truncf %189 : vector<8x16xf32> to vector<8x16xbf16>
    %191 = vector.extract_strided_slice %139 {offsets = [0, 96], sizes = [8, 16], strides = [1, 1]} : vector<8x192xf32> to vector<8x16xf32>
    %192 = arith.truncf %191 : vector<8x16xf32> to vector<8x16xbf16>
    %193 = vector.extract_strided_slice %139 {offsets = [0, 160], sizes = [8, 16], strides = [1, 1]} : vector<8x192xf32> to vector<8x16xf32>
    %194 = arith.truncf %193 : vector<8x16xf32> to vector<8x16xbf16>
    %cst_72 = arith.constant dense<0.000000e+00> : vector<8x8xf32>
    %195 = tpu.matmul %190, %192, %cst_72 {dimension_numbers = #tpu.dot_dimension_numbers<[1], [1], [0], [0], [0, 0, 1, 0], [], []>} : vector<8x16xbf16>, vector<8x16xbf16>, vector<8x8xf32> -> vector<8x8xf32>
    %cst_73 = arith.constant 2.500000e-01 : f32
    %196 = vector.broadcast %cst_73 : f32 to vector<8x8xf32>
    %197 = arith.mulf %195, %196 : vector<8x8xf32>
    %cst_74 = arith.constant dense<0xFF800000> : vector<8xf32>
    %198 = vector.multi_reduction <maximumf>, %197, %cst_74 [1] : vector<8x8xf32> to vector<8xf32>
    %199 = vector.shape_cast %198 : vector<8xf32> to vector<8x1xf32>
    %200 = vector.broadcast %199 : vector<8x1xf32> to vector<8x8xf32>
    %201 = arith.subf %197, %200 : vector<8x8xf32>
    %202 = math.exp %201 : vector<8x8xf32>
    %cst_75 = arith.constant dense<0.000000e+00> : vector<8xf32>
    %203 = vector.multi_reduction <add>, %202, %cst_75 [1] : vector<8x8xf32> to vector<8xf32>
    %204 = vector.shape_cast %203 : vector<8xf32> to vector<8x1xf32>
    %205 = tpu.reciprocal %204 {approx = true} : vector<8x1xf32> -> vector<8x1xf32>
    %206 = vector.broadcast %205 : vector<8x1xf32> to vector<8x8xf32>
    %207 = arith.mulf %202, %206 : vector<8x8xf32>
    %208 = arith.truncf %207 : vector<8x8xf32> to vector<8x8xbf16>
    %cst_76 = arith.constant dense<0.000000e+00> : vector<8x16xf32>
    %209 = tpu.matmul %208, %194, %cst_76 {dimension_numbers = #tpu.dot_dimension_numbers<[1], [0], [0], [1], [0, 0, 1, 1], [], []>} : vector<8x8xbf16>, vector<8x16xbf16>, vector<8x16xf32> -> vector<8x16xf32>
    %210 = arith.truncf %209 : vector<8x16xf32> to vector<8x16xbf16>
    %211 = vector.extract_strided_slice %20 {offsets = [32, 0], sizes = [16, 64], strides = [1, 1]} : vector<64x64xbf16> to vector<16x64xbf16>
    %cst_77 = arith.constant dense<0.000000e+00> : vector<8x64xf32>
    %212 = tpu.matmul %210, %211, %cst_77 {dimension_numbers = #tpu.dot_dimension_numbers<[1], [0], [0], [1], [0, 0, 1, 1], [], []>} : vector<8x16xbf16>, vector<16x64xbf16>, vector<8x64xf32> -> vector<8x64xf32>
    %213 = arith.addf %188, %212 : vector<8x64xf32>
    %214 = vector.extract_strided_slice %139 {offsets = [0, 48], sizes = [8, 16], strides = [1, 1]} : vector<8x192xf32> to vector<8x16xf32>
    %215 = arith.truncf %214 : vector<8x16xf32> to vector<8x16xbf16>
    %216 = vector.extract_strided_slice %139 {offsets = [0, 112], sizes = [8, 16], strides = [1, 1]} : vector<8x192xf32> to vector<8x16xf32>
    %217 = arith.truncf %216 : vector<8x16xf32> to vector<8x16xbf16>
    %218 = vector.extract_strided_slice %139 {offsets = [0, 176], sizes = [8, 16], strides = [1, 1]} : vector<8x192xf32> to vector<8x16xf32>
    %219 = arith.truncf %218 : vector<8x16xf32> to vector<8x16xbf16>
    %cst_78 = arith.constant dense<0.000000e+00> : vector<8x8xf32>
    %220 = tpu.matmul %215, %217, %cst_78 {dimension_numbers = #tpu.dot_dimension_numbers<[1], [1], [0], [0], [0, 0, 1, 0], [], []>} : vector<8x16xbf16>, vector<8x16xbf16>, vector<8x8xf32> -> vector<8x8xf32>
    %cst_79 = arith.constant 2.500000e-01 : f32
    %221 = vector.broadcast %cst_79 : f32 to vector<8x8xf32>
    %222 = arith.mulf %220, %221 : vector<8x8xf32>
    %cst_80 = arith.constant dense<0xFF800000> : vector<8xf32>
    %223 = vector.multi_reduction <maximumf>, %222, %cst_80 [1] : vector<8x8xf32> to vector<8xf32>
    %224 = vector.shape_cast %223 : vector<8xf32> to vector<8x1xf32>
    %225 = vector.broadcast %224 : vector<8x1xf32> to vector<8x8xf32>
    %226 = arith.subf %222, %225 : vector<8x8xf32>
    %227 = math.exp %226 : vector<8x8xf32>
    %cst_81 = arith.constant dense<0.000000e+00> : vector<8xf32>
    %228 = vector.multi_reduction <add>, %227, %cst_81 [1] : vector<8x8xf32> to vector<8xf32>
    %229 = vector.shape_cast %228 : vector<8xf32> to vector<8x1xf32>
    %230 = tpu.reciprocal %229 {approx = true} : vector<8x1xf32> -> vector<8x1xf32>
    %231 = vector.broadcast %230 : vector<8x1xf32> to vector<8x8xf32>
    %232 = arith.mulf %227, %231 : vector<8x8xf32>
    %233 = arith.truncf %232 : vector<8x8xf32> to vector<8x8xbf16>
    %cst_82 = arith.constant dense<0.000000e+00> : vector<8x16xf32>
    %234 = tpu.matmul %233, %219, %cst_82 {dimension_numbers = #tpu.dot_dimension_numbers<[1], [0], [0], [1], [0, 0, 1, 1], [], []>} : vector<8x8xbf16>, vector<8x16xbf16>, vector<8x16xf32> -> vector<8x16xf32>
    %235 = arith.truncf %234 : vector<8x16xf32> to vector<8x16xbf16>
    %236 = vector.extract_strided_slice %20 {offsets = [48, 0], sizes = [16, 64], strides = [1, 1]} : vector<64x64xbf16> to vector<16x64xbf16>
    %cst_83 = arith.constant dense<0.000000e+00> : vector<8x64xf32>
    %237 = tpu.matmul %235, %236, %cst_83 {dimension_numbers = #tpu.dot_dimension_numbers<[1], [0], [0], [1], [0, 0, 1, 1], [], []>} : vector<8x16xbf16>, vector<16x64xbf16>, vector<8x64xf32> -> vector<8x64xf32>
    %238 = arith.addf %213, %237 : vector<8x64xf32>
    %239 = tpu.concatenate %138, %238 in 0 : vector<8x64xf32>, vector<8x64xf32> -> vector<16x64xf32>
    %240 = vector.broadcast %29 : vector<1x64xf32> to vector<16x64xf32>
    %241 = arith.addf %239, %240 : vector<16x64xf32>
    %242 = arith.addf %14, %241 : vector<16x64xf32>
    %cst_84 = arith.constant dense<0.000000e+00> : vector<16xf32>
    %243 = vector.multi_reduction <add>, %242, %cst_84 [1] : vector<16x64xf32> to vector<16xf32>
    %244 = vector.shape_cast %243 : vector<16xf32> to vector<16x1xf32>
    %cst_85 = arith.constant 6.400000e+01 : f32
    %245 = vector.broadcast %cst_85 : f32 to vector<16x1xf32>
    %246 = arith.divf %244, %245 : vector<16x1xf32>
    %247 = vector.broadcast %246 : vector<16x1xf32> to vector<16x64xf32>
    %248 = arith.subf %242, %247 : vector<16x64xf32>
    %249 = arith.mulf %248, %248 : vector<16x64xf32>
    %cst_86 = arith.constant dense<0.000000e+00> : vector<16xf32>
    %250 = vector.multi_reduction <add>, %249, %cst_86 [1] : vector<16x64xf32> to vector<16xf32>
    %251 = vector.shape_cast %250 : vector<16xf32> to vector<16x1xf32>
    %cst_87 = arith.constant 6.400000e+01 : f32
    %252 = vector.broadcast %cst_87 : f32 to vector<16x1xf32>
    %253 = arith.divf %251, %252 : vector<16x1xf32>
    %254 = vector.broadcast %246 : vector<16x1xf32> to vector<16x64xf32>
    %255 = arith.subf %242, %254 : vector<16x64xf32>
    %cst_88 = arith.constant 9.99999974E-6 : f32
    %256 = vector.broadcast %cst_88 : f32 to vector<16x1xf32>
    %257 = arith.addf %253, %256 : vector<16x1xf32>
    %258 = math.rsqrt %257 : vector<16x1xf32>
    %259 = vector.broadcast %258 : vector<16x1xf32> to vector<16x64xf32>
    %260 = arith.mulf %255, %259 : vector<16x64xf32>
    %261 = vector.broadcast %30 : vector<1x64xf32> to vector<16x64xf32>
    %262 = arith.mulf %260, %261 : vector<16x64xf32>
    %263 = vector.broadcast %31 : vector<1x64xf32> to vector<16x64xf32>
    %264 = arith.addf %262, %263 : vector<16x64xf32>
    %265 = arith.truncf %264 : vector<16x64xf32> to vector<16x64xbf16>
    %cst_89 = arith.constant dense<0.000000e+00> : vector<16x128xf32>
    %266 = tpu.matmul %265, %24, %cst_89 {dimension_numbers = #tpu.dot_dimension_numbers<[1], [0], [0], [1], [0, 0, 1, 1], [], []>} : vector<16x64xbf16>, vector<64x128xbf16>, vector<16x128xf32> -> vector<16x128xf32>
    %267 = vector.broadcast %26 : vector<1x128xf32> to vector<16x128xf32>
    %268 = arith.addf %266, %267 : vector<16x128xf32>
    %cst_90 = arith.constant 0.000000e+00 : f32
    %269 = vector.broadcast %cst_90 : f32 to vector<16x128xf32>
    %270 = arith.maximumf %268, %269 : vector<16x128xf32>
    %271 = arith.truncf %270 : vector<16x128xf32> to vector<16x128xbf16>
    %cst_91 = arith.constant dense<0.000000e+00> : vector<16x64xf32>
    %272 = tpu.matmul %271, %28, %cst_91 {dimension_numbers = #tpu.dot_dimension_numbers<[1], [0], [0], [1], [0, 0, 1, 1], [], []>} : vector<16x128xbf16>, vector<128x64xbf16>, vector<16x64xf32> -> vector<16x64xf32>
    %273 = vector.broadcast %32 : vector<1x64xf32> to vector<16x64xf32>
    %274 = arith.addf %272, %273 : vector<16x64xf32>
    %275 = arith.addf %264, %274 : vector<16x64xf32>
    %cst_92 = arith.constant dense<0.000000e+00> : vector<16xf32>
    %276 = vector.multi_reduction <add>, %275, %cst_92 [1] : vector<16x64xf32> to vector<16xf32>
    %277 = vector.shape_cast %276 : vector<16xf32> to vector<16x1xf32>
    %cst_93 = arith.constant 6.400000e+01 : f32
    %278 = vector.broadcast %cst_93 : f32 to vector<16x1xf32>
    %279 = arith.divf %277, %278 : vector<16x1xf32>
    %280 = vector.broadcast %279 : vector<16x1xf32> to vector<16x64xf32>
    %281 = arith.subf %275, %280 : vector<16x64xf32>
    %282 = arith.mulf %281, %281 : vector<16x64xf32>
    %cst_94 = arith.constant dense<0.000000e+00> : vector<16xf32>
    %283 = vector.multi_reduction <add>, %282, %cst_94 [1] : vector<16x64xf32> to vector<16xf32>
    %284 = vector.shape_cast %283 : vector<16xf32> to vector<16x1xf32>
    %cst_95 = arith.constant 6.400000e+01 : f32
    %285 = vector.broadcast %cst_95 : f32 to vector<16x1xf32>
    %286 = arith.divf %284, %285 : vector<16x1xf32>
    %287 = vector.broadcast %279 : vector<16x1xf32> to vector<16x64xf32>
    %288 = arith.subf %275, %287 : vector<16x64xf32>
    %cst_96 = arith.constant 9.99999974E-6 : f32
    %289 = vector.broadcast %cst_96 : f32 to vector<16x1xf32>
    %290 = arith.addf %286, %289 : vector<16x1xf32>
    %291 = math.rsqrt %290 : vector<16x1xf32>
    %292 = vector.broadcast %291 : vector<16x1xf32> to vector<16x64xf32>
    %293 = arith.mulf %288, %292 : vector<16x64xf32>
    %294 = vector.broadcast %33 : vector<1x64xf32> to vector<16x64xf32>
    %295 = arith.mulf %293, %294 : vector<16x64xf32>
    %296 = vector.broadcast %34 : vector<1x64xf32> to vector<16x64xf32>
    %297 = arith.addf %295, %296 : vector<16x64xf32>
    %c0_97 = arith.constant 0 : index
    %c1 = arith.constant 1 : index
    %c0_98 = arith.constant 0 : index
    %c0_99 = arith.constant 0 : index
    %298 = vector.load %arg4[%c0_97, %c1, %c0_98, %c0_99] : memref<1x2x64x192xbf16, #tpu.memory_space<vmem>>, vector<1x1x64x192xbf16>
    %299 = vector.shape_cast %298 : vector<1x1x64x192xbf16> to vector<64x192xbf16>
    %c0_100 = arith.constant 0 : index
    %c1_101 = arith.constant 1 : index
    %c0_102 = arith.constant 0 : index
    %c0_103 = arith.constant 0 : index
    %300 = vector.load %arg5[%c0_100, %c1_101, %c0_102, %c0_103] : memref<1x2x1x192xf32, #tpu.memory_space<vmem>>, vector<1x1x1x192xf32>
    %301 = vector.shape_cast %300 : vector<1x1x1x192xf32> to vector<1x192xf32>
    %c0_104 = arith.constant 0 : index
    %c1_105 = arith.constant 1 : index
    %c0_106 = arith.constant 0 : index
    %c0_107 = arith.constant 0 : index
    %302 = vector.load %arg6[%c0_104, %c1_105, %c0_106, %c0_107] : memref<1x2x64x64xbf16, #tpu.memory_space<vmem>>, vector<1x1x64x64xbf16>
    %303 = vector.shape_cast %302 : vector<1x1x64x64xbf16> to vector<64x64xbf16>
    %c0_108 = arith.constant 0 : index
    %c1_109 = arith.constant 1 : index
    %c0_110 = arith.constant 0 : index
    %c0_111 = arith.constant 0 : index
    %304 = vector.load %arg7[%c0_108, %c1_109, %c0_110, %c0_111] : memref<1x2x6x64xf32, #tpu.memory_space<vmem>>, vector<1x1x6x64xf32>
    %305 = vector.shape_cast %304 : vector<1x1x6x64xf32> to vector<6x64xf32>
    %c0_112 = arith.constant 0 : index
    %c1_113 = arith.constant 1 : index
    %c0_114 = arith.constant 0 : index
    %c0_115 = arith.constant 0 : index
    %306 = vector.load %arg8[%c0_112, %c1_113, %c0_114, %c0_115] : memref<1x2x64x128xbf16, #tpu.memory_space<vmem>>, vector<1x1x64x128xbf16>
    %307 = vector.shape_cast %306 : vector<1x1x64x128xbf16> to vector<64x128xbf16>
    %c0_116 = arith.constant 0 : index
    %c1_117 = arith.constant 1 : index
    %c0_118 = arith.constant 0 : index
    %c0_119 = arith.constant 0 : index
    %308 = vector.load %arg9[%c0_116, %c1_117, %c0_118, %c0_119] : memref<1x2x1x128xf32, #tpu.memory_space<vmem>>, vector<1x1x1x128xf32>
    %309 = vector.shape_cast %308 : vector<1x1x1x128xf32> to vector<1x128xf32>
    %c0_120 = arith.constant 0 : index
    %c1_121 = arith.constant 1 : index
    %c0_122 = arith.constant 0 : index
    %c0_123 = arith.constant 0 : index
    %310 = vector.load %arg10[%c0_120, %c1_121, %c0_122, %c0_123] : memref<1x2x128x64xbf16, #tpu.memory_space<vmem>>, vector<1x1x128x64xbf16>
    %311 = vector.shape_cast %310 : vector<1x1x128x64xbf16> to vector<128x64xbf16>
    %312 = vector.extract_strided_slice %305 {offsets = [0, 0], sizes = [1, 64], strides = [1, 1]} : vector<6x64xf32> to vector<1x64xf32>
    %313 = vector.extract_strided_slice %305 {offsets = [1, 0], sizes = [1, 64], strides = [1, 1]} : vector<6x64xf32> to vector<1x64xf32>
    %314 = vector.extract_strided_slice %305 {offsets = [2, 0], sizes = [1, 64], strides = [1, 1]} : vector<6x64xf32> to vector<1x64xf32>
    %315 = vector.extract_strided_slice %305 {offsets = [3, 0], sizes = [1, 64], strides = [1, 1]} : vector<6x64xf32> to vector<1x64xf32>
    %316 = vector.extract_strided_slice %305 {offsets = [4, 0], sizes = [1, 64], strides = [1, 1]} : vector<6x64xf32> to vector<1x64xf32>
    %317 = vector.extract_strided_slice %305 {offsets = [5, 0], sizes = [1, 64], strides = [1, 1]} : vector<6x64xf32> to vector<1x64xf32>
    %318 = arith.truncf %297 : vector<16x64xf32> to vector<16x64xbf16>
    %cst_124 = arith.constant dense<0.000000e+00> : vector<16x192xf32>
    %319 = tpu.matmul %318, %299, %cst_124 {dimension_numbers = #tpu.dot_dimension_numbers<[1], [0], [0], [1], [0, 0, 1, 1], [], []>} : vector<16x64xbf16>, vector<64x192xbf16>, vector<16x192xf32> -> vector<16x192xf32>
    %320 = vector.broadcast %301 : vector<1x192xf32> to vector<16x192xf32>
    %321 = arith.addf %319, %320 : vector<16x192xf32>
    %322 = vector.extract_strided_slice %321 {offsets = [0, 0], sizes = [8, 192], strides = [1, 1]} : vector<16x192xf32> to vector<8x192xf32>
    %323 = vector.extract_strided_slice %322 {offsets = [0, 0], sizes = [8, 16], strides = [1, 1]} : vector<8x192xf32> to vector<8x16xf32>
    %324 = arith.truncf %323 : vector<8x16xf32> to vector<8x16xbf16>
    %325 = vector.extract_strided_slice %322 {offsets = [0, 64], sizes = [8, 16], strides = [1, 1]} : vector<8x192xf32> to vector<8x16xf32>
    %326 = arith.truncf %325 : vector<8x16xf32> to vector<8x16xbf16>
    %327 = vector.extract_strided_slice %322 {offsets = [0, 128], sizes = [8, 16], strides = [1, 1]} : vector<8x192xf32> to vector<8x16xf32>
    %328 = arith.truncf %327 : vector<8x16xf32> to vector<8x16xbf16>
    %cst_125 = arith.constant dense<0.000000e+00> : vector<8x8xf32>
    %329 = tpu.matmul %324, %326, %cst_125 {dimension_numbers = #tpu.dot_dimension_numbers<[1], [1], [0], [0], [0, 0, 1, 0], [], []>} : vector<8x16xbf16>, vector<8x16xbf16>, vector<8x8xf32> -> vector<8x8xf32>
    %cst_126 = arith.constant 2.500000e-01 : f32
    %330 = vector.broadcast %cst_126 : f32 to vector<8x8xf32>
    %331 = arith.mulf %329, %330 : vector<8x8xf32>
    %cst_127 = arith.constant dense<0xFF800000> : vector<8xf32>
    %332 = vector.multi_reduction <maximumf>, %331, %cst_127 [1] : vector<8x8xf32> to vector<8xf32>
    %333 = vector.shape_cast %332 : vector<8xf32> to vector<8x1xf32>
    %334 = vector.broadcast %333 : vector<8x1xf32> to vector<8x8xf32>
    %335 = arith.subf %331, %334 : vector<8x8xf32>
    %336 = math.exp %335 : vector<8x8xf32>
    %cst_128 = arith.constant dense<0.000000e+00> : vector<8xf32>
    %337 = vector.multi_reduction <add>, %336, %cst_128 [1] : vector<8x8xf32> to vector<8xf32>
    %338 = vector.shape_cast %337 : vector<8xf32> to vector<8x1xf32>
    %339 = tpu.reciprocal %338 {approx = true} : vector<8x1xf32> -> vector<8x1xf32>
    %340 = vector.broadcast %339 : vector<8x1xf32> to vector<8x8xf32>
    %341 = arith.mulf %336, %340 : vector<8x8xf32>
    %342 = arith.truncf %341 : vector<8x8xf32> to vector<8x8xbf16>
    %cst_129 = arith.constant dense<0.000000e+00> : vector<8x16xf32>
    %343 = tpu.matmul %342, %328, %cst_129 {dimension_numbers = #tpu.dot_dimension_numbers<[1], [0], [0], [1], [0, 0, 1, 1], [], []>} : vector<8x8xbf16>, vector<8x16xbf16>, vector<8x16xf32> -> vector<8x16xf32>
    %344 = arith.truncf %343 : vector<8x16xf32> to vector<8x16xbf16>
    %345 = vector.extract_strided_slice %303 {offsets = [0, 0], sizes = [16, 64], strides = [1, 1]} : vector<64x64xbf16> to vector<16x64xbf16>
    %cst_130 = arith.constant dense<0.000000e+00> : vector<8x64xf32>
    %346 = tpu.matmul %344, %345, %cst_130 {dimension_numbers = #tpu.dot_dimension_numbers<[1], [0], [0], [1], [0, 0, 1, 1], [], []>} : vector<8x16xbf16>, vector<16x64xbf16>, vector<8x64xf32> -> vector<8x64xf32>
    %347 = vector.extract_strided_slice %322 {offsets = [0, 16], sizes = [8, 16], strides = [1, 1]} : vector<8x192xf32> to vector<8x16xf32>
    %348 = arith.truncf %347 : vector<8x16xf32> to vector<8x16xbf16>
    %349 = vector.extract_strided_slice %322 {offsets = [0, 80], sizes = [8, 16], strides = [1, 1]} : vector<8x192xf32> to vector<8x16xf32>
    %350 = arith.truncf %349 : vector<8x16xf32> to vector<8x16xbf16>
    %351 = vector.extract_strided_slice %322 {offsets = [0, 144], sizes = [8, 16], strides = [1, 1]} : vector<8x192xf32> to vector<8x16xf32>
    %352 = arith.truncf %351 : vector<8x16xf32> to vector<8x16xbf16>
    %cst_131 = arith.constant dense<0.000000e+00> : vector<8x8xf32>
    %353 = tpu.matmul %348, %350, %cst_131 {dimension_numbers = #tpu.dot_dimension_numbers<[1], [1], [0], [0], [0, 0, 1, 0], [], []>} : vector<8x16xbf16>, vector<8x16xbf16>, vector<8x8xf32> -> vector<8x8xf32>
    %cst_132 = arith.constant 2.500000e-01 : f32
    %354 = vector.broadcast %cst_132 : f32 to vector<8x8xf32>
    %355 = arith.mulf %353, %354 : vector<8x8xf32>
    %cst_133 = arith.constant dense<0xFF800000> : vector<8xf32>
    %356 = vector.multi_reduction <maximumf>, %355, %cst_133 [1] : vector<8x8xf32> to vector<8xf32>
    %357 = vector.shape_cast %356 : vector<8xf32> to vector<8x1xf32>
    %358 = vector.broadcast %357 : vector<8x1xf32> to vector<8x8xf32>
    %359 = arith.subf %355, %358 : vector<8x8xf32>
    %360 = math.exp %359 : vector<8x8xf32>
    %cst_134 = arith.constant dense<0.000000e+00> : vector<8xf32>
    %361 = vector.multi_reduction <add>, %360, %cst_134 [1] : vector<8x8xf32> to vector<8xf32>
    %362 = vector.shape_cast %361 : vector<8xf32> to vector<8x1xf32>
    %363 = tpu.reciprocal %362 {approx = true} : vector<8x1xf32> -> vector<8x1xf32>
    %364 = vector.broadcast %363 : vector<8x1xf32> to vector<8x8xf32>
    %365 = arith.mulf %360, %364 : vector<8x8xf32>
    %366 = arith.truncf %365 : vector<8x8xf32> to vector<8x8xbf16>
    %cst_135 = arith.constant dense<0.000000e+00> : vector<8x16xf32>
    %367 = tpu.matmul %366, %352, %cst_135 {dimension_numbers = #tpu.dot_dimension_numbers<[1], [0], [0], [1], [0, 0, 1, 1], [], []>} : vector<8x8xbf16>, vector<8x16xbf16>, vector<8x16xf32> -> vector<8x16xf32>
    %368 = arith.truncf %367 : vector<8x16xf32> to vector<8x16xbf16>
    %369 = vector.extract_strided_slice %303 {offsets = [16, 0], sizes = [16, 64], strides = [1, 1]} : vector<64x64xbf16> to vector<16x64xbf16>
    %cst_136 = arith.constant dense<0.000000e+00> : vector<8x64xf32>
    %370 = tpu.matmul %368, %369, %cst_136 {dimension_numbers = #tpu.dot_dimension_numbers<[1], [0], [0], [1], [0, 0, 1, 1], [], []>} : vector<8x16xbf16>, vector<16x64xbf16>, vector<8x64xf32> -> vector<8x64xf32>
    %371 = arith.addf %346, %370 : vector<8x64xf32>
    %372 = vector.extract_strided_slice %322 {offsets = [0, 32], sizes = [8, 16], strides = [1, 1]} : vector<8x192xf32> to vector<8x16xf32>
    %373 = arith.truncf %372 : vector<8x16xf32> to vector<8x16xbf16>
    %374 = vector.extract_strided_slice %322 {offsets = [0, 96], sizes = [8, 16], strides = [1, 1]} : vector<8x192xf32> to vector<8x16xf32>
    %375 = arith.truncf %374 : vector<8x16xf32> to vector<8x16xbf16>
    %376 = vector.extract_strided_slice %322 {offsets = [0, 160], sizes = [8, 16], strides = [1, 1]} : vector<8x192xf32> to vector<8x16xf32>
    %377 = arith.truncf %376 : vector<8x16xf32> to vector<8x16xbf16>
    %cst_137 = arith.constant dense<0.000000e+00> : vector<8x8xf32>
    %378 = tpu.matmul %373, %375, %cst_137 {dimension_numbers = #tpu.dot_dimension_numbers<[1], [1], [0], [0], [0, 0, 1, 0], [], []>} : vector<8x16xbf16>, vector<8x16xbf16>, vector<8x8xf32> -> vector<8x8xf32>
    %cst_138 = arith.constant 2.500000e-01 : f32
    %379 = vector.broadcast %cst_138 : f32 to vector<8x8xf32>
    %380 = arith.mulf %378, %379 : vector<8x8xf32>
    %cst_139 = arith.constant dense<0xFF800000> : vector<8xf32>
    %381 = vector.multi_reduction <maximumf>, %380, %cst_139 [1] : vector<8x8xf32> to vector<8xf32>
    %382 = vector.shape_cast %381 : vector<8xf32> to vector<8x1xf32>
    %383 = vector.broadcast %382 : vector<8x1xf32> to vector<8x8xf32>
    %384 = arith.subf %380, %383 : vector<8x8xf32>
    %385 = math.exp %384 : vector<8x8xf32>
    %cst_140 = arith.constant dense<0.000000e+00> : vector<8xf32>
    %386 = vector.multi_reduction <add>, %385, %cst_140 [1] : vector<8x8xf32> to vector<8xf32>
    %387 = vector.shape_cast %386 : vector<8xf32> to vector<8x1xf32>
    %388 = tpu.reciprocal %387 {approx = true} : vector<8x1xf32> -> vector<8x1xf32>
    %389 = vector.broadcast %388 : vector<8x1xf32> to vector<8x8xf32>
    %390 = arith.mulf %385, %389 : vector<8x8xf32>
    %391 = arith.truncf %390 : vector<8x8xf32> to vector<8x8xbf16>
    %cst_141 = arith.constant dense<0.000000e+00> : vector<8x16xf32>
    %392 = tpu.matmul %391, %377, %cst_141 {dimension_numbers = #tpu.dot_dimension_numbers<[1], [0], [0], [1], [0, 0, 1, 1], [], []>} : vector<8x8xbf16>, vector<8x16xbf16>, vector<8x16xf32> -> vector<8x16xf32>
    %393 = arith.truncf %392 : vector<8x16xf32> to vector<8x16xbf16>
    %394 = vector.extract_strided_slice %303 {offsets = [32, 0], sizes = [16, 64], strides = [1, 1]} : vector<64x64xbf16> to vector<16x64xbf16>
    %cst_142 = arith.constant dense<0.000000e+00> : vector<8x64xf32>
    %395 = tpu.matmul %393, %394, %cst_142 {dimension_numbers = #tpu.dot_dimension_numbers<[1], [0], [0], [1], [0, 0, 1, 1], [], []>} : vector<8x16xbf16>, vector<16x64xbf16>, vector<8x64xf32> -> vector<8x64xf32>
    %396 = arith.addf %371, %395 : vector<8x64xf32>
    %397 = vector.extract_strided_slice %322 {offsets = [0, 48], sizes = [8, 16], strides = [1, 1]} : vector<8x192xf32> to vector<8x16xf32>
    %398 = arith.truncf %397 : vector<8x16xf32> to vector<8x16xbf16>
    %399 = vector.extract_strided_slice %322 {offsets = [0, 112], sizes = [8, 16], strides = [1, 1]} : vector<8x192xf32> to vector<8x16xf32>
    %400 = arith.truncf %399 : vector<8x16xf32> to vector<8x16xbf16>
    %401 = vector.extract_strided_slice %322 {offsets = [0, 176], sizes = [8, 16], strides = [1, 1]} : vector<8x192xf32> to vector<8x16xf32>
    %402 = arith.truncf %401 : vector<8x16xf32> to vector<8x16xbf16>
    %cst_143 = arith.constant dense<0.000000e+00> : vector<8x8xf32>
    %403 = tpu.matmul %398, %400, %cst_143 {dimension_numbers = #tpu.dot_dimension_numbers<[1], [1], [0], [0], [0, 0, 1, 0], [], []>} : vector<8x16xbf16>, vector<8x16xbf16>, vector<8x8xf32> -> vector<8x8xf32>
    %cst_144 = arith.constant 2.500000e-01 : f32
    %404 = vector.broadcast %cst_144 : f32 to vector<8x8xf32>
    %405 = arith.mulf %403, %404 : vector<8x8xf32>
    %cst_145 = arith.constant dense<0xFF800000> : vector<8xf32>
    %406 = vector.multi_reduction <maximumf>, %405, %cst_145 [1] : vector<8x8xf32> to vector<8xf32>
    %407 = vector.shape_cast %406 : vector<8xf32> to vector<8x1xf32>
    %408 = vector.broadcast %407 : vector<8x1xf32> to vector<8x8xf32>
    %409 = arith.subf %405, %408 : vector<8x8xf32>
    %410 = math.exp %409 : vector<8x8xf32>
    %cst_146 = arith.constant dense<0.000000e+00> : vector<8xf32>
    %411 = vector.multi_reduction <add>, %410, %cst_146 [1] : vector<8x8xf32> to vector<8xf32>
    %412 = vector.shape_cast %411 : vector<8xf32> to vector<8x1xf32>
    %413 = tpu.reciprocal %412 {approx = true} : vector<8x1xf32> -> vector<8x1xf32>
    %414 = vector.broadcast %413 : vector<8x1xf32> to vector<8x8xf32>
    %415 = arith.mulf %410, %414 : vector<8x8xf32>
    %416 = arith.truncf %415 : vector<8x8xf32> to vector<8x8xbf16>
    %cst_147 = arith.constant dense<0.000000e+00> : vector<8x16xf32>
    %417 = tpu.matmul %416, %402, %cst_147 {dimension_numbers = #tpu.dot_dimension_numbers<[1], [0], [0], [1], [0, 0, 1, 1], [], []>} : vector<8x8xbf16>, vector<8x16xbf16>, vector<8x16xf32> -> vector<8x16xf32>
    %418 = arith.truncf %417 : vector<8x16xf32> to vector<8x16xbf16>
    %419 = vector.extract_strided_slice %303 {offsets = [48, 0], sizes = [16, 64], strides = [1, 1]} : vector<64x64xbf16> to vector<16x64xbf16>
    %cst_148 = arith.constant dense<0.000000e+00> : vector<8x64xf32>
    %420 = tpu.matmul %418, %419, %cst_148 {dimension_numbers = #tpu.dot_dimension_numbers<[1], [0], [0], [1], [0, 0, 1, 1], [], []>} : vector<8x16xbf16>, vector<16x64xbf16>, vector<8x64xf32> -> vector<8x64xf32>
    %421 = arith.addf %396, %420 : vector<8x64xf32>
    %422 = vector.extract_strided_slice %321 {offsets = [8, 0], sizes = [8, 192], strides = [1, 1]} : vector<16x192xf32> to vector<8x192xf32>
    %423 = vector.extract_strided_slice %422 {offsets = [0, 0], sizes = [8, 16], strides = [1, 1]} : vector<8x192xf32> to vector<8x16xf32>
    %424 = arith.truncf %423 : vector<8x16xf32> to vector<8x16xbf16>
    %425 = vector.extract_strided_slice %422 {offsets = [0, 64], sizes = [8, 16], strides = [1, 1]} : vector<8x192xf32> to vector<8x16xf32>
    %426 = arith.truncf %425 : vector<8x16xf32> to vector<8x16xbf16>
    %427 = vector.extract_strided_slice %422 {offsets = [0, 128], sizes = [8, 16], strides = [1, 1]} : vector<8x192xf32> to vector<8x16xf32>
    %428 = arith.truncf %427 : vector<8x16xf32> to vector<8x16xbf16>
    %cst_149 = arith.constant dense<0.000000e+00> : vector<8x8xf32>
    %429 = tpu.matmul %424, %426, %cst_149 {dimension_numbers = #tpu.dot_dimension_numbers<[1], [1], [0], [0], [0, 0, 1, 0], [], []>} : vector<8x16xbf16>, vector<8x16xbf16>, vector<8x8xf32> -> vector<8x8xf32>
    %cst_150 = arith.constant 2.500000e-01 : f32
    %430 = vector.broadcast %cst_150 : f32 to vector<8x8xf32>
    %431 = arith.mulf %429, %430 : vector<8x8xf32>
    %cst_151 = arith.constant dense<0xFF800000> : vector<8xf32>
    %432 = vector.multi_reduction <maximumf>, %431, %cst_151 [1] : vector<8x8xf32> to vector<8xf32>
    %433 = vector.shape_cast %432 : vector<8xf32> to vector<8x1xf32>
    %434 = vector.broadcast %433 : vector<8x1xf32> to vector<8x8xf32>
    %435 = arith.subf %431, %434 : vector<8x8xf32>
    %436 = math.exp %435 : vector<8x8xf32>
    %cst_152 = arith.constant dense<0.000000e+00> : vector<8xf32>
    %437 = vector.multi_reduction <add>, %436, %cst_152 [1] : vector<8x8xf32> to vector<8xf32>
    %438 = vector.shape_cast %437 : vector<8xf32> to vector<8x1xf32>
    %439 = tpu.reciprocal %438 {approx = true} : vector<8x1xf32> -> vector<8x1xf32>
    %440 = vector.broadcast %439 : vector<8x1xf32> to vector<8x8xf32>
    %441 = arith.mulf %436, %440 : vector<8x8xf32>
    %442 = arith.truncf %441 : vector<8x8xf32> to vector<8x8xbf16>
    %cst_153 = arith.constant dense<0.000000e+00> : vector<8x16xf32>
    %443 = tpu.matmul %442, %428, %cst_153 {dimension_numbers = #tpu.dot_dimension_numbers<[1], [0], [0], [1], [0, 0, 1, 1], [], []>} : vector<8x8xbf16>, vector<8x16xbf16>, vector<8x16xf32> -> vector<8x16xf32>
    %444 = arith.truncf %443 : vector<8x16xf32> to vector<8x16xbf16>
    %445 = vector.extract_strided_slice %303 {offsets = [0, 0], sizes = [16, 64], strides = [1, 1]} : vector<64x64xbf16> to vector<16x64xbf16>
    %cst_154 = arith.constant dense<0.000000e+00> : vector<8x64xf32>
    %446 = tpu.matmul %444, %445, %cst_154 {dimension_numbers = #tpu.dot_dimension_numbers<[1], [0], [0], [1], [0, 0, 1, 1], [], []>} : vector<8x16xbf16>, vector<16x64xbf16>, vector<8x64xf32> -> vector<8x64xf32>
    %447 = vector.extract_strided_slice %422 {offsets = [0, 16], sizes = [8, 16], strides = [1, 1]} : vector<8x192xf32> to vector<8x16xf32>
    %448 = arith.truncf %447 : vector<8x16xf32> to vector<8x16xbf16>
    %449 = vector.extract_strided_slice %422 {offsets = [0, 80], sizes = [8, 16], strides = [1, 1]} : vector<8x192xf32> to vector<8x16xf32>
    %450 = arith.truncf %449 : vector<8x16xf32> to vector<8x16xbf16>
    %451 = vector.extract_strided_slice %422 {offsets = [0, 144], sizes = [8, 16], strides = [1, 1]} : vector<8x192xf32> to vector<8x16xf32>
    %452 = arith.truncf %451 : vector<8x16xf32> to vector<8x16xbf16>
    %cst_155 = arith.constant dense<0.000000e+00> : vector<8x8xf32>
    %453 = tpu.matmul %448, %450, %cst_155 {dimension_numbers = #tpu.dot_dimension_numbers<[1], [1], [0], [0], [0, 0, 1, 0], [], []>} : vector<8x16xbf16>, vector<8x16xbf16>, vector<8x8xf32> -> vector<8x8xf32>
    %cst_156 = arith.constant 2.500000e-01 : f32
    %454 = vector.broadcast %cst_156 : f32 to vector<8x8xf32>
    %455 = arith.mulf %453, %454 : vector<8x8xf32>
    %cst_157 = arith.constant dense<0xFF800000> : vector<8xf32>
    %456 = vector.multi_reduction <maximumf>, %455, %cst_157 [1] : vector<8x8xf32> to vector<8xf32>
    %457 = vector.shape_cast %456 : vector<8xf32> to vector<8x1xf32>
    %458 = vector.broadcast %457 : vector<8x1xf32> to vector<8x8xf32>
    %459 = arith.subf %455, %458 : vector<8x8xf32>
    %460 = math.exp %459 : vector<8x8xf32>
    %cst_158 = arith.constant dense<0.000000e+00> : vector<8xf32>
    %461 = vector.multi_reduction <add>, %460, %cst_158 [1] : vector<8x8xf32> to vector<8xf32>
    %462 = vector.shape_cast %461 : vector<8xf32> to vector<8x1xf32>
    %463 = tpu.reciprocal %462 {approx = true} : vector<8x1xf32> -> vector<8x1xf32>
    %464 = vector.broadcast %463 : vector<8x1xf32> to vector<8x8xf32>
    %465 = arith.mulf %460, %464 : vector<8x8xf32>
    %466 = arith.truncf %465 : vector<8x8xf32> to vector<8x8xbf16>
    %cst_159 = arith.constant dense<0.000000e+00> : vector<8x16xf32>
    %467 = tpu.matmul %466, %452, %cst_159 {dimension_numbers = #tpu.dot_dimension_numbers<[1], [0], [0], [1], [0, 0, 1, 1], [], []>} : vector<8x8xbf16>, vector<8x16xbf16>, vector<8x16xf32> -> vector<8x16xf32>
    %468 = arith.truncf %467 : vector<8x16xf32> to vector<8x16xbf16>
    %469 = vector.extract_strided_slice %303 {offsets = [16, 0], sizes = [16, 64], strides = [1, 1]} : vector<64x64xbf16> to vector<16x64xbf16>
    %cst_160 = arith.constant dense<0.000000e+00> : vector<8x64xf32>
    %470 = tpu.matmul %468, %469, %cst_160 {dimension_numbers = #tpu.dot_dimension_numbers<[1], [0], [0], [1], [0, 0, 1, 1], [], []>} : vector<8x16xbf16>, vector<16x64xbf16>, vector<8x64xf32> -> vector<8x64xf32>
    %471 = arith.addf %446, %470 : vector<8x64xf32>
    %472 = vector.extract_strided_slice %422 {offsets = [0, 32], sizes = [8, 16], strides = [1, 1]} : vector<8x192xf32> to vector<8x16xf32>
    %473 = arith.truncf %472 : vector<8x16xf32> to vector<8x16xbf16>
    %474 = vector.extract_strided_slice %422 {offsets = [0, 96], sizes = [8, 16], strides = [1, 1]} : vector<8x192xf32> to vector<8x16xf32>
    %475 = arith.truncf %474 : vector<8x16xf32> to vector<8x16xbf16>
    %476 = vector.extract_strided_slice %422 {offsets = [0, 160], sizes = [8, 16], strides = [1, 1]} : vector<8x192xf32> to vector<8x16xf32>
    %477 = arith.truncf %476 : vector<8x16xf32> to vector<8x16xbf16>
    %cst_161 = arith.constant dense<0.000000e+00> : vector<8x8xf32>
    %478 = tpu.matmul %473, %475, %cst_161 {dimension_numbers = #tpu.dot_dimension_numbers<[1], [1], [0], [0], [0, 0, 1, 0], [], []>} : vector<8x16xbf16>, vector<8x16xbf16>, vector<8x8xf32> -> vector<8x8xf32>
    %cst_162 = arith.constant 2.500000e-01 : f32
    %479 = vector.broadcast %cst_162 : f32 to vector<8x8xf32>
    %480 = arith.mulf %478, %479 : vector<8x8xf32>
    %cst_163 = arith.constant dense<0xFF800000> : vector<8xf32>
    %481 = vector.multi_reduction <maximumf>, %480, %cst_163 [1] : vector<8x8xf32> to vector<8xf32>
    %482 = vector.shape_cast %481 : vector<8xf32> to vector<8x1xf32>
    %483 = vector.broadcast %482 : vector<8x1xf32> to vector<8x8xf32>
    %484 = arith.subf %480, %483 : vector<8x8xf32>
    %485 = math.exp %484 : vector<8x8xf32>
    %cst_164 = arith.constant dense<0.000000e+00> : vector<8xf32>
    %486 = vector.multi_reduction <add>, %485, %cst_164 [1] : vector<8x8xf32> to vector<8xf32>
    %487 = vector.shape_cast %486 : vector<8xf32> to vector<8x1xf32>
    %488 = tpu.reciprocal %487 {approx = true} : vector<8x1xf32> -> vector<8x1xf32>
    %489 = vector.broadcast %488 : vector<8x1xf32> to vector<8x8xf32>
    %490 = arith.mulf %485, %489 : vector<8x8xf32>
    %491 = arith.truncf %490 : vector<8x8xf32> to vector<8x8xbf16>
    %cst_165 = arith.constant dense<0.000000e+00> : vector<8x16xf32>
    %492 = tpu.matmul %491, %477, %cst_165 {dimension_numbers = #tpu.dot_dimension_numbers<[1], [0], [0], [1], [0, 0, 1, 1], [], []>} : vector<8x8xbf16>, vector<8x16xbf16>, vector<8x16xf32> -> vector<8x16xf32>
    %493 = arith.truncf %492 : vector<8x16xf32> to vector<8x16xbf16>
    %494 = vector.extract_strided_slice %303 {offsets = [32, 0], sizes = [16, 64], strides = [1, 1]} : vector<64x64xbf16> to vector<16x64xbf16>
    %cst_166 = arith.constant dense<0.000000e+00> : vector<8x64xf32>
    %495 = tpu.matmul %493, %494, %cst_166 {dimension_numbers = #tpu.dot_dimension_numbers<[1], [0], [0], [1], [0, 0, 1, 1], [], []>} : vector<8x16xbf16>, vector<16x64xbf16>, vector<8x64xf32> -> vector<8x64xf32>
    %496 = arith.addf %471, %495 : vector<8x64xf32>
    %497 = vector.extract_strided_slice %422 {offsets = [0, 48], sizes = [8, 16], strides = [1, 1]} : vector<8x192xf32> to vector<8x16xf32>
    %498 = arith.truncf %497 : vector<8x16xf32> to vector<8x16xbf16>
    %499 = vector.extract_strided_slice %422 {offsets = [0, 112], sizes = [8, 16], strides = [1, 1]} : vector<8x192xf32> to vector<8x16xf32>
    %500 = arith.truncf %499 : vector<8x16xf32> to vector<8x16xbf16>
    %501 = vector.extract_strided_slice %422 {offsets = [0, 176], sizes = [8, 16], strides = [1, 1]} : vector<8x192xf32> to vector<8x16xf32>
    %502 = arith.truncf %501 : vector<8x16xf32> to vector<8x16xbf16>
    %cst_167 = arith.constant dense<0.000000e+00> : vector<8x8xf32>
    %503 = tpu.matmul %498, %500, %cst_167 {dimension_numbers = #tpu.dot_dimension_numbers<[1], [1], [0], [0], [0, 0, 1, 0], [], []>} : vector<8x16xbf16>, vector<8x16xbf16>, vector<8x8xf32> -> vector<8x8xf32>
    %cst_168 = arith.constant 2.500000e-01 : f32
    %504 = vector.broadcast %cst_168 : f32 to vector<8x8xf32>
    %505 = arith.mulf %503, %504 : vector<8x8xf32>
    %cst_169 = arith.constant dense<0xFF800000> : vector<8xf32>
    %506 = vector.multi_reduction <maximumf>, %505, %cst_169 [1] : vector<8x8xf32> to vector<8xf32>
    %507 = vector.shape_cast %506 : vector<8xf32> to vector<8x1xf32>
    %508 = vector.broadcast %507 : vector<8x1xf32> to vector<8x8xf32>
    %509 = arith.subf %505, %508 : vector<8x8xf32>
    %510 = math.exp %509 : vector<8x8xf32>
    %cst_170 = arith.constant dense<0.000000e+00> : vector<8xf32>
    %511 = vector.multi_reduction <add>, %510, %cst_170 [1] : vector<8x8xf32> to vector<8xf32>
    %512 = vector.shape_cast %511 : vector<8xf32> to vector<8x1xf32>
    %513 = tpu.reciprocal %512 {approx = true} : vector<8x1xf32> -> vector<8x1xf32>
    %514 = vector.broadcast %513 : vector<8x1xf32> to vector<8x8xf32>
    %515 = arith.mulf %510, %514 : vector<8x8xf32>
    %516 = arith.truncf %515 : vector<8x8xf32> to vector<8x8xbf16>
    %cst_171 = arith.constant dense<0.000000e+00> : vector<8x16xf32>
    %517 = tpu.matmul %516, %502, %cst_171 {dimension_numbers = #tpu.dot_dimension_numbers<[1], [0], [0], [1], [0, 0, 1, 1], [], []>} : vector<8x8xbf16>, vector<8x16xbf16>, vector<8x16xf32> -> vector<8x16xf32>
    %518 = arith.truncf %517 : vector<8x16xf32> to vector<8x16xbf16>
    %519 = vector.extract_strided_slice %303 {offsets = [48, 0], sizes = [16, 64], strides = [1, 1]} : vector<64x64xbf16> to vector<16x64xbf16>
    %cst_172 = arith.constant dense<0.000000e+00> : vector<8x64xf32>
    %520 = tpu.matmul %518, %519, %cst_172 {dimension_numbers = #tpu.dot_dimension_numbers<[1], [0], [0], [1], [0, 0, 1, 1], [], []>} : vector<8x16xbf16>, vector<16x64xbf16>, vector<8x64xf32> -> vector<8x64xf32>
    %521 = arith.addf %496, %520 : vector<8x64xf32>
    %522 = tpu.concatenate %421, %521 in 0 : vector<8x64xf32>, vector<8x64xf32> -> vector<16x64xf32>
    %523 = vector.broadcast %312 : vector<1x64xf32> to vector<16x64xf32>
    %524 = arith.addf %522, %523 : vector<16x64xf32>
    %525 = arith.addf %297, %524 : vector<16x64xf32>
    %cst_173 = arith.constant dense<0.000000e+00> : vector<16xf32>
    %526 = vector.multi_reduction <add>, %525, %cst_173 [1] : vector<16x64xf32> to vector<16xf32>
    %527 = vector.shape_cast %526 : vector<16xf32> to vector<16x1xf32>
    %cst_174 = arith.constant 6.400000e+01 : f32
    %528 = vector.broadcast %cst_174 : f32 to vector<16x1xf32>
    %529 = arith.divf %527, %528 : vector<16x1xf32>
    %530 = vector.broadcast %529 : vector<16x1xf32> to vector<16x64xf32>
    %531 = arith.subf %525, %530 : vector<16x64xf32>
    %532 = arith.mulf %531, %531 : vector<16x64xf32>
    %cst_175 = arith.constant dense<0.000000e+00> : vector<16xf32>
    %533 = vector.multi_reduction <add>, %532, %cst_175 [1] : vector<16x64xf32> to vector<16xf32>
    %534 = vector.shape_cast %533 : vector<16xf32> to vector<16x1xf32>
    %cst_176 = arith.constant 6.400000e+01 : f32
    %535 = vector.broadcast %cst_176 : f32 to vector<16x1xf32>
    %536 = arith.divf %534, %535 : vector<16x1xf32>
    %537 = vector.broadcast %529 : vector<16x1xf32> to vector<16x64xf32>
    %538 = arith.subf %525, %537 : vector<16x64xf32>
    %cst_177 = arith.constant 9.99999974E-6 : f32
    %539 = vector.broadcast %cst_177 : f32 to vector<16x1xf32>
    %540 = arith.addf %536, %539 : vector<16x1xf32>
    %541 = math.rsqrt %540 : vector<16x1xf32>
    %542 = vector.broadcast %541 : vector<16x1xf32> to vector<16x64xf32>
    %543 = arith.mulf %538, %542 : vector<16x64xf32>
    %544 = vector.broadcast %313 : vector<1x64xf32> to vector<16x64xf32>
    %545 = arith.mulf %543, %544 : vector<16x64xf32>
    %546 = vector.broadcast %314 : vector<1x64xf32> to vector<16x64xf32>
    %547 = arith.addf %545, %546 : vector<16x64xf32>
    %548 = arith.truncf %547 : vector<16x64xf32> to vector<16x64xbf16>
    %cst_178 = arith.constant dense<0.000000e+00> : vector<16x128xf32>
    %549 = tpu.matmul %548, %307, %cst_178 {dimension_numbers = #tpu.dot_dimension_numbers<[1], [0], [0], [1], [0, 0, 1, 1], [], []>} : vector<16x64xbf16>, vector<64x128xbf16>, vector<16x128xf32> -> vector<16x128xf32>
    %550 = vector.broadcast %309 : vector<1x128xf32> to vector<16x128xf32>
    %551 = arith.addf %549, %550 : vector<16x128xf32>
    %cst_179 = arith.constant 0.000000e+00 : f32
    %552 = vector.broadcast %cst_179 : f32 to vector<16x128xf32>
    %553 = arith.maximumf %551, %552 : vector<16x128xf32>
    %554 = arith.truncf %553 : vector<16x128xf32> to vector<16x128xbf16>
    %cst_180 = arith.constant dense<0.000000e+00> : vector<16x64xf32>
    %555 = tpu.matmul %554, %311, %cst_180 {dimension_numbers = #tpu.dot_dimension_numbers<[1], [0], [0], [1], [0, 0, 1, 1], [], []>} : vector<16x128xbf16>, vector<128x64xbf16>, vector<16x64xf32> -> vector<16x64xf32>
    %556 = vector.broadcast %315 : vector<1x64xf32> to vector<16x64xf32>
    %557 = arith.addf %555, %556 : vector<16x64xf32>
    %558 = arith.addf %547, %557 : vector<16x64xf32>
    %cst_181 = arith.constant dense<0.000000e+00> : vector<16xf32>
    %559 = vector.multi_reduction <add>, %558, %cst_181 [1] : vector<16x64xf32> to vector<16xf32>
    %560 = vector.shape_cast %559 : vector<16xf32> to vector<16x1xf32>
    %cst_182 = arith.constant 6.400000e+01 : f32
    %561 = vector.broadcast %cst_182 : f32 to vector<16x1xf32>
    %562 = arith.divf %560, %561 : vector<16x1xf32>
    %563 = vector.broadcast %562 : vector<16x1xf32> to vector<16x64xf32>
    %564 = arith.subf %558, %563 : vector<16x64xf32>
    %565 = arith.mulf %564, %564 : vector<16x64xf32>
    %cst_183 = arith.constant dense<0.000000e+00> : vector<16xf32>
    %566 = vector.multi_reduction <add>, %565, %cst_183 [1] : vector<16x64xf32> to vector<16xf32>
    %567 = vector.shape_cast %566 : vector<16xf32> to vector<16x1xf32>
    %cst_184 = arith.constant 6.400000e+01 : f32
    %568 = vector.broadcast %cst_184 : f32 to vector<16x1xf32>
    %569 = arith.divf %567, %568 : vector<16x1xf32>
    %570 = vector.broadcast %562 : vector<16x1xf32> to vector<16x64xf32>
    %571 = arith.subf %558, %570 : vector<16x64xf32>
    %cst_185 = arith.constant 9.99999974E-6 : f32
    %572 = vector.broadcast %cst_185 : f32 to vector<16x1xf32>
    %573 = arith.addf %569, %572 : vector<16x1xf32>
    %574 = math.rsqrt %573 : vector<16x1xf32>
    %575 = vector.broadcast %574 : vector<16x1xf32> to vector<16x64xf32>
    %576 = arith.mulf %571, %575 : vector<16x64xf32>
    %577 = vector.broadcast %316 : vector<1x64xf32> to vector<16x64xf32>
    %578 = arith.mulf %576, %577 : vector<16x64xf32>
    %579 = vector.broadcast %317 : vector<1x64xf32> to vector<16x64xf32>
    %580 = arith.addf %578, %579 : vector<16x64xf32>
    %581 = vector.extract_strided_slice %580 {offsets = [0, 0], sizes = [8, 64], strides = [1, 1]} : vector<16x64xf32> to vector<8x64xf32>
    %cst_186 = arith.constant dense<0.000000e+00> : vector<64xf32>
    %582 = vector.multi_reduction <add>, %581, %cst_186 [0] : vector<8x64xf32> to vector<64xf32>
    %583 = vector.shape_cast %582 : vector<64xf32> to vector<1x64xf32>
    %cst_187 = arith.constant 8.000000e+00 : f32
    %584 = vector.broadcast %cst_187 : f32 to vector<1x64xf32>
    %585 = arith.divf %583, %584 : vector<1x64xf32>
    %c0_i32 = arith.constant 0 : i32
    %586 = arith.addi %c0_i32, %arg0 : i32
    %587 = arith.index_cast %586 : i32 to index
    %c0_188 = arith.constant 0 : index
    %588 = vector.load %arg25[%587, %c0_188] : memref<6x64xf32, #tpu.memory_space<vmem>>, vector<1x64xf32>
    tpu.vector_store %arg25[%587, %c0_188], %585 {strides = array<i32>} : memref<6x64xf32, #tpu.memory_space<vmem>>, vector<1x64xf32>,
    %589 = vector.extract_strided_slice %580 {offsets = [8, 0], sizes = [8, 64], strides = [1, 1]} : vector<16x64xf32> to vector<8x64xf32>
    %cst_189 = arith.constant dense<0.000000e+00> : vector<64xf32>
    %590 = vector.multi_reduction <add>, %589, %cst_189 [0] : vector<8x64xf32> to vector<64xf32>
    %591 = vector.shape_cast %590 : vector<64xf32> to vector<1x64xf32>
    %cst_190 = arith.constant 8.000000e+00 : f32
    %592 = vector.broadcast %cst_190 : f32 to vector<1x64xf32>
    %593 = arith.divf %591, %592 : vector<1x64xf32>
    %c3_i32 = arith.constant 3 : i32
    %594 = arith.addi %c3_i32, %arg0 : i32
    %595 = arith.index_cast %594 : i32 to index
    %c0_191 = arith.constant 0 : index
    %596 = vector.load %arg25[%595, %c0_191] : memref<6x64xf32, #tpu.memory_space<vmem>>, vector<1x64xf32>
    tpu.vector_store %arg25[%595, %c0_191], %593 {strides = array<i32>} : memref<6x64xf32, #tpu.memory_space<vmem>>, vector<1x64xf32>,
    %c2_i32 = arith.constant 2 : i32
    %597 = arith.cmpi eq, %arg0, %c2_i32 : i32
    %598 = arith.extui %597 : i1 to i32
    %c0_i32_192 = arith.constant 0 : i32
    %599 = arith.cmpi ne, %598, %c0_i32_192 : i32
    scf.if %599 {
      %c0_193 = arith.constant 0 : index
      %c0_194 = arith.constant 0 : index
      %600 = vector.load %arg25[%c0_193, %c0_194] : memref<6x64xf32, #tpu.memory_space<vmem>>, vector<6x64xf32>
      %c0_195 = arith.constant 0 : index
      %c0_196 = arith.constant 0 : index
      %601 = vector.load %arg11[%c0_195, %c0_196] : memref<64x192xbf16, #tpu.memory_space<vmem>>, vector<64x192xbf16>
      %c0_197 = arith.constant 0 : index
      %c0_198 = arith.constant 0 : index
      %602 = vector.load %arg12[%c0_197, %c0_198] : memref<1x192xf32, #tpu.memory_space<vmem>>, vector<1x192xf32>
      %c0_199 = arith.constant 0 : index
      %c0_200 = arith.constant 0 : index
      %603 = vector.load %arg13[%c0_199, %c0_200] : memref<64x64xbf16, #tpu.memory_space<vmem>>, vector<64x64xbf16>
      %c0_201 = arith.constant 0 : index
      %c0_202 = arith.constant 0 : index
      %604 = vector.load %arg14[%c0_201, %c0_202] : memref<6x64xf32, #tpu.memory_space<vmem>>, vector<6x64xf32>
      %c0_203 = arith.constant 0 : index
      %c0_204 = arith.constant 0 : index
      %605 = vector.load %arg15[%c0_203, %c0_204] : memref<64x128xbf16, #tpu.memory_space<vmem>>, vector<64x128xbf16>
      %c0_205 = arith.constant 0 : index
      %c0_206 = arith.constant 0 : index
      %606 = vector.load %arg16[%c0_205, %c0_206] : memref<1x128xf32, #tpu.memory_space<vmem>>, vector<1x128xf32>
      %c0_207 = arith.constant 0 : index
      %c0_208 = arith.constant 0 : index
      %607 = vector.load %arg17[%c0_207, %c0_208] : memref<128x64xbf16, #tpu.memory_space<vmem>>, vector<128x64xbf16>
      %608 = vector.extract_strided_slice %604 {offsets = [0, 0], sizes = [1, 64], strides = [1, 1]} : vector<6x64xf32> to vector<1x64xf32>
      %609 = vector.extract_strided_slice %604 {offsets = [1, 0], sizes = [1, 64], strides = [1, 1]} : vector<6x64xf32> to vector<1x64xf32>
      %610 = vector.extract_strided_slice %604 {offsets = [2, 0], sizes = [1, 64], strides = [1, 1]} : vector<6x64xf32> to vector<1x64xf32>
      %611 = vector.extract_strided_slice %604 {offsets = [3, 0], sizes = [1, 64], strides = [1, 1]} : vector<6x64xf32> to vector<1x64xf32>
      %612 = vector.extract_strided_slice %604 {offsets = [4, 0], sizes = [1, 64], strides = [1, 1]} : vector<6x64xf32> to vector<1x64xf32>
      %613 = vector.extract_strided_slice %604 {offsets = [5, 0], sizes = [1, 64], strides = [1, 1]} : vector<6x64xf32> to vector<1x64xf32>
      %614 = arith.truncf %600 : vector<6x64xf32> to vector<6x64xbf16>
      %cst_209 = arith.constant dense<0.000000e+00> : vector<6x192xf32>
      %615 = tpu.matmul %614, %601, %cst_209 {dimension_numbers = #tpu.dot_dimension_numbers<[1], [0], [0], [1], [0, 0, 1, 1], [], []>} : vector<6x64xbf16>, vector<64x192xbf16>, vector<6x192xf32> -> vector<6x192xf32>
      %616 = vector.broadcast %602 : vector<1x192xf32> to vector<6x192xf32>
      %617 = arith.addf %615, %616 : vector<6x192xf32>
      %618 = vector.extract_strided_slice %617 {offsets = [0, 0], sizes = [3, 192], strides = [1, 1]} : vector<6x192xf32> to vector<3x192xf32>
      %619 = vector.extract_strided_slice %618 {offsets = [0, 0], sizes = [3, 16], strides = [1, 1]} : vector<3x192xf32> to vector<3x16xf32>
      %620 = arith.truncf %619 : vector<3x16xf32> to vector<3x16xbf16>
      %621 = vector.extract_strided_slice %618 {offsets = [0, 64], sizes = [3, 16], strides = [1, 1]} : vector<3x192xf32> to vector<3x16xf32>
      %622 = arith.truncf %621 : vector<3x16xf32> to vector<3x16xbf16>
      %623 = vector.extract_strided_slice %618 {offsets = [0, 128], sizes = [3, 16], strides = [1, 1]} : vector<3x192xf32> to vector<3x16xf32>
      %624 = arith.truncf %623 : vector<3x16xf32> to vector<3x16xbf16>
      %cst_210 = arith.constant dense<0.000000e+00> : vector<3x3xf32>
      %625 = tpu.matmul %620, %622, %cst_210 {dimension_numbers = #tpu.dot_dimension_numbers<[1], [1], [0], [0], [0, 0, 1, 0], [], []>} : vector<3x16xbf16>, vector<3x16xbf16>, vector<3x3xf32> -> vector<3x3xf32>
      %cst_211 = arith.constant 2.500000e-01 : f32
      %626 = vector.broadcast %cst_211 : f32 to vector<3x3xf32>
      %627 = arith.mulf %625, %626 : vector<3x3xf32>
      %cst_212 = arith.constant dense<0xFF800000> : vector<3xf32>
      %628 = vector.multi_reduction <maximumf>, %627, %cst_212 [1] : vector<3x3xf32> to vector<3xf32>
      %629 = vector.shape_cast %628 : vector<3xf32> to vector<3x1xf32>
      %630 = vector.broadcast %629 : vector<3x1xf32> to vector<3x3xf32>
      %631 = arith.subf %627, %630 : vector<3x3xf32>
      %632 = math.exp %631 : vector<3x3xf32>
      %cst_213 = arith.constant dense<0.000000e+00> : vector<3xf32>
      %633 = vector.multi_reduction <add>, %632, %cst_213 [1] : vector<3x3xf32> to vector<3xf32>
      %634 = vector.shape_cast %633 : vector<3xf32> to vector<3x1xf32>
      %635 = tpu.reciprocal %634 {approx = true} : vector<3x1xf32> -> vector<3x1xf32>
      %636 = vector.broadcast %635 : vector<3x1xf32> to vector<3x3xf32>
      %637 = arith.mulf %632, %636 : vector<3x3xf32>
      %638 = arith.truncf %637 : vector<3x3xf32> to vector<3x3xbf16>
      %cst_214 = arith.constant dense<0.000000e+00> : vector<3x16xf32>
      %639 = tpu.matmul %638, %624, %cst_214 {dimension_numbers = #tpu.dot_dimension_numbers<[1], [0], [0], [1], [0, 0, 1, 1], [], []>} : vector<3x3xbf16>, vector<3x16xbf16>, vector<3x16xf32> -> vector<3x16xf32>
      %640 = arith.truncf %639 : vector<3x16xf32> to vector<3x16xbf16>
      %641 = vector.extract_strided_slice %603 {offsets = [0, 0], sizes = [16, 64], strides = [1, 1]} : vector<64x64xbf16> to vector<16x64xbf16>
      %cst_215 = arith.constant dense<0.000000e+00> : vector<3x64xf32>
      %642 = tpu.matmul %640, %641, %cst_215 {dimension_numbers = #tpu.dot_dimension_numbers<[1], [0], [0], [1], [0, 0, 1, 1], [], []>} : vector<3x16xbf16>, vector<16x64xbf16>, vector<3x64xf32> -> vector<3x64xf32>
      %643 = vector.extract_strided_slice %618 {offsets = [0, 16], sizes = [3, 16], strides = [1, 1]} : vector<3x192xf32> to vector<3x16xf32>
      %644 = arith.truncf %643 : vector<3x16xf32> to vector<3x16xbf16>
      %645 = vector.extract_strided_slice %618 {offsets = [0, 80], sizes = [3, 16], strides = [1, 1]} : vector<3x192xf32> to vector<3x16xf32>
      %646 = arith.truncf %645 : vector<3x16xf32> to vector<3x16xbf16>
      %647 = vector.extract_strided_slice %618 {offsets = [0, 144], sizes = [3, 16], strides = [1, 1]} : vector<3x192xf32> to vector<3x16xf32>
      %648 = arith.truncf %647 : vector<3x16xf32> to vector<3x16xbf16>
      %cst_216 = arith.constant dense<0.000000e+00> : vector<3x3xf32>
      %649 = tpu.matmul %644, %646, %cst_216 {dimension_numbers = #tpu.dot_dimension_numbers<[1], [1], [0], [0], [0, 0, 1, 0], [], []>} : vector<3x16xbf16>, vector<3x16xbf16>, vector<3x3xf32> -> vector<3x3xf32>
      %cst_217 = arith.constant 2.500000e-01 : f32
      %650 = vector.broadcast %cst_217 : f32 to vector<3x3xf32>
      %651 = arith.mulf %649, %650 : vector<3x3xf32>
      %cst_218 = arith.constant dense<0xFF800000> : vector<3xf32>
      %652 = vector.multi_reduction <maximumf>, %651, %cst_218 [1] : vector<3x3xf32> to vector<3xf32>
      %653 = vector.shape_cast %652 : vector<3xf32> to vector<3x1xf32>
      %654 = vector.broadcast %653 : vector<3x1xf32> to vector<3x3xf32>
      %655 = arith.subf %651, %654 : vector<3x3xf32>
      %656 = math.exp %655 : vector<3x3xf32>
      %cst_219 = arith.constant dense<0.000000e+00> : vector<3xf32>
      %657 = vector.multi_reduction <add>, %656, %cst_219 [1] : vector<3x3xf32> to vector<3xf32>
      %658 = vector.shape_cast %657 : vector<3xf32> to vector<3x1xf32>
      %659 = tpu.reciprocal %658 {approx = true} : vector<3x1xf32> -> vector<3x1xf32>
      %660 = vector.broadcast %659 : vector<3x1xf32> to vector<3x3xf32>
      %661 = arith.mulf %656, %660 : vector<3x3xf32>
      %662 = arith.truncf %661 : vector<3x3xf32> to vector<3x3xbf16>
      %cst_220 = arith.constant dense<0.000000e+00> : vector<3x16xf32>
      %663 = tpu.matmul %662, %648, %cst_220 {dimension_numbers = #tpu.dot_dimension_numbers<[1], [0], [0], [1], [0, 0, 1, 1], [], []>} : vector<3x3xbf16>, vector<3x16xbf16>, vector<3x16xf32> -> vector<3x16xf32>
      %664 = arith.truncf %663 : vector<3x16xf32> to vector<3x16xbf16>
      %665 = vector.extract_strided_slice %603 {offsets = [16, 0], sizes = [16, 64], strides = [1, 1]} : vector<64x64xbf16> to vector<16x64xbf16>
      %cst_221 = arith.constant dense<0.000000e+00> : vector<3x64xf32>
      %666 = tpu.matmul %664, %665, %cst_221 {dimension_numbers = #tpu.dot_dimension_numbers<[1], [0], [0], [1], [0, 0, 1, 1], [], []>} : vector<3x16xbf16>, vector<16x64xbf16>, vector<3x64xf32> -> vector<3x64xf32>
      %667 = arith.addf %642, %666 : vector<3x64xf32>
      %668 = vector.extract_strided_slice %618 {offsets = [0, 32], sizes = [3, 16], strides = [1, 1]} : vector<3x192xf32> to vector<3x16xf32>
      %669 = arith.truncf %668 : vector<3x16xf32> to vector<3x16xbf16>
      %670 = vector.extract_strided_slice %618 {offsets = [0, 96], sizes = [3, 16], strides = [1, 1]} : vector<3x192xf32> to vector<3x16xf32>
      %671 = arith.truncf %670 : vector<3x16xf32> to vector<3x16xbf16>
      %672 = vector.extract_strided_slice %618 {offsets = [0, 160], sizes = [3, 16], strides = [1, 1]} : vector<3x192xf32> to vector<3x16xf32>
      %673 = arith.truncf %672 : vector<3x16xf32> to vector<3x16xbf16>
      %cst_222 = arith.constant dense<0.000000e+00> : vector<3x3xf32>
      %674 = tpu.matmul %669, %671, %cst_222 {dimension_numbers = #tpu.dot_dimension_numbers<[1], [1], [0], [0], [0, 0, 1, 0], [], []>} : vector<3x16xbf16>, vector<3x16xbf16>, vector<3x3xf32> -> vector<3x3xf32>
      %cst_223 = arith.constant 2.500000e-01 : f32
      %675 = vector.broadcast %cst_223 : f32 to vector<3x3xf32>
      %676 = arith.mulf %674, %675 : vector<3x3xf32>
      %cst_224 = arith.constant dense<0xFF800000> : vector<3xf32>
      %677 = vector.multi_reduction <maximumf>, %676, %cst_224 [1] : vector<3x3xf32> to vector<3xf32>
      %678 = vector.shape_cast %677 : vector<3xf32> to vector<3x1xf32>
      %679 = vector.broadcast %678 : vector<3x1xf32> to vector<3x3xf32>
      %680 = arith.subf %676, %679 : vector<3x3xf32>
      %681 = math.exp %680 : vector<3x3xf32>
      %cst_225 = arith.constant dense<0.000000e+00> : vector<3xf32>
      %682 = vector.multi_reduction <add>, %681, %cst_225 [1] : vector<3x3xf32> to vector<3xf32>
      %683 = vector.shape_cast %682 : vector<3xf32> to vector<3x1xf32>
      %684 = tpu.reciprocal %683 {approx = true} : vector<3x1xf32> -> vector<3x1xf32>
      %685 = vector.broadcast %684 : vector<3x1xf32> to vector<3x3xf32>
      %686 = arith.mulf %681, %685 : vector<3x3xf32>
      %687 = arith.truncf %686 : vector<3x3xf32> to vector<3x3xbf16>
      %cst_226 = arith.constant dense<0.000000e+00> : vector<3x16xf32>
      %688 = tpu.matmul %687, %673, %cst_226 {dimension_numbers = #tpu.dot_dimension_numbers<[1], [0], [0], [1], [0, 0, 1, 1], [], []>} : vector<3x3xbf16>, vector<3x16xbf16>, vector<3x16xf32> -> vector<3x16xf32>
      %689 = arith.truncf %688 : vector<3x16xf32> to vector<3x16xbf16>
      %690 = vector.extract_strided_slice %603 {offsets = [32, 0], sizes = [16, 64], strides = [1, 1]} : vector<64x64xbf16> to vector<16x64xbf16>
      %cst_227 = arith.constant dense<0.000000e+00> : vector<3x64xf32>
      %691 = tpu.matmul %689, %690, %cst_227 {dimension_numbers = #tpu.dot_dimension_numbers<[1], [0], [0], [1], [0, 0, 1, 1], [], []>} : vector<3x16xbf16>, vector<16x64xbf16>, vector<3x64xf32> -> vector<3x64xf32>
      %692 = arith.addf %667, %691 : vector<3x64xf32>
      %693 = vector.extract_strided_slice %618 {offsets = [0, 48], sizes = [3, 16], strides = [1, 1]} : vector<3x192xf32> to vector<3x16xf32>
      %694 = arith.truncf %693 : vector<3x16xf32> to vector<3x16xbf16>
      %695 = vector.extract_strided_slice %618 {offsets = [0, 112], sizes = [3, 16], strides = [1, 1]} : vector<3x192xf32> to vector<3x16xf32>
      %696 = arith.truncf %695 : vector<3x16xf32> to vector<3x16xbf16>
      %697 = vector.extract_strided_slice %618 {offsets = [0, 176], sizes = [3, 16], strides = [1, 1]} : vector<3x192xf32> to vector<3x16xf32>
      %698 = arith.truncf %697 : vector<3x16xf32> to vector<3x16xbf16>
      %cst_228 = arith.constant dense<0.000000e+00> : vector<3x3xf32>
      %699 = tpu.matmul %694, %696, %cst_228 {dimension_numbers = #tpu.dot_dimension_numbers<[1], [1], [0], [0], [0, 0, 1, 0], [], []>} : vector<3x16xbf16>, vector<3x16xbf16>, vector<3x3xf32> -> vector<3x3xf32>
      %cst_229 = arith.constant 2.500000e-01 : f32
      %700 = vector.broadcast %cst_229 : f32 to vector<3x3xf32>
      %701 = arith.mulf %699, %700 : vector<3x3xf32>
      %cst_230 = arith.constant dense<0xFF800000> : vector<3xf32>
      %702 = vector.multi_reduction <maximumf>, %701, %cst_230 [1] : vector<3x3xf32> to vector<3xf32>
      %703 = vector.shape_cast %702 : vector<3xf32> to vector<3x1xf32>
      %704 = vector.broadcast %703 : vector<3x1xf32> to vector<3x3xf32>
      %705 = arith.subf %701, %704 : vector<3x3xf32>
      %706 = math.exp %705 : vector<3x3xf32>
      %cst_231 = arith.constant dense<0.000000e+00> : vector<3xf32>
      %707 = vector.multi_reduction <add>, %706, %cst_231 [1] : vector<3x3xf32> to vector<3xf32>
      %708 = vector.shape_cast %707 : vector<3xf32> to vector<3x1xf32>
      %709 = tpu.reciprocal %708 {approx = true} : vector<3x1xf32> -> vector<3x1xf32>
      %710 = vector.broadcast %709 : vector<3x1xf32> to vector<3x3xf32>
      %711 = arith.mulf %706, %710 : vector<3x3xf32>
      %712 = arith.truncf %711 : vector<3x3xf32> to vector<3x3xbf16>
      %cst_232 = arith.constant dense<0.000000e+00> : vector<3x16xf32>
      %713 = tpu.matmul %712, %698, %cst_232 {dimension_numbers = #tpu.dot_dimension_numbers<[1], [0], [0], [1], [0, 0, 1, 1], [], []>} : vector<3x3xbf16>, vector<3x16xbf16>, vector<3x16xf32> -> vector<3x16xf32>
      %714 = arith.truncf %713 : vector<3x16xf32> to vector<3x16xbf16>
      %715 = vector.extract_strided_slice %603 {offsets = [48, 0], sizes = [16, 64], strides = [1, 1]} : vector<64x64xbf16> to vector<16x64xbf16>
      %cst_233 = arith.constant dense<0.000000e+00> : vector<3x64xf32>
      %716 = tpu.matmul %714, %715, %cst_233 {dimension_numbers = #tpu.dot_dimension_numbers<[1], [0], [0], [1], [0, 0, 1, 1], [], []>} : vector<3x16xbf16>, vector<16x64xbf16>, vector<3x64xf32> -> vector<3x64xf32>
      %717 = arith.addf %692, %716 : vector<3x64xf32>
      %718 = vector.extract_strided_slice %617 {offsets = [3, 0], sizes = [3, 192], strides = [1, 1]} : vector<6x192xf32> to vector<3x192xf32>
      %719 = vector.extract_strided_slice %718 {offsets = [0, 0], sizes = [3, 16], strides = [1, 1]} : vector<3x192xf32> to vector<3x16xf32>
      %720 = arith.truncf %719 : vector<3x16xf32> to vector<3x16xbf16>
      %721 = vector.extract_strided_slice %718 {offsets = [0, 64], sizes = [3, 16], strides = [1, 1]} : vector<3x192xf32> to vector<3x16xf32>
      %722 = arith.truncf %721 : vector<3x16xf32> to vector<3x16xbf16>
      %723 = vector.extract_strided_slice %718 {offsets = [0, 128], sizes = [3, 16], strides = [1, 1]} : vector<3x192xf32> to vector<3x16xf32>
      %724 = arith.truncf %723 : vector<3x16xf32> to vector<3x16xbf16>
      %cst_234 = arith.constant dense<0.000000e+00> : vector<3x3xf32>
      %725 = tpu.matmul %720, %722, %cst_234 {dimension_numbers = #tpu.dot_dimension_numbers<[1], [1], [0], [0], [0, 0, 1, 0], [], []>} : vector<3x16xbf16>, vector<3x16xbf16>, vector<3x3xf32> -> vector<3x3xf32>
      %cst_235 = arith.constant 2.500000e-01 : f32
      %726 = vector.broadcast %cst_235 : f32 to vector<3x3xf32>
      %727 = arith.mulf %725, %726 : vector<3x3xf32>
      %cst_236 = arith.constant dense<0xFF800000> : vector<3xf32>
      %728 = vector.multi_reduction <maximumf>, %727, %cst_236 [1] : vector<3x3xf32> to vector<3xf32>
      %729 = vector.shape_cast %728 : vector<3xf32> to vector<3x1xf32>
      %730 = vector.broadcast %729 : vector<3x1xf32> to vector<3x3xf32>
      %731 = arith.subf %727, %730 : vector<3x3xf32>
      %732 = math.exp %731 : vector<3x3xf32>
      %cst_237 = arith.constant dense<0.000000e+00> : vector<3xf32>
      %733 = vector.multi_reduction <add>, %732, %cst_237 [1] : vector<3x3xf32> to vector<3xf32>
      %734 = vector.shape_cast %733 : vector<3xf32> to vector<3x1xf32>
      %735 = tpu.reciprocal %734 {approx = true} : vector<3x1xf32> -> vector<3x1xf32>
      %736 = vector.broadcast %735 : vector<3x1xf32> to vector<3x3xf32>
      %737 = arith.mulf %732, %736 : vector<3x3xf32>
      %738 = arith.truncf %737 : vector<3x3xf32> to vector<3x3xbf16>
      %cst_238 = arith.constant dense<0.000000e+00> : vector<3x16xf32>
      %739 = tpu.matmul %738, %724, %cst_238 {dimension_numbers = #tpu.dot_dimension_numbers<[1], [0], [0], [1], [0, 0, 1, 1], [], []>} : vector<3x3xbf16>, vector<3x16xbf16>, vector<3x16xf32> -> vector<3x16xf32>
      %740 = arith.truncf %739 : vector<3x16xf32> to vector<3x16xbf16>
      %741 = vector.extract_strided_slice %603 {offsets = [0, 0], sizes = [16, 64], strides = [1, 1]} : vector<64x64xbf16> to vector<16x64xbf16>
      %cst_239 = arith.constant dense<0.000000e+00> : vector<3x64xf32>
      %742 = tpu.matmul %740, %741, %cst_239 {dimension_numbers = #tpu.dot_dimension_numbers<[1], [0], [0], [1], [0, 0, 1, 1], [], []>} : vector<3x16xbf16>, vector<16x64xbf16>, vector<3x64xf32> -> vector<3x64xf32>
      %743 = vector.extract_strided_slice %718 {offsets = [0, 16], sizes = [3, 16], strides = [1, 1]} : vector<3x192xf32> to vector<3x16xf32>
      %744 = arith.truncf %743 : vector<3x16xf32> to vector<3x16xbf16>
      %745 = vector.extract_strided_slice %718 {offsets = [0, 80], sizes = [3, 16], strides = [1, 1]} : vector<3x192xf32> to vector<3x16xf32>
      %746 = arith.truncf %745 : vector<3x16xf32> to vector<3x16xbf16>
      %747 = vector.extract_strided_slice %718 {offsets = [0, 144], sizes = [3, 16], strides = [1, 1]} : vector<3x192xf32> to vector<3x16xf32>
      %748 = arith.truncf %747 : vector<3x16xf32> to vector<3x16xbf16>
      %cst_240 = arith.constant dense<0.000000e+00> : vector<3x3xf32>
      %749 = tpu.matmul %744, %746, %cst_240 {dimension_numbers = #tpu.dot_dimension_numbers<[1], [1], [0], [0], [0, 0, 1, 0], [], []>} : vector<3x16xbf16>, vector<3x16xbf16>, vector<3x3xf32> -> vector<3x3xf32>
      %cst_241 = arith.constant 2.500000e-01 : f32
      %750 = vector.broadcast %cst_241 : f32 to vector<3x3xf32>
      %751 = arith.mulf %749, %750 : vector<3x3xf32>
      %cst_242 = arith.constant dense<0xFF800000> : vector<3xf32>
      %752 = vector.multi_reduction <maximumf>, %751, %cst_242 [1] : vector<3x3xf32> to vector<3xf32>
      %753 = vector.shape_cast %752 : vector<3xf32> to vector<3x1xf32>
      %754 = vector.broadcast %753 : vector<3x1xf32> to vector<3x3xf32>
      %755 = arith.subf %751, %754 : vector<3x3xf32>
      %756 = math.exp %755 : vector<3x3xf32>
      %cst_243 = arith.constant dense<0.000000e+00> : vector<3xf32>
      %757 = vector.multi_reduction <add>, %756, %cst_243 [1] : vector<3x3xf32> to vector<3xf32>
      %758 = vector.shape_cast %757 : vector<3xf32> to vector<3x1xf32>
      %759 = tpu.reciprocal %758 {approx = true} : vector<3x1xf32> -> vector<3x1xf32>
      %760 = vector.broadcast %759 : vector<3x1xf32> to vector<3x3xf32>
      %761 = arith.mulf %756, %760 : vector<3x3xf32>
      %762 = arith.truncf %761 : vector<3x3xf32> to vector<3x3xbf16>
      %cst_244 = arith.constant dense<0.000000e+00> : vector<3x16xf32>
      %763 = tpu.matmul %762, %748, %cst_244 {dimension_numbers = #tpu.dot_dimension_numbers<[1], [0], [0], [1], [0, 0, 1, 1], [], []>} : vector<3x3xbf16>, vector<3x16xbf16>, vector<3x16xf32> -> vector<3x16xf32>
      %764 = arith.truncf %763 : vector<3x16xf32> to vector<3x16xbf16>
      %765 = vector.extract_strided_slice %603 {offsets = [16, 0], sizes = [16, 64], strides = [1, 1]} : vector<64x64xbf16> to vector<16x64xbf16>
      %cst_245 = arith.constant dense<0.000000e+00> : vector<3x64xf32>
      %766 = tpu.matmul %764, %765, %cst_245 {dimension_numbers = #tpu.dot_dimension_numbers<[1], [0], [0], [1], [0, 0, 1, 1], [], []>} : vector<3x16xbf16>, vector<16x64xbf16>, vector<3x64xf32> -> vector<3x64xf32>
      %767 = arith.addf %742, %766 : vector<3x64xf32>
      %768 = vector.extract_strided_slice %718 {offsets = [0, 32], sizes = [3, 16], strides = [1, 1]} : vector<3x192xf32> to vector<3x16xf32>
      %769 = arith.truncf %768 : vector<3x16xf32> to vector<3x16xbf16>
      %770 = vector.extract_strided_slice %718 {offsets = [0, 96], sizes = [3, 16], strides = [1, 1]} : vector<3x192xf32> to vector<3x16xf32>
      %771 = arith.truncf %770 : vector<3x16xf32> to vector<3x16xbf16>
      %772 = vector.extract_strided_slice %718 {offsets = [0, 160], sizes = [3, 16], strides = [1, 1]} : vector<3x192xf32> to vector<3x16xf32>
      %773 = arith.truncf %772 : vector<3x16xf32> to vector<3x16xbf16>
      %cst_246 = arith.constant dense<0.000000e+00> : vector<3x3xf32>
      %774 = tpu.matmul %769, %771, %cst_246 {dimension_numbers = #tpu.dot_dimension_numbers<[1], [1], [0], [0], [0, 0, 1, 0], [], []>} : vector<3x16xbf16>, vector<3x16xbf16>, vector<3x3xf32> -> vector<3x3xf32>
      %cst_247 = arith.constant 2.500000e-01 : f32
      %775 = vector.broadcast %cst_247 : f32 to vector<3x3xf32>
      %776 = arith.mulf %774, %775 : vector<3x3xf32>
      %cst_248 = arith.constant dense<0xFF800000> : vector<3xf32>
      %777 = vector.multi_reduction <maximumf>, %776, %cst_248 [1] : vector<3x3xf32> to vector<3xf32>
      %778 = vector.shape_cast %777 : vector<3xf32> to vector<3x1xf32>
      %779 = vector.broadcast %778 : vector<3x1xf32> to vector<3x3xf32>
      %780 = arith.subf %776, %779 : vector<3x3xf32>
      %781 = math.exp %780 : vector<3x3xf32>
      %cst_249 = arith.constant dense<0.000000e+00> : vector<3xf32>
      %782 = vector.multi_reduction <add>, %781, %cst_249 [1] : vector<3x3xf32> to vector<3xf32>
      %783 = vector.shape_cast %782 : vector<3xf32> to vector<3x1xf32>
      %784 = tpu.reciprocal %783 {approx = true} : vector<3x1xf32> -> vector<3x1xf32>
      %785 = vector.broadcast %784 : vector<3x1xf32> to vector<3x3xf32>
      %786 = arith.mulf %781, %785 : vector<3x3xf32>
      %787 = arith.truncf %786 : vector<3x3xf32> to vector<3x3xbf16>
      %cst_250 = arith.constant dense<0.000000e+00> : vector<3x16xf32>
      %788 = tpu.matmul %787, %773, %cst_250 {dimension_numbers = #tpu.dot_dimension_numbers<[1], [0], [0], [1], [0, 0, 1, 1], [], []>} : vector<3x3xbf16>, vector<3x16xbf16>, vector<3x16xf32> -> vector<3x16xf32>
      %789 = arith.truncf %788 : vector<3x16xf32> to vector<3x16xbf16>
      %790 = vector.extract_strided_slice %603 {offsets = [32, 0], sizes = [16, 64], strides = [1, 1]} : vector<64x64xbf16> to vector<16x64xbf16>
      %cst_251 = arith.constant dense<0.000000e+00> : vector<3x64xf32>
      %791 = tpu.matmul %789, %790, %cst_251 {dimension_numbers = #tpu.dot_dimension_numbers<[1], [0], [0], [1], [0, 0, 1, 1], [], []>} : vector<3x16xbf16>, vector<16x64xbf16>, vector<3x64xf32> -> vector<3x64xf32>
      %792 = arith.addf %767, %791 : vector<3x64xf32>
      %793 = vector.extract_strided_slice %718 {offsets = [0, 48], sizes = [3, 16], strides = [1, 1]} : vector<3x192xf32> to vector<3x16xf32>
      %794 = arith.truncf %793 : vector<3x16xf32> to vector<3x16xbf16>
      %795 = vector.extract_strided_slice %718 {offsets = [0, 112], sizes = [3, 16], strides = [1, 1]} : vector<3x192xf32> to vector<3x16xf32>
      %796 = arith.truncf %795 : vector<3x16xf32> to vector<3x16xbf16>
      %797 = vector.extract_strided_slice %718 {offsets = [0, 176], sizes = [3, 16], strides = [1, 1]} : vector<3x192xf32> to vector<3x16xf32>
      %798 = arith.truncf %797 : vector<3x16xf32> to vector<3x16xbf16>
      %cst_252 = arith.constant dense<0.000000e+00> : vector<3x3xf32>
      %799 = tpu.matmul %794, %796, %cst_252 {dimension_numbers = #tpu.dot_dimension_numbers<[1], [1], [0], [0], [0, 0, 1, 0], [], []>} : vector<3x16xbf16>, vector<3x16xbf16>, vector<3x3xf32> -> vector<3x3xf32>
      %cst_253 = arith.constant 2.500000e-01 : f32
      %800 = vector.broadcast %cst_253 : f32 to vector<3x3xf32>
      %801 = arith.mulf %799, %800 : vector<3x3xf32>
      %cst_254 = arith.constant dense<0xFF800000> : vector<3xf32>
      %802 = vector.multi_reduction <maximumf>, %801, %cst_254 [1] : vector<3x3xf32> to vector<3xf32>
      %803 = vector.shape_cast %802 : vector<3xf32> to vector<3x1xf32>
      %804 = vector.broadcast %803 : vector<3x1xf32> to vector<3x3xf32>
      %805 = arith.subf %801, %804 : vector<3x3xf32>
      %806 = math.exp %805 : vector<3x3xf32>
      %cst_255 = arith.constant dense<0.000000e+00> : vector<3xf32>
      %807 = vector.multi_reduction <add>, %806, %cst_255 [1] : vector<3x3xf32> to vector<3xf32>
      %808 = vector.shape_cast %807 : vector<3xf32> to vector<3x1xf32>
      %809 = tpu.reciprocal %808 {approx = true} : vector<3x1xf32> -> vector<3x1xf32>
      %810 = vector.broadcast %809 : vector<3x1xf32> to vector<3x3xf32>
      %811 = arith.mulf %806, %810 : vector<3x3xf32>
      %812 = arith.truncf %811 : vector<3x3xf32> to vector<3x3xbf16>
      %cst_256 = arith.constant dense<0.000000e+00> : vector<3x16xf32>
      %813 = tpu.matmul %812, %798, %cst_256 {dimension_numbers = #tpu.dot_dimension_numbers<[1], [0], [0], [1], [0, 0, 1, 1], [], []>} : vector<3x3xbf16>, vector<3x16xbf16>, vector<3x16xf32> -> vector<3x16xf32>
      %814 = arith.truncf %813 : vector<3x16xf32> to vector<3x16xbf16>
      %815 = vector.extract_strided_slice %603 {offsets = [48, 0], sizes = [16, 64], strides = [1, 1]} : vector<64x64xbf16> to vector<16x64xbf16>
      %cst_257 = arith.constant dense<0.000000e+00> : vector<3x64xf32>
      %816 = tpu.matmul %814, %815, %cst_257 {dimension_numbers = #tpu.dot_dimension_numbers<[1], [0], [0], [1], [0, 0, 1, 1], [], []>} : vector<3x16xbf16>, vector<16x64xbf16>, vector<3x64xf32> -> vector<3x64xf32>
      %817 = arith.addf %792, %816 : vector<3x64xf32>
      %818 = tpu.concatenate %717, %817 in 0 : vector<3x64xf32>, vector<3x64xf32> -> vector<6x64xf32>
      %819 = vector.broadcast %608 : vector<1x64xf32> to vector<6x64xf32>
      %820 = arith.addf %818, %819 : vector<6x64xf32>
      %821 = arith.addf %600, %820 : vector<6x64xf32>
      %cst_258 = arith.constant dense<0.000000e+00> : vector<6xf32>
      %822 = vector.multi_reduction <add>, %821, %cst_258 [1] : vector<6x64xf32> to vector<6xf32>
      %823 = vector.shape_cast %822 : vector<6xf32> to vector<6x1xf32>
      %cst_259 = arith.constant 6.400000e+01 : f32
      %824 = vector.broadcast %cst_259 : f32 to vector<6x1xf32>
      %825 = arith.divf %823, %824 : vector<6x1xf32>
      %826 = vector.broadcast %825 : vector<6x1xf32> to vector<6x64xf32>
      %827 = arith.subf %821, %826 : vector<6x64xf32>
      %828 = arith.mulf %827, %827 : vector<6x64xf32>
      %cst_260 = arith.constant dense<0.000000e+00> : vector<6xf32>
      %829 = vector.multi_reduction <add>, %828, %cst_260 [1] : vector<6x64xf32> to vector<6xf32>
      %830 = vector.shape_cast %829 : vector<6xf32> to vector<6x1xf32>
      %cst_261 = arith.constant 6.400000e+01 : f32
      %831 = vector.broadcast %cst_261 : f32 to vector<6x1xf32>
      %832 = arith.divf %830, %831 : vector<6x1xf32>
      %833 = vector.broadcast %825 : vector<6x1xf32> to vector<6x64xf32>
      %834 = arith.subf %821, %833 : vector<6x64xf32>
      %cst_262 = arith.constant 9.99999974E-6 : f32
      %835 = vector.broadcast %cst_262 : f32 to vector<6x1xf32>
      %836 = arith.addf %832, %835 : vector<6x1xf32>
      %837 = math.rsqrt %836 : vector<6x1xf32>
      %838 = vector.broadcast %837 : vector<6x1xf32> to vector<6x64xf32>
      %839 = arith.mulf %834, %838 : vector<6x64xf32>
      %840 = vector.broadcast %609 : vector<1x64xf32> to vector<6x64xf32>
      %841 = arith.mulf %839, %840 : vector<6x64xf32>
      %842 = vector.broadcast %610 : vector<1x64xf32> to vector<6x64xf32>
      %843 = arith.addf %841, %842 : vector<6x64xf32>
      %844 = arith.truncf %843 : vector<6x64xf32> to vector<6x64xbf16>
      %cst_263 = arith.constant dense<0.000000e+00> : vector<6x128xf32>
      %845 = tpu.matmul %844, %605, %cst_263 {dimension_numbers = #tpu.dot_dimension_numbers<[1], [0], [0], [1], [0, 0, 1, 1], [], []>} : vector<6x64xbf16>, vector<64x128xbf16>, vector<6x128xf32> -> vector<6x128xf32>
      %846 = vector.broadcast %606 : vector<1x128xf32> to vector<6x128xf32>
      %847 = arith.addf %845, %846 : vector<6x128xf32>
      %cst_264 = arith.constant 0.000000e+00 : f32
      %848 = vector.broadcast %cst_264 : f32 to vector<6x128xf32>
      %849 = arith.maximumf %847, %848 : vector<6x128xf32>
      %850 = arith.truncf %849 : vector<6x128xf32> to vector<6x128xbf16>
      %cst_265 = arith.constant dense<0.000000e+00> : vector<6x64xf32>
      %851 = tpu.matmul %850, %607, %cst_265 {dimension_numbers = #tpu.dot_dimension_numbers<[1], [0], [0], [1], [0, 0, 1, 1], [], []>} : vector<6x128xbf16>, vector<128x64xbf16>, vector<6x64xf32> -> vector<6x64xf32>
      %852 = vector.broadcast %611 : vector<1x64xf32> to vector<6x64xf32>
      %853 = arith.addf %851, %852 : vector<6x64xf32>
      %854 = arith.addf %843, %853 : vector<6x64xf32>
      %cst_266 = arith.constant dense<0.000000e+00> : vector<6xf32>
      %855 = vector.multi_reduction <add>, %854, %cst_266 [1] : vector<6x64xf32> to vector<6xf32>
      %856 = vector.shape_cast %855 : vector<6xf32> to vector<6x1xf32>
      %cst_267 = arith.constant 6.400000e+01 : f32
      %857 = vector.broadcast %cst_267 : f32 to vector<6x1xf32>
      %858 = arith.divf %856, %857 : vector<6x1xf32>
      %859 = vector.broadcast %858 : vector<6x1xf32> to vector<6x64xf32>
      %860 = arith.subf %854, %859 : vector<6x64xf32>
      %861 = arith.mulf %860, %860 : vector<6x64xf32>
      %cst_268 = arith.constant dense<0.000000e+00> : vector<6xf32>
      %862 = vector.multi_reduction <add>, %861, %cst_268 [1] : vector<6x64xf32> to vector<6xf32>
      %863 = vector.shape_cast %862 : vector<6xf32> to vector<6x1xf32>
      %cst_269 = arith.constant 6.400000e+01 : f32
      %864 = vector.broadcast %cst_269 : f32 to vector<6x1xf32>
      %865 = arith.divf %863, %864 : vector<6x1xf32>
      %866 = vector.broadcast %858 : vector<6x1xf32> to vector<6x64xf32>
      %867 = arith.subf %854, %866 : vector<6x64xf32>
      %cst_270 = arith.constant 9.99999974E-6 : f32
      %868 = vector.broadcast %cst_270 : f32 to vector<6x1xf32>
      %869 = arith.addf %865, %868 : vector<6x1xf32>
      %870 = math.rsqrt %869 : vector<6x1xf32>
      %871 = vector.broadcast %870 : vector<6x1xf32> to vector<6x64xf32>
      %872 = arith.mulf %867, %871 : vector<6x64xf32>
      %873 = vector.broadcast %612 : vector<1x64xf32> to vector<6x64xf32>
      %874 = arith.mulf %872, %873 : vector<6x64xf32>
      %875 = vector.broadcast %613 : vector<1x64xf32> to vector<6x64xf32>
      %876 = arith.addf %874, %875 : vector<6x64xf32>
      %877 = arith.truncf %876 : vector<6x64xf32> to vector<6x64xbf16>
      %c0_271 = arith.constant 0 : index
      %c0_272 = arith.constant 0 : index
      %878 = vector.load %arg18[%c0_271, %c0_272] : memref<64x64xbf16, #tpu.memory_space<vmem>>, vector<64x64xbf16>
      %cst_273 = arith.constant dense<0.000000e+00> : vector<6x64xf32>
      %879 = tpu.matmul %877, %878, %cst_273 {dimension_numbers = #tpu.dot_dimension_numbers<[1], [0], [0], [1], [0, 0, 1, 1], [], []>} : vector<6x64xbf16>, vector<64x64xbf16>, vector<6x64xf32> -> vector<6x64xf32>
      %c0_274 = arith.constant 0 : index
      %c0_275 = arith.constant 0 : index
      %880 = vector.load %arg19[%c0_274, %c0_275] : memref<1x64xf32, #tpu.memory_space<vmem>>, vector<1x64xf32>
      %881 = vector.broadcast %880 : vector<1x64xf32> to vector<6x64xf32>
      %882 = arith.addf %879, %881 : vector<6x64xf32>
      %883 = math.tanh %882 : vector<6x64xf32>
      %c0_276 = arith.constant 0 : index
      %c0_277 = arith.constant 0 : index
      %884 = vector.load %arg20[%c0_276, %c0_277] : memref<1x64xf32, #tpu.memory_space<vmem>>, vector<1x64xf32>
      %885 = vector.broadcast %884 : vector<1x64xf32> to vector<6x64xf32>
      %886 = arith.mulf %883, %885 : vector<6x64xf32>
      %cst_278 = arith.constant dense<0.000000e+00> : vector<6xf32>
      %887 = vector.multi_reduction <add>, %886, %cst_278 [1] : vector<6x64xf32> to vector<6xf32>
      %888 = vector.shape_cast %887 : vector<6xf32> to vector<6x1xf32>
      %c0_279 = arith.constant 0 : index
      %c0_280 = arith.constant 0 : index
      %889 = vector.load %arg21[%c0_279, %c0_280] : memref<1x1xf32, #tpu.memory_space<vmem>>, vector<1x1xf32>
      %890 = vector.broadcast %889 : vector<1x1xf32> to vector<6x1xf32>
      %891 = arith.addf %888, %890 : vector<6x1xf32>
      %892 = vector.extract_strided_slice %891 {offsets = [0, 0], sizes = [3, 1], strides = [1, 1]} : vector<6x1xf32> to vector<3x1xf32>
      %cst_281 = arith.constant dense<0xFF800000> : vector<1xf32>
      %893 = vector.multi_reduction <maximumf>, %892, %cst_281 [0] : vector<3x1xf32> to vector<1xf32>
      %894 = vector.shape_cast %893 : vector<1xf32> to vector<1x1xf32>
      %895 = vector.broadcast %894 : vector<1x1xf32> to vector<3x1xf32>
      %896 = arith.subf %892, %895 : vector<3x1xf32>
      %897 = math.exp %896 : vector<3x1xf32>
      %cst_282 = arith.constant dense<0.000000e+00> : vector<1xf32>
      %898 = vector.multi_reduction <add>, %897, %cst_282 [0] : vector<3x1xf32> to vector<1xf32>
      %899 = vector.shape_cast %898 : vector<1xf32> to vector<1x1xf32>
      %900 = tpu.reciprocal %899 {approx = true} : vector<1x1xf32> -> vector<1x1xf32>
      %901 = vector.broadcast %900 : vector<1x1xf32> to vector<3x1xf32>
      %902 = arith.mulf %897, %901 : vector<3x1xf32>
      %903 = vector.extract_strided_slice %876 {offsets = [0, 0], sizes = [3, 64], strides = [1, 1]} : vector<6x64xf32> to vector<3x64xf32>
      %904 = vector.broadcast %902 : vector<3x1xf32> to vector<3x64xf32>
      %905 = arith.mulf %904, %903 : vector<3x64xf32>
      %cst_283 = arith.constant dense<0.000000e+00> : vector<64xf32>
      %906 = vector.multi_reduction <add>, %905, %cst_283 [0] : vector<3x64xf32> to vector<64xf32>
      %907 = vector.shape_cast %906 : vector<64xf32> to vector<1x64xf32>
      %908 = vector.extract_strided_slice %891 {offsets = [3, 0], sizes = [3, 1], strides = [1, 1]} : vector<6x1xf32> to vector<3x1xf32>
      %cst_284 = arith.constant dense<0xFF800000> : vector<1xf32>
      %909 = vector.multi_reduction <maximumf>, %908, %cst_284 [0] : vector<3x1xf32> to vector<1xf32>
      %910 = vector.shape_cast %909 : vector<1xf32> to vector<1x1xf32>
      %911 = vector.broadcast %910 : vector<1x1xf32> to vector<3x1xf32>
      %912 = arith.subf %908, %911 : vector<3x1xf32>
      %913 = math.exp %912 : vector<3x1xf32>
      %cst_285 = arith.constant dense<0.000000e+00> : vector<1xf32>
      %914 = vector.multi_reduction <add>, %913, %cst_285 [0] : vector<3x1xf32> to vector<1xf32>
      %915 = vector.shape_cast %914 : vector<1xf32> to vector<1x1xf32>
      %916 = tpu.reciprocal %915 {approx = true} : vector<1x1xf32> -> vector<1x1xf32>
      %917 = vector.broadcast %916 : vector<1x1xf32> to vector<3x1xf32>
      %918 = arith.mulf %913, %917 : vector<3x1xf32>
      %919 = vector.extract_strided_slice %876 {offsets = [3, 0], sizes = [3, 64], strides = [1, 1]} : vector<6x64xf32> to vector<3x64xf32>
      %920 = vector.broadcast %918 : vector<3x1xf32> to vector<3x64xf32>
      %921 = arith.mulf %920, %919 : vector<3x64xf32>
      %cst_286 = arith.constant dense<0.000000e+00> : vector<64xf32>
      %922 = vector.multi_reduction <add>, %921, %cst_286 [0] : vector<3x64xf32> to vector<64xf32>
      %923 = vector.shape_cast %922 : vector<64xf32> to vector<1x64xf32>
      %924 = tpu.concatenate %907, %923 in 0 : vector<1x64xf32>, vector<1x64xf32> -> vector<2x64xf32>
      %925 = arith.truncf %924 : vector<2x64xf32> to vector<2x64xbf16>
      %c0_287 = arith.constant 0 : index
      %c0_288 = arith.constant 0 : index
      %926 = vector.load %arg22[%c0_287, %c0_288] : memref<64x2xbf16, #tpu.memory_space<vmem>>, vector<64x2xbf16>
      %cst_289 = arith.constant dense<0.000000e+00> : vector<2x2xf32>
      %927 = tpu.matmul %925, %926, %cst_289 {dimension_numbers = #tpu.dot_dimension_numbers<[1], [0], [0], [1], [0, 0, 1, 1], [], []>} : vector<2x64xbf16>, vector<64x2xbf16>, vector<2x2xf32> -> vector<2x2xf32>
      %c0_290 = arith.constant 0 : index
      %c0_291 = arith.constant 0 : index
      %928 = vector.load %arg23[%c0_290, %c0_291] : memref<1x2xf32, #tpu.memory_space<vmem>>, vector<1x2xf32>
      %929 = vector.broadcast %928 : vector<1x2xf32> to vector<2x2xf32>
      %930 = arith.addf %927, %929 : vector<2x2xf32>
      %c0_292 = arith.constant 0 : index
      %c0_293 = arith.constant 0 : index
      %931 = vector.load %arg24[%c0_292, %c0_293] : memref<2x2xf32, #tpu.memory_space<vmem>>, vector<2x2xf32>
      tpu.vector_store %arg24[%c0_292, %c0_293], %930 {strides = array<i32>} : memref<2x2xf32, #tpu.memory_space<vmem>>, vector<2x2xf32>,
    } else {
    }
    return
  }
  func.func @transform_0(%arg0: i32) -> (i32, i32, i32) {
    %c0_i32 = arith.constant 0 : i32
    %c0_i32_0 = arith.constant 0 : i32
    %c0_i32_1 = arith.constant 0 : i32
    return %arg0, %c0_i32, %c0_i32_0 : i32, i32, i32
  }
  func.func @transform_1(%arg0: i32) -> (i32, i32, i32) {
    %c0_i32 = arith.constant 0 : i32
    %c0_i32_0 = arith.constant 0 : i32
    %c0_i32_1 = arith.constant 0 : i32
    return %arg0, %c0_i32, %c0_i32_0 : i32, i32, i32
  }
  func.func @transform_2(%arg0: i32) -> (i32, i32, i32) {
    %c0_i32 = arith.constant 0 : i32
    %c0_i32_0 = arith.constant 0 : i32
    %c0_i32_1 = arith.constant 0 : i32
    return %arg0, %c0_i32, %c0_i32_0 : i32, i32, i32
  }
  func.func @transform_3(%arg0: i32) -> (i32, i32, i32, i32) {
    %c0_i32 = arith.constant 0 : i32
    %c0_i32_0 = arith.constant 0 : i32
    %c0_i32_1 = arith.constant 0 : i32
    %c0_i32_2 = arith.constant 0 : i32
    return %arg0, %c0_i32, %c0_i32_0, %c0_i32_1 : i32, i32, i32, i32
  }
  func.func @transform_4(%arg0: i32) -> (i32, i32, i32, i32) {
    %c0_i32 = arith.constant 0 : i32
    %c0_i32_0 = arith.constant 0 : i32
    %c0_i32_1 = arith.constant 0 : i32
    %c0_i32_2 = arith.constant 0 : i32
    return %arg0, %c0_i32, %c0_i32_0, %c0_i32_1 : i32, i32, i32, i32
  }
  func.func @transform_5(%arg0: i32) -> (i32, i32, i32, i32) {
    %c0_i32 = arith.constant 0 : i32
    %c0_i32_0 = arith.constant 0 : i32
    %c0_i32_1 = arith.constant 0 : i32
    %c0_i32_2 = arith.constant 0 : i32
    return %arg0, %c0_i32, %c0_i32_0, %c0_i32_1 : i32, i32, i32, i32
  }
  func.func @transform_6(%arg0: i32) -> (i32, i32, i32, i32) {
    %c0_i32 = arith.constant 0 : i32
    %c0_i32_0 = arith.constant 0 : i32
    %c0_i32_1 = arith.constant 0 : i32
    %c0_i32_2 = arith.constant 0 : i32
    return %arg0, %c0_i32, %c0_i32_0, %c0_i32_1 : i32, i32, i32, i32
  }
  func.func @transform_7(%arg0: i32) -> (i32, i32, i32, i32) {
    %c0_i32 = arith.constant 0 : i32
    %c0_i32_0 = arith.constant 0 : i32
    %c0_i32_1 = arith.constant 0 : i32
    %c0_i32_2 = arith.constant 0 : i32
    return %arg0, %c0_i32, %c0_i32_0, %c0_i32_1 : i32, i32, i32, i32
  }
  func.func @transform_8(%arg0: i32) -> (i32, i32, i32, i32) {
    %c0_i32 = arith.constant 0 : i32
    %c0_i32_0 = arith.constant 0 : i32
    %c0_i32_1 = arith.constant 0 : i32
    %c0_i32_2 = arith.constant 0 : i32
    return %arg0, %c0_i32, %c0_i32_0, %c0_i32_1 : i32, i32, i32, i32
  }
  func.func @transform_9(%arg0: i32) -> (i32, i32, i32, i32) {
    %c0_i32 = arith.constant 0 : i32
    %c0_i32_0 = arith.constant 0 : i32
    %c0_i32_1 = arith.constant 0 : i32
    %c0_i32_2 = arith.constant 0 : i32
    return %arg0, %c0_i32, %c0_i32_0, %c0_i32_1 : i32, i32, i32, i32
  }
  func.func @transform_10(%arg0: i32) -> (i32, i32) {
    %c0_i32 = arith.constant 0 : i32
    %c0_i32_0 = arith.constant 0 : i32
    %c0_i32_1 = arith.constant 0 : i32
    return %c0_i32, %c0_i32_0 : i32, i32
  }
  func.func @transform_11(%arg0: i32) -> (i32, i32) {
    %c0_i32 = arith.constant 0 : i32
    %c0_i32_0 = arith.constant 0 : i32
    %c0_i32_1 = arith.constant 0 : i32
    return %c0_i32, %c0_i32_0 : i32, i32
  }
  func.func @transform_12(%arg0: i32) -> (i32, i32) {
    %c0_i32 = arith.constant 0 : i32
    %c0_i32_0 = arith.constant 0 : i32
    %c0_i32_1 = arith.constant 0 : i32
    return %c0_i32, %c0_i32_0 : i32, i32
  }
  func.func @transform_13(%arg0: i32) -> (i32, i32) {
    %c0_i32 = arith.constant 0 : i32
    %c0_i32_0 = arith.constant 0 : i32
    %c0_i32_1 = arith.constant 0 : i32
    return %c0_i32, %c0_i32_0 : i32, i32
  }
  func.func @transform_14(%arg0: i32) -> (i32, i32) {
    %c0_i32 = arith.constant 0 : i32
    %c0_i32_0 = arith.constant 0 : i32
    %c0_i32_1 = arith.constant 0 : i32
    return %c0_i32, %c0_i32_0 : i32, i32
  }
  func.func @transform_15(%arg0: i32) -> (i32, i32) {
    %c0_i32 = arith.constant 0 : i32
    %c0_i32_0 = arith.constant 0 : i32
    %c0_i32_1 = arith.constant 0 : i32
    return %c0_i32, %c0_i32_0 : i32, i32
  }
  func.func @transform_16(%arg0: i32) -> (i32, i32) {
    %c0_i32 = arith.constant 0 : i32
    %c0_i32_0 = arith.constant 0 : i32
    %c0_i32_1 = arith.constant 0 : i32
    return %c0_i32, %c0_i32_0 : i32, i32
  }
  func.func @transform_17(%arg0: i32) -> (i32, i32) {
    %c0_i32 = arith.constant 0 : i32
    %c0_i32_0 = arith.constant 0 : i32
    %c0_i32_1 = arith.constant 0 : i32
    return %c0_i32, %c0_i32_0 : i32, i32
  }
  func.func @transform_18(%arg0: i32) -> (i32, i32) {
    %c0_i32 = arith.constant 0 : i32
    %c0_i32_0 = arith.constant 0 : i32
    %c0_i32_1 = arith.constant 0 : i32
    return %c0_i32, %c0_i32_0 : i32, i32
  }
  func.func @transform_19(%arg0: i32) -> (i32, i32) {
    %c0_i32 = arith.constant 0 : i32
    %c0_i32_0 = arith.constant 0 : i32
    %c0_i32_1 = arith.constant 0 : i32
    return %c0_i32, %c0_i32_0 : i32, i32
  }
  func.func @transform_20(%arg0: i32) -> (i32, i32) {
    %c0_i32 = arith.constant 0 : i32
    %c0_i32_0 = arith.constant 0 : i32
    %c0_i32_1 = arith.constant 0 : i32
    return %c0_i32, %c0_i32_0 : i32, i32
  }
  func.func @transform_21(%arg0: i32) -> (i32, i32) {
    %c0_i32 = arith.constant 0 : i32
    %c0_i32_0 = arith.constant 0 : i32
    %c0_i32_1 = arith.constant 0 : i32
    return %c0_i32, %c0_i32_0 : i32, i32
  }
  func.func @transform_22(%arg0: i32) -> (i32, i32) {
    %c0_i32 = arith.constant 0 : i32
    %c0_i32_0 = arith.constant 0 : i32
    %c0_i32_1 = arith.constant 0 : i32
    return %c0_i32, %c0_i32_0 : i32, i32
  }
  func.func @transform_23(%arg0: i32) -> (i32, i32) {
    %c0_i32 = arith.constant 0 : i32
    %c0_i32_0 = arith.constant 0 : i32
    %c0_i32_1 = arith.constant 0 : i32
    return %c0_i32, %c0_i32_0 : i32, i32
  }
}

</mosaic_0001>

<bundles_post_ra>
// kernel: neuropathnet_forward.1
= control target key start
LH: loop header
LB: loop body
LE: loop exit
PB: predicated region body
PF: predicated region fallthrough
CT: control target
= control target key end

     0   :  { %s6093_s0 = inlined_call_operand.vmem [shape: f32[3,16,1], index: 0, kind: input, shape index: {}]   ;;  %s6094_s1 = inlined_call_operand.vmem [shape: f32[3,8,64], index: 1, kind: input, shape index: {}]   ;;  %s6095_s2 = inlined_call_operand.vmem [shape: f32[3,2,64], index: 2, kind: input, shape index: {}]   ;;  %s6096_s3 = inlined_call_operand.vmem [shape: bf16[3,2,64,192], index: 3, kind: input, shape index: {}]   ;;  %s6097_s4 = inlined_call_operand.vmem [shape: f32[3,2,1,192], index: 4, kind: input, shape index: {}]   ;;  %s6098_s5 = inlined_call_operand.vmem [shape: bf16[3,2,64,64], index: 5, kind: input, shape index: {}]   ;;  %s6099_s6 = inlined_call_operand.vmem [shape: f32[3,2,6,64], index: 6, kind: input, shape index: {}]   ;;  %s6100_s7 = inlined_call_operand.hbm [shape: bf16[3,2,64,128], index: 7, kind: input, shape index: {}]   ;;  %s6101_s8 = inlined_call_operand.vmem [shape: f32[3,2,1,128], index: 8, kind: input, shape index: {}]   ;;  %s6102_s9 = inlined_call_operand.vmem [shape: bf16[3,2,128,64], index: 9, kind: input, shape index: {}]   ;;  %s6103_s10 = inlined_call_operand.vmem [shape: bf16[64,192], index: 10, kind: input, shape index: {}]   ;;  %s6104_s11 = inlined_call_operand.vmem [shape: f32[1,192], index: 11, kind: input, shape index: {}]   ;;  %s6105_s12 = inlined_call_operand.vmem [shape: bf16[64,64], index: 12, kind: input, shape index: {}]   ;;  %s6106_s13 = inlined_call_operand.vmem [shape: f32[6,64], index: 13, kind: input, shape index: {}]   ;;  %s6107_s14 = inlined_call_operand.vmem [shape: bf16[64,128], index: 14, kind: input, shape index: {}]   ;;  %s6108_s15 = inlined_call_operand.vmem [shape: f32[1,128], index: 15, kind: input, shape index: {}]   ;;  %s6109_s16 = inlined_call_operand.vmem [shape: bf16[128,64], index: 16, kind: input, shape index: {}]   ;;  %s6110_s17 = inlined_call_operand.vmem [shape: bf16[64,64], index: 17, kind: input, shape index: {}]   ;;  %s6111_s18 = inlined_call_operand.vmem [shape: f32[1,64], index: 18, kind: input, shape index: {}]   ;;  %s6112_s19 = inlined_call_operand.vmem [shape: f32[1,64], index: 19, kind: input, shape index: {}]   ;;  %s6113_s20 = inlined_call_operand.<no memory space> [shape: f32[1,1], index: 20, kind: input, shape index: {}]   ;;  %s6114_s21 = inlined_call_operand.vmem [shape: bf16[64,2], index: 21, kind: input, shape index: {}]   ;;  %s6115_s22 = inlined_call_operand.vmem [shape: f32[1,2], index: 22, kind: input, shape index: {}]   ;;  %s6116_s23 = inlined_call_operand.hbm [shape: f32[2,2], index: 23, kind: output, shape index: {}]  }
   0x1   :  { %6133 = sst [smem:[#allocation13_spill]] %s6093_s0  ;;  %v28_v0 = vstv %s6113_s20 }
   0x2   :  { %6134 = sst [smem:[#allocation14_spill]] %s6094_s1  ;;  %29 = vst [vmem:[#allocation3] sm:$0x1] %v28_v0 }
   0x3   :  { %6135 = sst [smem:[#allocation15_spill]] %s6095_s2 }
   0x4   :  { %6136 = sst [smem:[#allocation16_spill]] %s6096_s3 }
   0x5   :  { %6137 = sst [smem:[#allocation17_spill]] %s6097_s4 }
   0x6   :  { %6138 = sst [smem:[#allocation18_spill]] %s6098_s5 }
   0x7   :  { %6139 = sst [smem:[#allocation19_spill]] %s6099_s6 }
   0x8   :  { %6140 = sst [smem:[#allocation20_spill]] %s6100_s7 }
   0x9   :  { %6141 = sst [smem:[#allocation21_spill]] %s6112_s19 }
   0xa   :  { %6142 = sst [smem:[#allocation22_spill]] %s6114_s21 }
   0xb   :  { %6143 = sst [smem:[#allocation23_spill]] %s6115_s22 }
   0xc   :  { %6144 = sst [smem:[#allocation24_spill]] %s6116_s23 }
   0xd   :  { %30 = vsyncpa [#allocation5], 0 }
   0xe   :  { %32 = vsyncpa [#allocation5 + $0x1], 0 }
   0xf   :  { %33 = vsyncpa [#allocation6], 0  ;;  %s5190_s24 = smov 0   ;;  %s5192_s25 = smov 0  }
  0x10   :  { %s5194_s5 = smov 0   ;;  %s5196_s1 = smov 0  }
  0x11 LB: > { %6145 = sst [smem:[#allocation10_spill]] %s5039_s5  ;;  %s5209_s20 = sadd.s32 4294967295, %s5043_s1   ;;  %s5043_s1 = sphi %s5196_s1, %s6171_s1   ;;  %s5039_s5 = sphi %s5194_s5, %s6176_s5   ;;  %s5035_s25 = sphi %s5192_s25, %s6175_s25   ;;  %s5031_s24 = sphi %s5190_s24, %s6174_s24  }
  0x12   : > { %s5212_s26 = sadd.s32 1, %s5043_s1   ;;  %s228_s6 = sadd.s32 1, %s5039_s5 }
  0x13   : > { %6146 = sst [smem:[#allocation11_spill]] %s5212_s26  ;;  %s225_s2 = ssub.s32 %s5043_s1, %s5212_s26 }
  0x14   : > { %p226_p0 = scmp.eq.s32.totalorder %s225_s2, 0  ;;  %p235_p1 = scmp.ne.s32.totalorder %s5039_s5, %s5035_s25 }
  0x15   : > { %p236_p2 = scmp.eq.s32.totalorder %s5043_s1, 0  ;;  %p241_p3 = scmp.ne.s32.totalorder %s5035_s25, %s5031_s24 }
  0x16   : > { %s5222_s27 = scalar_select %p226_p0, %s5039_s5, %s228_s6  }
  0x17   : > { %p5224_p4 = por %p236_p2, %p235_p1  ;;  %p242_p5 = scmp.eq.s32.totalorder %s5209_s20, 0 }
  0x18   : > { %6147 = sst [smem:[#allocation12_spill]] %s5222_s27  ;;  %p4749_p6 = scmp.lt.s32.totalorder %s5043_s1, 3 }
  0x19   : > { %p5230_p7 = por %p242_p5, %p241_p3  ;;  %s703_s29 = sand.u32 1, %s5039_s5  }
  0x1a   : > { %s4173_s3 = sshll.u32 %s703_s29, 6  ;;  %s4646_s0 = sshll.u32 %s5043_s1, 6 }
  0x1b   : > { %s6150_s24 = sld [smem:[#allocation20_spill]]  ;;  %s707_s6 = scalar_lea.vmem [#allocation4], %s4173_s3 }
  0x1c   : > { %s715_s27 = sshll.u32 %s707_s6, 4  ;;  %p5241_p8 = pnand %p4749_p6, %p5224_p4  ;;  %s716_s27 = int_to_ptr.vmem [resolvable:$true] %s715_s27 }
  0x1d   : > { %p4176_p9 = scmp.ge.s32.totalorder %s5043_s1, 1  ;;  %s704_s21 = scalar_lea.sflag [#allocation5], %s703_s29 }
  0x1e   : > { %p4951_p11 = pneg %p5241_p8 }
  0x21   : > { %s6151_s2 = smov %s6150_s24  ;;  %s712_s26 = scalar_lea.hbm %s6150_s24, %s4646_s0 }
  0x22   : > { %s713_s23 = sshll.u32 %s712_s26, 4  ;;  %s4954_s0 = scalar_lea.hbm %s6151_s2, 192  ;;  %s714_s23 = int_to_ptr.hbm [resolvable:$true] %s713_s23 }
  0x23   : > { %s4947_s5 = sshra.s32 %s714_s23, 4  ;;  %s4948_s5 = int_to_ptr.hbm [resolvable:$true] %s4947_s5 }
  0x24   : > { %s4949_s19 = scalar_lea.hbm %s4948_s5, 64  ;;  %p4955_p0 = scmp.lt.s32.totalorder %s4948_s5, %s6151_s2 }
  0x25   : > { %p4950_p10 = scmp.ne.s32.totalorder %s4948_s5, %s4949_s19  ;;  %p4956_p1 = scmp.lt.s32.totalorder %s4954_s0, %s4949_s19 }
  0x27   : > { %p4952_p12 = pnand %p4951_p11, %p4950_p10  ;;  %p4957_p2 = por %p4956_p1, %p4955_p0 }
  0x29   : > { %p4953_p13 = pneg %p4952_p12 }
  0x2b   : > { %p4958_p3 = pnand %p4957_p2, %p4953_p13 }
  0x2d   : > { %4961 = shalt.err (!%p4958_p3)
}
  0x2e   : > { %s5045_s29 = smov 64   ;;  %s5046_s30 = smov 4  }
  0x2f   : > { %4748 = dma.hbm_to_vmem [thread:$0]  (!%p5241_p8), %s714_s23, 1024, %s716_s27, %s704_s21, %s5045_s29, %s5045_s29, %s5046_s30  }
  0x30   : > { %p738_p4 = scmp.lt.s32.totalorder %s5043_s1, 4 }
  0x32   : > { %p739_p5 = pnand %p4176_p9, %p738_p4 }
  0x33   : > { %s744_s24 = sand.u32 (!%p739_p5), 1, %s5035_s25  }
  0x34   : > { %742 = sbr.rel (%p739_p5) target bundleno = 9746 (0x2612), region = 112  ;;  %s4177_s6 = sshll.u32 (!%p739_p5), %s744_s24, 6 }
  0x35   : > { %s745_s5 = scalar_lea.sflag (!%p739_p5), [#allocation5], %s744_s24  ;;  %s5260_s19 = scalar_lea.vmem (!%p739_p5), [#allocation4], %s4177_s6 }
  0x39   : > { %5022 = dma.done.wait (%p5230_p7), %s745_s5, 1024  }
  0x3a   : > { %5024 = vsyncadd (%p5230_p7), %s745_s5, 4294966272  ;;  %p848_p6 = scmp.lt.s32.totalorder %s5209_s20, 2  ;;  %v5047_v1 = vmov 0   ;;  %s6153_s3 = sld [smem:[#allocation13_spill]]  ;;  %vm1001_vm0 = vcmask 523264   ;;  %vm1075_vm1 = vcmask 1043456  }
  0x3b   : > { %4806 = vset.pattern.permute.xlu0 %v5047_v1  ;;  %s6154_s4 = sld [smem:[#allocation16_spill]]  ;;  %vm1038_vm2 = vcmask 130048   ;;  %vm1059_vm3 = vcmask 64512   ;;  %s6127_s24 = smov 80  }
  0x3c   : > { %s5268_s21 = scalar_select %p848_p6, %s5209_s20, 2 }
  0x3d   : > { %s6155_s5 = sld [smem:[#allocation15_spill]]  ;;  %p4484_p7 = scmp.ne.s32.totalorder %s5209_s20, 2 }
  0x3e   : > { %s6124_s22 = sshll.u32 %s5268_s21, 4  ;;  %s6122_s28 = sshll.u32 %s5268_s21, 7 }
  0x3f   : > { %s6123_s30 = sshll.u32 %s5268_s21, 1  ;;  %s4180_s27 = sshll.u32 %s5268_s21, 3 }
  0x40   : > { %s852_s26 = scalar_lea.vmem %s6153_s3, %s6124_s22  ;;  %s6156_s0 = sld [smem:[#allocation14_spill]] }
  0x41   : > { %v892_v2 = vld [vmem:[%s852_s26] sm:$0xff]  ;;  %v893_v3 = vld [vmem:[%s852_s26 + $0x8] sm:$0xff]  ;;  %s5282_s29 = scalar_lea.vmem %s6154_s4, %s6122_s28  ;;  %s4184_s4 = sshll.u32 %s5268_s21, 2 }
  0x42   : > { %896 = vperm.xlu0 %4806, %v892_v2   ;;  %v4218_v4 = vld [vmem:[%s5282_s29 + $0x30] sm:$0xf]  ;;  %v4659_v5 = vld [vmem:[%s5282_s29 + $0x34] sm:$0xf0]  ;;  %v4658_v7 = vld [vmem:[%s5282_s29 + $0x34] sm:$0xf] }
  0x43   : > { %v4219_v6 = vor.u32 %v4659_v5, %v4218_v4  ;;  %v4220_v8 = vld [vmem:[%s5282_s29 + $0x38] sm:$0xf0]  ;;  %v4210_v10 = vld [vmem:[%s5282_s29 + $0x20] sm:$0xf]  ;;  %v4657_v11 = vld [vmem:[%s5282_s29 + $0x24] sm:$0xf0]  ;;  %s860_s23 = scalar_lea.vmem %s6155_s5, %s6123_s30 }
  0x44   : > { %v4223_v9 = vor.u32 %v4658_v7, %v4220_v8  ;;  %v4656_v12 = vld [vmem:[%s5282_s29 + $0x24] sm:$0xf]  ;;  %v4211_v13 = vor.u32 %v4657_v11, %v4210_v10  ;;  %v4212_v14 = vld [vmem:[%s5282_s29 + $0x28] sm:$0xf0]  ;;  %v4202_v16 = vld [vmem:[%s5282_s29 + $0x10] sm:$0xf] }
  0x45   : > { %1009 = vmatpush.bf16.msra.mxu0 %v4219_v6  ;;  %v4215_v15 = vor.u32 %v4656_v12, %v4212_v14  ;;  %v4655_v17 = vld [vmem:[%s5282_s29 + $0x14] sm:$0xf0]  ;;  %v4654_v18 = vld [vmem:[%s5282_s29 + $0x14] sm:$0xf]  ;;  %v4204_v20 = vld [vmem:[%s5282_s29 + $0x18] sm:$0xf0] }
  0x46   : > { %1023 = vmatpush.bf16.msra.mxu1 %v4223_v9  ;;  %v4203_v19 = vor.u32 %v4655_v17, %v4202_v16  ;;  %v4207_v21 = vor.u32 %v4654_v18, %v4204_v20  ;;  %v4194_v22 = vld [vmem:[%s5282_s29] sm:$0xf]  ;;  %v4653_v23 = vld [vmem:[%s5282_s29 + $0x4] sm:$0xf0]  ;;  %v4652_v24 = vld [vmem:[%s5282_s29 + $0x4] sm:$0xf]  ;;  %s856_s7 = scalar_lea.vmem %s6156_s0, %s4180_s27 }
  0x47   : > { %v4195_v25 = vor.u32 %v4653_v23, %v4194_v22  ;;  %v4196_v26 = vld [vmem:[%s5282_s29 + $0x8] sm:$0xf0]  ;;  %v891_v28 = vld [vmem:[%s860_s23] sm:$0x3]  ;;  %s6157_s5 = sld [smem:[#allocation17_spill]]  ;;  %s6129_s27 = smov 96  }
  0x48   : > { %v4199_v27 = vor.u32 %v4652_v24, %v4196_v26  ;;  %v904_v30 = vperm.slane %v891_v28, 0  ;;  %v907_v32 = vperm.slane %v891_v28, 1  ;;  %v890_v36 = vld [vmem:[%s856_s7] sm:$0xff]  ;;  %s5049_s3 = smov 112   ;;  %s6131_s26 = smov 64  }
  0x49   : > { %1010 = vmatpush.bf16.msra.mxu0 %v4211_v13  ;;  %s5051_s0 = smov 32   ;;  %s5052_s7 = smov 48  }
  0x4a   : > { %901 = vperm.xlu0 %4806, %v893_v3   ;;  %1024 = vmatpush.bf16.msra.mxu1 %v4215_v15  ;;  %s4649_s6 = sshll.u32 %s5268_s21, 6  ;;  %s6158_s30 = sld [smem:[#allocation18_spill]] }
  0x4b   : > { %s6159_s28 = sshll.u32 %s5268_s21, 4 }
  0x4d   : > { %1011 = vmatpush.bf16.msra.mxu0 %v4203_v19  ;;  %s5322_s23 = scalar_lea.vmem %s6157_s5, %s4184_s4  ;;  %s6125_s4 = smov 16  }
  0x4e   : > { %1025 = vmatpush.bf16.msra.mxu1 %v4207_v21  ;;  %v5325_v41 = vld [vmem:[%s5322_s23] sm:$0x3]  ;;  %s6160_s5 = sld [smem:[#allocation19_spill]] }
  0x4f   : > { %v957_v42 = vperm.slane %v5325_v41, 0  ;;  %v958_v46 = vperm.slane %v5325_v41, 1 }
  0x50   : > { %s5380_s22 = scalar_lea.vmem %s6158_s30, %s4649_s6 }
  0x51   : > { %1012 = vmatpush.bf16.msra.mxu0 %v4195_v25  ;;  %v4660_v25 = vld [vmem:[%s5380_s22] sm:$0xff] }
  0x52   : > { %1026 = vmatpush.bf16.msra.mxu1 %v4199_v27 }
  0x56   : > { %1190 = vmatpush.bf16.msrb.mxu1 %v4660_v25 }
  0xb4   : > { %v897_v29 = vpop.permute.xlu0 %896 }
  0xb5   : > { %v905_v31 = vmul.f32 %v904_v30, %v897_v29 }
  0xb7   : > { %v908_v34 = vadd.f32 %v907_v32, %v905_v31 }
  0xb9   : > { %v5310_v38 = vadd.f32 %v908_v34, %v890_v36 }
  0xbc   : > { %v902_v33 = vpop.permute.xlu0 %901 }
  0xbd   : > { %v906_v35 = vmul.f32 %v904_v30, %v902_v33 }
  0xbf   : > { %v909_v37 = vadd.f32 %v907_v32, %v906_v35 }
  0xc1   : > { %v5312_v39 = vadd.f32 %v909_v37, %v890_v36 }
  0xc3   : > { %v955_v40 = vpack.c.bf16 %v5312_v39, %v5310_v38 }
  0xc5   : > { %4224 = vmatmul.msk.bf16.vlgmr.msra.gmra.mxu0 %vm1001_vm0, %v955_v40  ;;  %4225 = vmatmul.msk.bf16.vlgmr.msra.gmra.mxu1 %vm1001_vm0, %v955_v40 }
 0x142   : > { %v1014_v43 = vpop.f32.mrf.mxu0  ;;  %v1028_v47 = vpop.f32.mrf.mxu1 }
 0x143   : > { %v1015_v44 = vadd.f32 %v1014_v43, %v957_v42  ;;  %v1029_v48 = vadd.f32 %v1028_v47, %v958_v46 }
 0x145   : > { %v5330_v45 = vpack.c.bf16 %v1015_v44, %v1015_v44  ;;  %v5345_v50 = vpack.c.bf16 %v1029_v48, %v1029_v48  ;;  %v4661_v48 = vld [vmem:[%s5380_s22 + $0x8] sm:$0xff] }
 0x146   : > { %1168 = vmatpush.bf16.msrb.mxu0 %v4661_v48 }
 0x147   : > { %1196 = vrot.lane.b32.xlu0 %v5330_v45, %s6129_s27  ;;  %1093 = vrot.lane.b32.xlu2 %v5330_v45, %s5049_s3  ;;  %v1077_v53 = vsel %vm1075_vm1, %v5345_v50, 0 }
 0x148   : > { %1036 = vrot.lane.b32.xlu1 %v5330_v45, %s6131_s26 }
 0x14a   : > { %v1016_v22 = vpop.f32.mrf.mxu0 }
 0x14b   : > { %v1017_v23 = vadd.f32 %v1016_v22, %v957_v42 }
 0x14d   : > { %v5372_v24 = vpack.c.bf16 %v1017_v23, %v1017_v23 }
 0x14f   : > { %1198 = vrot.lane.b32.xlu2 %v5330_v45, %s5051_s0 }
 0x150   : > { %1095 = vrot.lane.b32.xlu1 %v5330_v45, %s5052_s7 }
 0x1a1   : > { %v1094_v49 = vpop.permute.xlu2 %1093 }
 0x1a9   : > { %v1199_v54 = vpop.permute.xlu2 %1198 }
 0x1aa   : > { %v1204_v57 = vsel %vm1038_vm2, %v1199_v54, 0 }
 0x1b9   : > { %v1197_v58 = vpop.permute.xlu0 %1196 }
 0x1ba   : > { %v1037_v51 = vpop.permute.xlu1 %1036 }
 0x1bb   : > { %v1043_v52 = vsel %vm1038_vm2, %v1037_v51, 0  ;;  %v1030_v51 = vpop.f32.mrf.mxu1 }
 0x1bc   : > { %1052 = vmatpush.bf16.xpose.msra.mxu2 %v1043_v52  ;;  %v1031_v52 = vadd.f32 %v1030_v51, %v958_v46 }
 0x1c2   : > { %v1096_v55 = vpop.permute.xlu1 %1095 }
 0x1c3   : > { %4226 = vmatmul.msk.bf16.vlgmr.msra.gmra.mxu2 %vm1038_vm2, %v5330_v45  ;;  %v1101_v56 = vsel %vm1038_vm2, %v1096_v55, 0 }
 0x1c4   : > { %1086 = vmatpush.bf16.msrb.mxu2 %v1077_v53  ;;  %1110 = vmatpush.bf16.xpose.msra.mxu3 %v1101_v56  ;;  %v5393_v53 = vpack.c.bf16 %v1031_v52, %v1031_v52 }
 0x1c6   : > { %v1399_v56 = vsel %vm1075_vm1, %v5393_v53, 0 }
 0x1cb   : > { %4228 = vmatmul.msk.bf16.vlgmr.msra.gmra.mxu3 %vm1038_vm2, %v1094_v49  ;;  %v4662_v49 = vld [vmem:[%s5380_s22 + $0x10] sm:$0xff] }
 0x1cc   : > { %1213 = vmatpush.bf16.xpose.msrb.mxu3 %v1204_v57  ;;  %1270 = vmatpush.bf16.msra.mxu0 %v4662_v49 }
 0x1db   : > { %4240 = vmatmul.msk.bf16.vlgmr.msrb.gmra.mxu3 %vm1038_vm2, %v1197_v58 }
 0x246   : > { %v1054_v59 = vpop.f32.mrf.mxu2 }
 0x247   : > { %v1058_v60 = vmul.f32 0.25, %v1054_v59 }
 0x249   : > { %v1060_v61 = vsel %vm1059_vm3, %v1058_v60, -inf }
 0x24a   : > { %1061 = vmax.xlane.f32.xlu1 %v1060_v61 }
 0x24e   : > { %v1056_v62 = vpop.f32.mrf.mxu2  ;;  %v1112_v63 = vpop.f32.mrf.mxu3 }
 0x24f   : > { %v1116_v0 = vmul.f32 0.25, %v1112_v63 }
 0x251   : > { %v1117_v1 = vsel %vm1059_vm3, %v1116_v0, -inf }
 0x252   : > { %1118 = vmax.xlane.f32.xlu2 %v1117_v1 }
 0x256   : > { %v1114_v2 = vpop.f32.mrf.mxu3 }
 0x25e   : > { %v1215_v3 = vpop.f32.mrf.mxu3 }
 0x25f   : > { %v1219_v4 = vmul.f32 0.25, %v1215_v3 }
 0x261   : > { %v1220_v5 = vsel %vm1059_vm3, %v1219_v4, -inf }
 0x262   : > { %1221 = vmax.xlane.f32.xlu0 %v1220_v5 }
 0x266   : > { %v1217_v6 = vpop.f32.mrf.mxu3 }
 0x2bd   : > { %v1062_v7 = vpop.xlane.xlu1 %1061 }
 0x2be   : > { %v1063_v8 = vsub.f32 %v1058_v60, %v1062_v7 }
 0x2c0   : > { %v1064_v9 = vmul.f32 1.442695, %v1063_v8 }
 0x2c2   : > { %4809 = vpow2.f32 %v1064_v9 }
 0x2c5   : > { %v1119_v10 = vpop.xlane.xlu2 %1118 }
 0x2c6   : > { %v1120_v11 = vsub.f32 %v1116_v0, %v1119_v10 }
 0x2c8   : > { %v4810_v12 = vpop.eup %4809  ;;  %v1121_v13 = vmul.f32 1.442695, %v1120_v11 }
 0x2c9   : > { %v1066_v14 = vsel %vm1059_vm3, %v4810_v12, 0.0 }
 0x2ca   : > { %4811 = vpow2.f32 %v1121_v13  ;;  %1067 = vadd.xlane.f32.xlu2 %v1066_v14 }
 0x2d0   : > { %v4812_v15 = vpop.eup %4811 }
 0x2d1   : > { %v1123_v16 = vsel %vm1059_vm3, %v4812_v15, 0.0 }
 0x2d2   : > { %1124 = vadd.xlane.f32.xlu1 %v1123_v16 }
 0x2d5   : > { %v1222_v17 = vpop.xlane.xlu0 %1221 }
 0x2d6   : > { %v1223_v18 = vsub.f32 %v1219_v4, %v1222_v17 }
 0x2d8   : > { %v1224_v19 = vmul.f32 1.442695, %v1223_v18 }
 0x2da   : > { %4813 = vpow2.f32 %v1224_v19 }
 0x2e0   : > { %v4814_v20 = vpop.eup %4813 }
 0x2e1   : > { %v1226_v21 = vsel %vm1059_vm3, %v4814_v20, 0.0 }
 0x2e2   : > { %1227 = vadd.xlane.f32.xlu0 %v1226_v21  ;;  %1130 = vrot.lane.b32.xlu2 %v5345_v50, %s5049_s3 }
 0x2ea   : > { %1279 = vrot.lane.b32.xlu2 %v5330_v45, %s6125_s4 }
 0x2eb   : > { %1232 = vrot.lane.b32.xlu1 %v5345_v50, %s6129_s27 }
 0x2f3   : > { %1277 = vrot.lane.b32.xlu1 %v5330_v45, %s6127_s24 }
 0x2f6   : > { %1361 = vrot.lane.b32.xlu0 %v5372_v24, %s6131_s26  ;;  %s5058_s26 = smov (!%p4484_p7), 64  }
 0x33d   : > { %v1068_v26 = vpop.xlane.xlu2 %1067 }
 0x33e   : > { %4815 = vrcp.f32 %v1068_v26 }
 0x344   : > { %v4816_v27 = vpop.eup %4815 }
 0x345   : > { %v1070_v28 = vmul.f32 %v4816_v27, %v4810_v12  ;;  %v1131_v29 = vpop.permute.xlu2 %1130  ;;  %v1125_v31 = vpop.xlane.xlu1 %1124 }
 0x346   : > { %v1136_v30 = vsel %vm1075_vm1, %v1131_v29, 0  ;;  %4817 = vrcp.f32 %v1125_v31 }
 0x347   : > { %1145 = vmatpush.bf16.msra.mxu2 %v1136_v30  ;;  %v1071_v32 = vpack.c.bf16 %v1070_v28, %v1070_v28 }
 0x349   : > { %4227 = vmatmul.msk.bf16.vlgmr.msrb.gmra.mxu2 %vm1059_vm3, %v1071_v32 }
 0x34c   : > { %v4818_v35 = vpop.eup %4817 }
 0x34d   : > { %v1280_v33 = vpop.permute.xlu2 %1279  ;;  %v1127_v36 = vmul.f32 %v4818_v35, %v4812_v15 }
 0x34e   : > { %v1285_v34 = vsel %vm1038_vm2, %v1280_v33, 0 }
 0x34f   : > { %1294 = vmatpush.bf16.xpose.msra.mxu1 %v1285_v34  ;;  %v1128_v37 = vpack.c.bf16 %v1127_v36, %v1127_v36 }
 0x355   : > { %v1228_v40 = vpop.xlane.xlu0 %1227 }
 0x356   : > { %4819 = vrcp.f32 %v1228_v40 }
 0x359   : > { %4229 = vmatmul.msk.bf16.vlgmr.msra.gmra.mxu2 %vm1059_vm3, %v1128_v37 }
 0x35c   : > { %v4820_v44 = vpop.eup %4819 }
 0x35d   : > { %v1233_v42 = vpop.permute.xlu1 %1232  ;;  %v1230_v45 = vmul.f32 %v4820_v44, %v4814_v20 }
 0x35e   : > { %v1238_v43 = vsel %vm1075_vm1, %v1233_v42, 0 }
 0x35f   : > { %1247 = vmatpush.bf16.msrb.mxu2 %v1238_v43  ;;  %v1231_v47 = vpack.c.bf16 %v1230_v45, %v1230_v45 }
 0x365   : > { %v1278_v61 = vpop.permute.xlu1 %1277 }
 0x368   : > { %v1362_v58 = vpop.permute.xlu0 %1361 }
 0x369   : > { %4241 = vmatmul.msk.bf16.vlgmr.msrb.gmra.mxu2 %vm1059_vm3, %v1231_v47  ;;  %v1367_v62 = vsel %vm1038_vm2, %v1362_v58, 0 }
 0x3cc   : > { %v1088_v54 = vpop.f32.mrf.mxu2 }
 0x3cd   : > { %v1092_v55 = vpack.c.bf16 %v1088_v54, %v1088_v54 }
 0x3cf   : > { %4239 = vmatmul.msk.bf16.vlgmr.msrb.gmra.mxu1 %vm1038_vm2, %v1092_v55 }
 0x3d0   : > { %1408 = vmatpush.bf16.msrb.mxu1 %v1399_v56 }
 0x3d4   : > { %v1090_v57 = vpop.f32.mrf.mxu2 }
 0x3dc   : > { %v1147_v59 = vpop.f32.mrf.mxu2 }
 0x3dd   : > { %v1151_v60 = vpack.c.bf16 %v1147_v59, %v1147_v59 }
 0x3df   : > { %4234 = vmatmul.msk.bf16.vlgmr.msrb.gmra.mxu0 %vm1038_vm2, %v1151_v60  ;;  %4247 = vmatmul.msk.bf16.vlgmr.msra.gmra.mxu1 %vm1038_vm2, %v1278_v61 }
 0x3e0   : > { %1376 = vmatpush.bf16.xpose.msrb.mxu0 %v1367_v62  ;;  %1500 = vmatpush.bf16.msra.mxu1 %v4660_v25 }
 0x3e4   : > { %v1149_v41 = vpop.f32.mrf.mxu2 }
 0x3ec   : > { %v1249_v46 = vpop.f32.mrf.mxu2 }
 0x3ed   : > { %v1253_v63 = vpack.c.bf16 %v1249_v46, %v1249_v46 }
 0x3ef   : > { %4246 = vmatmul.msk.bf16.vlgmr.msra.gmra.mxu0 %vm1038_vm2, %v1253_v63 }
 0x3f0   : > { %1484 = vmatpush.bf16.msra.mxu0 %v4661_v48  ;;  %v5433_v48 = vld [vmem:[%s5380_s22 + $0x18] sm:$0xff] }
 0x3f1   : > { %1351 = vmatpush.bf16.msra.mxu2 %v5433_v48 }
 0x3f4   : > { %v1251_v0 = vpop.f32.mrf.mxu2 }
 0x3ff   : > { %4254 = vmatmul.msk.bf16.vlgmr.msrb.gmra.mxu0 %vm1038_vm2, %v5372_v24 }
 0x400   : > { %1574 = vmatpush.bf16.msrb.mxu0 %v4662_v49 }
 0x44c   : > { %v1192_v1 = vpop.f32.mrf.mxu1 }
 0x454   : > { %v1194_v2 = vpop.f32.mrf.mxu1 }
 0x45c   : > { %v1170_v3 = vpop.f32.mrf.mxu0  ;;  %v1296_v4 = vpop.f32.mrf.mxu1 }
 0x45d   : > { %v1193_v5 = vadd.f32 %v1192_v1, %v1170_v3  ;;  %v1300_v6 = vmul.f32 0.25, %v1296_v4 }
 0x45f   : > { %v1301_v7 = vsel %vm1059_vm3, %v1300_v6, -inf }
 0x460   : > { %1302 = vmax.xlane.f32.xlu1 %v1301_v7 }
 0x464   : > { %v1172_v8 = vpop.f32.mrf.mxu0  ;;  %v1298_v9 = vpop.f32.mrf.mxu1 }
 0x46c   : > { %v1272_v10 = vpop.f32.mrf.mxu0 }
 0x46d   : > { %v5405_v11 = vadd.f32 %v1272_v10, %v1193_v5 }
 0x474   : > { %v1274_v12 = vpop.f32.mrf.mxu0 }
 0x479   : > { %1417 = vrot.lane.b32.xlu1 %v5372_v24, %s5052_s7 }
 0x47c   : > { %v1378_v13 = vpop.f32.mrf.mxu0 }
 0x47d   : > { %v1382_v14 = vmul.f32 0.25, %v1378_v13 }
 0x47f   : > { %v1383_v15 = vsel %vm1059_vm3, %v1382_v14, -inf }
 0x480   : > { %1384 = vmax.xlane.f32.xlu0 %v1383_v15 }
 0x481   : > { %1506 = vrot.lane.b32.xlu1 %v5372_v24, %s6129_s27 }
 0x484   : > { %v1380_v16 = vpop.f32.mrf.mxu0 }
 0x4d3   : > { %v1303_v17 = vpop.xlane.xlu1 %1302 }
 0x4d4   : > { %v1304_v18 = vsub.f32 %v1300_v6, %v1303_v17 }
 0x4d6   : > { %v1305_v19 = vmul.f32 1.442695, %v1304_v18 }
 0x4d8   : > { %4821 = vpow2.f32 %v1305_v19 }
 0x4de   : > { %v4822_v20 = vpop.eup %4821 }
 0x4df   : > { %v1307_v21 = vsel %vm1059_vm3, %v4822_v20, 0.0 }
 0x4e0   : > { %1308 = vadd.xlane.f32.xlu0 %v1307_v21 }
 0x4eb   : > { %v1418_v33 = vpop.permute.xlu1 %1417 }
 0x4ec   : > { %v1423_v40 = vsel %vm1038_vm2, %v1418_v33, 0 }
 0x4f3   : > { %v1385_v22 = vpop.xlane.xlu0 %1384  ;;  %v1507_v47 = vpop.permute.xlu1 %1506 }
 0x4f4   : > { %v1386_v23 = vsub.f32 %v1382_v14, %v1385_v22  ;;  %1415 = vrot.lane.b32.xlu0 %v5372_v24, %s5049_s3 }
 0x4f6   : > { %v1387_v25 = vmul.f32 1.442695, %v1386_v23 }
 0x4f8   : > { %4823 = vpow2.f32 %v1387_v25 }
 0x4fc   : > { %1583 = vrot.lane.b32.xlu0 %v5372_v24, %s6125_s4  ;;  %s5456_s4 = scalar_lea.vmem %s6160_s5, %s6159_s28  ;;  %s6161_s28 = sshll.u32 %s5268_s21, 1 }
 0x4fd   : > { %v5459_v19 = vld [vmem:[%s5456_s4] sm:$0x3f]  ;;  %s5499_s5 = scalar_lea.vmem %s6101_s8, %s6161_s28  ;;  %s5061_s28 = smov (!%p4484_p7), 48  }
 0x4fe   : > { %v4824_v26 = vpop.eup %4823 }
 0x4ff   : > { %v1389_v27 = vsel %vm1059_vm3, %v4824_v26, 0.0 }
 0x500   : > { %1390 = vadd.xlane.f32.xlu2 %v1389_v27 }
 0x518   : > { %1313 = vrot.lane.b32.xlu2 %v5345_v50, %s6127_s24 }
 0x520   : > { %1508 = vrot.lane.b32.xlu2 %v5372_v24, %s5051_s0 }
 0x528   : > { %1581 = vrot.lane.b32.xlu2 %v5372_v24, %s6127_s24 }
 0x553   : > { %v1309_v28 = vpop.xlane.xlu0 %1308 }
 0x554   : > { %4825 = vrcp.f32 %v1309_v28 }
 0x55a   : > { %v4826_v31 = vpop.eup %4825 }
 0x55b   : > { %v1311_v34 = vmul.f32 %v4826_v31, %v4822_v20  ;;  %v1656_v20 = vperm.slane %v5459_v19, 0 }
 0x55d   : > { %v1312_v24 = vpack.c.bf16 %v1311_v34, %v1311_v34 }
 0x566   : > { %v1416_v29 = vpop.permute.xlu0 %1415 }
 0x56e   : > { %v1584_v37 = vpop.permute.xlu0 %1583 }
 0x56f   : > { %v1589_v43 = vsel %vm1038_vm2, %v1584_v37, 0  ;;  %v5055_v37 = vmov 64.0  }
 0x573   : > { %v1391_v30 = vpop.xlane.xlu2 %1390 }
 0x574   : > { %4827 = vrcp.f32 %v1391_v30 }
 0x57a   : > { %v4828_v32 = vpop.eup %4827 }
 0x57b   : > { %v1393_v35 = vmul.f32 %v4828_v32, %v4824_v26  ;;  %v1314_v36 = vpop.permute.xlu2 %1313 }
 0x57c   : > { %v1319_v50 = vsel %vm1075_vm1, %v1314_v36, 0 }
 0x57d   : > { %v1394_v42 = vpack.c.bf16 %v1393_v35, %v1393_v35  ;;  %1328 = vmatpush.bf16.msra.mxu3 %v1319_v50 }
 0x57f   : > { %4255 = vmatmul.msk.bf16.vlgmr.msrb.gmra.mxu1 %vm1059_vm3, %v1394_v42 }
 0x580   : > { %1598 = vmatpush.bf16.xpose.msrb.mxu1 %v1589_v43  ;;  %4248 = vmatmul.msk.bf16.vlgmr.msra.gmra.mxu3 %vm1059_vm3, %v1312_v24 }
 0x581   : > { %1432 = vmatpush.bf16.xpose.msrb.mxu3 %v1423_v40 }
 0x583   : > { %v1509_v44 = vpop.permute.xlu2 %1508 }
 0x584   : > { %v1514_v45 = vsel %vm1038_vm2, %v1509_v44, 0 }
 0x589   : > { %1523 = vmatpush.bf16.xpose.msra.mxu3 %v1514_v45 }
 0x58b   : > { %v1582_v57 = vpop.permute.xlu2 %1581 }
 0x590   : > { %4256 = vmatmul.msk.bf16.vlgmr.msrb.gmra.mxu3 %vm1038_vm2, %v1416_v29 }
 0x5a0   : > { %4260 = vmatmul.msk.bf16.vlgmr.msra.gmra.mxu3 %vm1038_vm2, %v1507_v47 }
 0x5fc   : > { %v1410_v49 = vpop.f32.mrf.mxu1 }
 0x5fd   : > { %v1414_v51 = vpack.c.bf16 %v1410_v49, %v1410_v49 }
 0x5ff   : > { %4259 = vmatmul.msk.bf16.vlgmr.msra.gmra.mxu1 %vm1038_vm2, %v1414_v51 }
 0x603   : > { %v1330_v52 = vpop.f32.mrf.mxu3 }
 0x604   : > { %v1334_v54 = vpack.c.bf16 %v1330_v52, %v1330_v52  ;;  %v1412_v55 = vpop.f32.mrf.mxu1 }
 0x606   : > { %4253 = vmatmul.msk.bf16.vlgmr.msra.gmra.mxu2 %vm1038_vm2, %v1334_v54 }
 0x60b   : > { %v1332_v56 = vpop.f32.mrf.mxu3 }
 0x60f   : > { %4263 = vmatmul.msk.bf16.vlgmr.msrb.gmra.mxu1 %vm1038_vm2, %v1582_v57 }
 0x613   : > { %v1434_v58 = vpop.f32.mrf.mxu3 }
 0x614   : > { %v1438_v59 = vmul.f32 0.25, %v1434_v58 }
 0x616   : > { %v1439_v60 = vsel %vm1059_vm3, %v1438_v59, -inf }
 0x617   : > { %1440 = vmax.xlane.f32.xlu0 %v1439_v60 }
 0x61b   : > { %v1436_v61 = vpop.f32.mrf.mxu3 }
 0x623   : > { %v1525_v62 = vpop.f32.mrf.mxu3 }
 0x624   : > { %v1529_v41 = vmul.f32 0.25, %v1525_v62 }
 0x626   : > { %v1530_v46 = vsel %vm1059_vm3, %v1529_v41, -inf }
 0x627   : > { %1531 = vmax.xlane.f32.xlu2 %v1530_v46 }
 0x62b   : > { %v1527_v63 = vpop.f32.mrf.mxu3 }
 0x67c   : > { %v5441_v0 = vpop.f32.mrf.mxu1 }
 0x684   : > { %v1504_v1 = vpop.f32.mrf.mxu1 }
 0x689   : > { %v1353_v2 = vpop.f32.mrf.mxu2 }
 0x68a   : > { %v1357_v3 = vadd.f32 %v1353_v2, %v5405_v11  ;;  %v1441_v4 = vpop.xlane.xlu0 %1440 }
 0x68b   : > { %v1442_v5 = vsub.f32 %v1438_v59, %v1441_v4 }
 0x68c   : > { %v1600_v6 = vpop.f32.mrf.mxu1  ;;  %v1657_v21 = vadd.f32 %v1656_v20, %v1357_v3 }
 0x68d   : > { %v1443_v7 = vmul.f32 1.442695, %v1442_v5  ;;  %v1604_v8 = vmul.f32 0.25, %v1600_v6 }
 0x68e   : > { %v1659_v22 = vadd.f32 %v1657_v21, %v5310_v38 }
 0x68f   : > { %4829 = vpow2.f32 %v1443_v7  ;;  %v1605_v9 = vsel %vm1059_vm3, %v1604_v8, -inf }
 0x690   : > { %1606 = vmax.xlane.f32.xlu1 %v1605_v9  ;;  %v1661_v23 = vsel %vm1001_vm0, %v1659_v22, 0.0 }
 0x691   : > { %v1355_v10 = vpop.f32.mrf.mxu2 }
 0x694   : > { %v1602_v12 = vpop.f32.mrf.mxu1 }
 0x695   : > { %v4830_v13 = vpop.eup %4829 }
 0x696   : > { %v1445_v14 = vsel %vm1059_vm3, %v4830_v13, 0.0 }
 0x697   : > { %1446 = vadd.xlane.f32.xlu0 %v1445_v14 }
 0x69a   : > { %v1532_v15 = vpop.xlane.xlu2 %1531 }
 0x69b   : > { %v1533_v16 = vsub.f32 %v1529_v41, %v1532_v15 }
 0x69d   : > { %v1534_v17 = vmul.f32 1.442695, %v1533_v16 }
 0x69f   : > { %4831 = vpow2.f32 %v1534_v17 }
 0x6a5   : > { %v4832_v11 = vpop.eup %4831 }
 0x6a6   : > { %v1536_v18 = vsel %vm1059_vm3, %v4832_v11, 0.0 }
 0x6a7   : > { %1537 = vadd.xlane.f32.xlu0 %v1536_v18 }
 0x6a9   : > { %1452 = vrot.lane.b32.xlu1 %v5393_v53, %s5049_s3 }
 0x6bb   : > { %1542 = vrot.lane.b32.xlu0 %v5393_v53, %s6129_s27  ;;  %s6166_s27 = smov 16  }
 0x6d3   : > { %1662 = vadd.xlane.f32.xlu1 %v1661_v23 }
 0x703   : > { %v1607_v25 = vpop.xlane.xlu1 %1606 }
 0x704   : > { %v1608_v26 = vsub.f32 %v1604_v8, %v1607_v25 }
 0x706   : > { %v1609_v27 = vmul.f32 1.442695, %v1608_v26  ;;  %v4667_v26 = vld [vmem:[%s5260_s19 + $0x18] sm:$0xff] }
 0x708   : > { %4833 = vpow2.f32 %v1609_v27  ;;  %v4666_v27 = vld [vmem:[%s5260_s19 + $0x10] sm:$0xff] }
 0x70a   : > { %v1447_v29 = vpop.xlane.xlu0 %1446 }
 0x70b   : > { %4835 = vrcp.f32 %v1447_v29 }
 0x70e   : > { %v4834_v28 = vpop.eup %4833 }
 0x70f   : > { %v1611_v30 = vsel %vm1059_vm3, %v4834_v28, 0.0 }
 0x710   : > { %1612 = vadd.xlane.f32.xlu2 %v1611_v30  ;;  %v4664_v30 = vld [vmem:[%s5260_s19] sm:$0xff] }
 0x711   : > { %v4836_v31 = vpop.eup %4835 }
 0x712   : > { %v1449_v32 = vmul.f32 %v4836_v31, %v4830_v13 }
 0x714   : > { %v1450_v38 = vpack.c.bf16 %v1449_v32, %v1449_v32 }
 0x71a   : > { %v1538_v35 = vpop.xlane.xlu0 %1537 }
 0x71b   : > { %v1453_v33 = vpop.permute.xlu1 %1452  ;;  %4837 = vrcp.f32 %v1538_v35 }
 0x71c   : > { %v1458_v34 = vsel %vm1075_vm1, %v1453_v33, 0  ;;  %4839 = vrcp.f32 %v5055_v37 }
 0x71d   : > { %1467 = vmatpush.bf16.msrb.mxu2 %v1458_v34 }
 0x720   : > { %4257 = vmatmul.msk.bf16.vlgmr.msrb.gmra.mxu2 %vm1059_vm3, %v1450_v38 }
 0x721   : > { %v4838_v36 = vpop.eup %4837 }
 0x722   : > { %v1540_v50 = vmul.f32 %v4838_v36, %v4832_v11  ;;  %v4840_v43 = vpop.eup %4839 }
 0x723   : > { %v1668_v44 = vmul.f32 64.0, %v4840_v43  ;;  %vm1672_vm4 = vweird.f32 %v4840_v43 }
 0x724   : > { %v1541_v24 = vpack.c.bf16 %v1540_v50, %v1540_v50 }
 0x725   : > { %v1669_v45 = vsub.f32 1.0, %v1668_v44 }
 0x727   : > { %v1670_v47 = vmul.f32 %v4840_v43, %v1669_v45 }
 0x728   : > { %1617 = vrot.lane.b32.xlu2 %v5393_v53, %s6127_s24  ;;  %s6162_s24 = sshll.u32 %s5268_s21, 7  ;;  %s6163_s21 = smov 64  }
 0x729   : > { %v1671_v49 = vadd.f32 %v4840_v43, %v1670_v47  ;;  %s5511_s30 = scalar_lea.vmem %s6102_s9, %s6162_s24 }
 0x72a   : > { %v4675_v32 = vld [vmem:[%s5511_s30 + $0x38] sm:$0xff]  ;;  %v4674_v35 = vld [vmem:[%s5511_s30 + $0x30] sm:$0xff]  ;;  %v4673_v50 = vld [vmem:[%s5511_s30 + $0x28] sm:$0xff] }
 0x72b   : > { %v5474_v53 = vsel %vm1672_vm4, %v4840_v43, %v1671_v49  ;;  %1815 = vmatpush.bf16.msra.mxu1 %v4675_v32 }
 0x72d   : > { %v1543_v40 = vpop.permute.xlu0 %1542 }
 0x72e   : > { %v1548_v42 = vsel %vm1075_vm1, %v1543_v40, 0 }
 0x72f   : > { %1557 = vmatpush.bf16.msra.mxu2 %v1548_v42  ;;  %1816 = vmatpush.bf16.msra.mxu1 %v4674_v35  ;;  %v4672_v42 = vld [vmem:[%s5511_s30 + $0x20] sm:$0xff]  ;;  %v4681_v35 = vld [vmem:[%s5282_s29 + $0x64] sm:$0xf0] }
 0x732   : > { %4261 = vmatmul.msk.bf16.vlgmr.msra.gmra.mxu2 %vm1059_vm3, %v1541_v24 }
 0x733   : > { %1649 = vmatpush.bf16.msrb.mxu2 %v5433_v48  ;;  %1817 = vmatpush.bf16.msra.mxu1 %v4673_v50  ;;  %v4378_v50 = vld [vmem:[%s5282_s29 + $0x68] sm:$0xf0] }
 0x737   : > { %1818 = vmatpush.bf16.msra.mxu1 %v4672_v42  ;;  %v4368_v42 = vld [vmem:[%s5282_s29 + $0x50] sm:$0xf] }
 0x746   : > { %v1663_v51 = vpop.xlane.xlu1 %1662 }
 0x747   : > { %v1674_v52 = vmul.f32 %v5474_v53, %v1663_v51 }
 0x749   : > { %v5477_v54 = vsub.f32 %v1659_v22, %v1674_v52  ;;  %v1712_v52 = vperm.slane %v5459_v19, 1 }
 0x74b   : > { %v1678_v55 = vmul.f32 %v5477_v54, %v5477_v54 }
 0x74d   : > { %v1680_v48 = vsel %vm1001_vm0, %v1678_v55, 0.0 }
 0x751   : > { %1681 = vadd.xlane.f32.xlu2 %v1680_v48 }
 0x783   : > { %v1613_v56 = vpop.xlane.xlu2 %1612 }
 0x784   : > { %4841 = vrcp.f32 %v1613_v56 }
 0x78a   : > { %v4842_v57 = vpop.eup %4841 }
 0x78b   : > { %v1615_v58 = vmul.f32 %v4842_v57, %v4834_v28  ;;  %v1618_v59 = vpop.permute.xlu2 %1617  ;;  %v4665_v28 = vld [vmem:[%s5260_s19 + $0x8] sm:$0xff]  ;;  %v1715_v57 = vperm.slane %v5459_v19, 2 }
 0x78c   : > { %v1623_v60 = vsel %vm1075_vm1, %v1618_v59, 0 }
 0x78d   : > { %v1616_v61 = vpack.c.bf16 %v1615_v58, %v1615_v58  ;;  %1632 = vmatpush.bf16.msrb.mxu3 %v1623_v60 }
 0x790   : > { %4264 = vmatmul.msk.bf16.vlgmr.msrb.gmra.mxu3 %vm1059_vm3, %v1616_v61 }
 0x7a3   : > { %v1469_v62 = vpop.f32.mrf.mxu2 }
 0x7a4   : > { %v1473_v41 = vpack.c.bf16 %v1469_v62, %v1469_v62 }
 0x7a6   : > { %4258 = vmatmul.msk.bf16.vlgmr.msra.gmra.mxu0 %vm1038_vm2, %v1473_v41 }
 0x7a7   : > { %1753 = vmatpush.bf16.msra.mxu0 %v4667_v26 }
 0x7ab   : > { %v1471_v46 = vpop.f32.mrf.mxu2  ;;  %1754 = vmatpush.bf16.msra.mxu0 %v4666_v27 }
 0x7ac   : > { %v4671_v46 = vld [vmem:[%s5511_s30 + $0x18] sm:$0xff] }
 0x7ad   : > { %1819 = vmatpush.bf16.msra.mxu1 %v4671_v46 }
 0x7af   : > { %1755 = vmatpush.bf16.msra.mxu0 %v4665_v28 }
 0x7b3   : > { %1756 = vmatpush.bf16.msra.mxu0 %v4664_v30  ;;  %v4683_v30 = vld [vmem:[%s5282_s29 + $0x74] sm:$0xf0] }
 0x7b5   : > { %v1559_v63 = vpop.f32.mrf.mxu2 }
 0x7b6   : > { %v1563_v1 = vpack.c.bf16 %v1559_v63, %v1559_v63  ;;  %v4669_v63 = vld [vmem:[%s5511_s30 + $0x8] sm:$0xff] }
 0x7b8   : > { %4262 = vmatmul.msk.bf16.vlgmr.msrb.gmra.mxu0 %vm1038_vm2, %v1563_v1  ;;  %v4668_v1 = vld [vmem:[%s5511_s30] sm:$0xff] }
 0x7bd   : > { %v1561_v2 = vpop.f32.mrf.mxu2 }
 0x813   : > { %v1634_v3 = vpop.f32.mrf.mxu3 }
 0x814   : > { %v1638_v4 = vpack.c.bf16 %v1634_v3, %v1634_v3  ;;  %v4807_v3 = vld [vmem:[%s5499_s5] ss:$0 sm:$0xff] }
 0x816   : > { %4265 = vmatmul.msk.bf16.vlgmr.msrb.gmra.mxu2 %vm1038_vm2, %v1638_v4 }
 0x81b   : > { %v1636_v5 = vpop.f32.mrf.mxu3 }
 0x823   : > { %v1486_v6 = vpop.f32.mrf.mxu0 }
 0x824   : > { %v1503_v8 = vadd.f32 %v5441_v0, %v1486_v6 }
 0x82b   : > { %v1488_v7 = vpop.f32.mrf.mxu0 }
 0x835   : > { %v1576_v9 = vpop.f32.mrf.mxu0 }
 0x836   : > { %v1580_v10 = vadd.f32 %v1576_v9, %v1503_v8 }
 0x83d   : > { %v1578_v12 = vpop.f32.mrf.mxu0 }
 0x899   : > { %v1651_v13 = vpop.f32.mrf.mxu2 }
 0x89a   : > { %v1655_v14 = vadd.f32 %v1651_v13, %v1580_v10  ;;  %v1766_v10 = vperm.slane %v5459_v19, 3 }
 0x89c   : > { %v1658_v15 = vadd.f32 %v1656_v20, %v1655_v14 }
 0x89e   : > { %v1660_v16 = vadd.f32 %v1658_v15, %v5312_v39  ;;  %v1682_v39 = vpop.xlane.xlu2 %1681 }
 0x89f   : > { %v1686_v20 = vmul.f32 %v1682_v39, %v5474_v53 }
 0x8a0   : > { %v1664_v17 = vsel %vm1001_vm0, %v1660_v16, 0.0 }
 0x8a1   : > { %1665 = vadd.xlane.f32.xlu0 %v1664_v17  ;;  %v1653_v11 = vpop.f32.mrf.mxu2  ;;  %v1688_v25 = vadd.f32 1e-05, %v1686_v20 }
 0x8a3   : > { %4843 = vrsqrt.f32 %v1688_v25  ;;  %vm1696_vm6 = vweird.f32 %v1688_v25 }
 0x8a9   : > { %v4844_v29 = vpop.eup %4843 }
 0x8aa   : > { %v1691_v31 = vmul.f32 %v4844_v29, %v1688_v25  ;;  %vm1697_vm5 = vweird.f32 %v4844_v29 }
 0x8ab   : > { %vm1698_vm7 = vmor %vm1696_vm6, %vm1697_vm5 }
 0x8ac   : > { %v1692_v33 = vmul.f32 %v4844_v29, %v1691_v31  ;;  %v4682_v31 = vld [vmem:[%s5282_s29 + $0x74] sm:$0xf] }
 0x8ae   : > { %v1693_v37 = vmul.f32 0.5, %v1692_v33  ;;  %v4386_v33 = vld [vmem:[%s5282_s29 + $0x78] sm:$0xf0] }
 0x8b0   : > { %v1694_v40 = vsub.f32 1.5, %v1693_v37 }
 0x8b2   : > { %v1695_v43 = vmul.f32 %v4844_v29, %v1694_v40 }
 0x8b4   : > { %v1699_v47 = vsel %vm1698_vm7, %v4844_v29, %v1695_v43  ;;  %v4384_v29 = vld [vmem:[%s5282_s29 + $0x70] sm:$0xf]  ;;  %v4678_v43 = vld [vmem:[%s5282_s29 + $0x54] sm:$0xf] }
 0x8b5   : > { %v1710_v55 = vmul.f32 %v1699_v47, %v5477_v54  ;;  %v4670_v54 = vld [vmem:[%s5511_s30 + $0x10] sm:$0xff]  ;;  %v4385_v32 = vor.u32 %v4683_v30, %v4384_v29 }
 0x8b6   : > { %1820 = vmatpush.bf16.msra.mxu1 %v4670_v54 }
 0x8b7   : > { %v1713_v58 = vmul.f32 %v1712_v52, %v1710_v55  ;;  %1984 = vmatpush.bf16.msra.mxu3 %v4385_v32  ;;  %v4677_v55 = vld [vmem:[%s5282_s29 + $0x44] sm:$0xf0] }
 0x8b9   : > { %v1716_v61 = vadd.f32 %v1715_v57, %v1713_v58  ;;  %v4362_v58 = vld [vmem:[%s5282_s29 + $0x48] sm:$0xf0] }
 0x8ba   : > { %1821 = vmatpush.bf16.msra.mxu1 %v4669_v63 }
 0x8be   : > { %1822 = vmatpush.bf16.msra.mxu1 %v4668_v1 }
 0x914   : > { %v1666_v18 = vpop.xlane.xlu0 %1665 }
 0x915   : > { %v1675_v0 = vmul.f32 %v5474_v53, %v1666_v18 }
 0x917   : > { %v1677_v21 = vsub.f32 %v1660_v16, %v1675_v0 }
 0x919   : > { %v1679_v22 = vmul.f32 %v1677_v21, %v1677_v21 }
 0x91b   : > { %v1683_v23 = vsel %vm1001_vm0, %v1679_v22, 0.0 }
 0x91c   : > { %1684 = vadd.xlane.f32.xlu1 %v1683_v23 }
 0x98f   : > { %v1685_v34 = vpop.xlane.xlu1 %1684 }
 0x990   : > { %v1687_v38 = vmul.f32 %v1685_v34, %v5474_v53  ;;  %v4389_v34 = vor.u32 %v4682_v31, %v4386_v33 }
 0x992   : > { %v1689_v36 = vadd.f32 1e-05, %v1687_v38  ;;  %1998 = vmatpush.bf16.msra.mxu2 %v4389_v34  ;;  %v4376_v38 = vld [vmem:[%s5282_s29 + $0x60] sm:$0xf] }
 0x993   : > { %v4377_v37 = vor.u32 %v4681_v35, %v4376_v38 }
 0x994   : > { %4845 = vrsqrt.f32 %v1689_v36  ;;  %vm1706_vm9 = vweird.f32 %v1689_v36 }
 0x995   : > { %1985 = vmatpush.bf16.msra.mxu3 %v4377_v37 }
 0x99a   : > { %v4846_v24 = vpop.eup %4845 }
 0x99b   : > { %v1701_v44 = vmul.f32 %v4846_v24, %v1689_v36  ;;  %vm1707_vm8 = vweird.f32 %v4846_v24  ;;  %v4680_v36 = vld [vmem:[%s5282_s29 + $0x64] sm:$0xf] }
 0x99c   : > { %vm1708_vm10 = vmor %vm1706_vm9, %vm1707_vm8  ;;  %v4381_v40 = vor.u32 %v4680_v36, %v4378_v50 }
 0x99d   : > { %v1702_v45 = vmul.f32 %v4846_v24, %v1701_v44 }
 0x99e   : > { %1999 = vmatpush.bf16.msra.mxu2 %v4381_v40 }
 0x99f   : > { %v1703_v49 = vmul.f32 0.5, %v1702_v45  ;;  %v4370_v45 = vld [vmem:[%s5282_s29 + $0x58] sm:$0xf0] }
 0x9a1   : > { %v1704_v51 = vsub.f32 1.5, %v1703_v49  ;;  %v4373_v49 = vor.u32 %v4678_v43, %v4370_v45 }
 0x9a3   : > { %v1705_v48 = vmul.f32 %v4846_v24, %v1704_v51  ;;  %2000 = vmatpush.bf16.msra.mxu2 %v4373_v49 }
 0x9a5   : > { %v1709_v56 = vsel %vm1708_vm10, %v4846_v24, %v1705_v48  ;;  %v4679_v24 = vld [vmem:[%s5282_s29 + $0x54] sm:$0xf0]  ;;  %v4676_v48 = vld [vmem:[%s5282_s29 + $0x44] sm:$0xf] }
 0x9a6   : > { %v1711_v59 = vmul.f32 %v1709_v56, %v1677_v21  ;;  %v4369_v44 = vor.u32 %v4679_v24, %v4368_v42 }
 0x9a8   : > { %v1714_v60 = vmul.f32 %v1712_v52, %v1711_v59  ;;  %1986 = vmatpush.bf16.msra.mxu3 %v4369_v44  ;;  %v4360_v52 = vld [vmem:[%s5282_s29 + $0x40] sm:$0xf]  ;;  %v4365_v59 = vor.u32 %v4676_v48, %v4362_v58  ;;  %s6164_s29 = smov 96  }
 0x9aa   : > { %v1717_v62 = vadd.f32 %v1715_v57, %v1714_v60  ;;  %v4361_v57 = vor.u32 %v4677_v55, %v4360_v52  ;;  %2001 = vmatpush.bf16.msra.mxu2 %v4365_v59 }
 0x9ac   : > { %v1718_v41 = vpack.c.bf16 %v1717_v62, %v1716_v61  ;;  %1987 = vmatpush.bf16.msra.mxu3 %v4361_v57 }
 0x9ae   : > { %4282 = vmatmul.msk.bf16.vlgmr.msra.gmra.mxu0 %vm1001_vm0, %v1718_v41 }
 0xa2b   : > { %v1758_v2 = vpop.f32.mrf.mxu0 }
 0xa2c   : > { %v1759_v4 = vadd.f32 %v4807_v3, %v1758_v2 }
 0xa2e   : > { %v1763_v7 = vmax.f32 %v1759_v4, 0.0 }
 0xa33   : > { %v1760_v5 = vpop.f32.mrf.mxu0 }
 0xa34   : > { %v1761_v6 = vadd.f32 %v4807_v3, %v1760_v5 }
 0xa36   : > { %v1764_v8 = vmax.f32 %v1761_v6, 0.0 }
 0xa38   : > { %v1765_v9 = vpack.c.bf16 %v1764_v8, %v1763_v7 }
 0xa3a   : > { %1823 = vmatmul.bf16.vlgmr.msra.gmra.mxu1 %v1765_v9  ;;  %v1875_v9 = vperm.slane %v5459_v19, 4 }
 0xab7   : > { %v1824_v12 = vpop.f32.mrf.mxu1 }
 0xab8   : > { %v1825_v13 = vadd.f32 %v1824_v12, %v1766_v10 }
 0xaba   : > { %v1829_v14 = vadd.f32 %v1825_v13, %v1716_v61 }
 0xabc   : > { %v1831_v15 = vsel %vm1001_vm0, %v1829_v14, 0.0 }
 0xabd   : > { %1832 = vadd.xlane.f32.xlu1 %v1831_v15 }
 0xabf   : > { %v1826_v16 = vpop.f32.mrf.mxu1 }
 0xac0   : > { %v1827_v17 = vadd.f32 %v1826_v16, %v1766_v10 }
 0xac2   : > { %v1830_v11 = vadd.f32 %v1827_v17, %v1717_v62 }
 0xac4   : > { %v1834_v18 = vsel %vm1001_vm0, %v1830_v11, 0.0 }
 0xac5   : > { %1835 = vadd.xlane.f32.xlu0 %v1834_v18 }
 0xb30   : > { %v1833_v0 = vpop.xlane.xlu1 %1832 }
 0xb31   : > { %v1837_v21 = vmul.f32 %v1833_v0, %v5474_v53 }
 0xb33   : > { %v5531_v22 = vsub.f32 %v1829_v14, %v1837_v21  ;;  %v1878_v14 = vperm.slane %v5459_v19, 5  ;;  %v5573_v21 = vld [vmem:[%s5322_s23 + $0x2] sm:$0x3]  ;;  %s6165_s23 = smov 80  }
 0xb34   : > { %v1934_v19 = vperm.slane %v5573_v21, 1 }
 0xb35   : > { %v1841_v23 = vmul.f32 %v5531_v22, %v5531_v22 }
 0xb37   : > { %v1843_v39 = vsel %vm1001_vm0, %v1841_v23, 0.0 }
 0xb38   : > { %v1836_v20 = vpop.xlane.xlu0 %1835  ;;  %1844 = vadd.xlane.f32.xlu2 %v1843_v39 }
 0xb39   : > { %v1838_v25 = vmul.f32 %v1836_v20, %v5474_v53 }
 0xb3b   : > { %v5537_v26 = vsub.f32 %v1830_v11, %v1838_v25 }
 0xb3d   : > { %v1842_v27 = vmul.f32 %v5537_v26, %v5537_v26 }
 0xb3f   : > { %v1846_v28 = vsel %vm1001_vm0, %v1842_v27, 0.0 }
 0xb40   : > { %1847 = vadd.xlane.f32.xlu1 %v1846_v28 }
 0xbab   : > { %v1845_v47 = vpop.xlane.xlu2 %1844 }
 0xbac   : > { %v1849_v51 = vmul.f32 %v1845_v47, %v5474_v53 }
 0xbae   : > { %v1851_v56 = vadd.f32 1e-05, %v1849_v51 }
 0xbb0   : > { %4847 = vrsqrt.f32 %v1851_v56  ;;  %vm1859_vm12 = vweird.f32 %v1851_v56 }
 0xbb3   : > { %v1848_v60 = vpop.xlane.xlu1 %1847 }
 0xbb4   : > { %v1850_v61 = vmul.f32 %v1848_v60, %v5474_v53 }
 0xbb6   : > { %v4848_v62 = vpop.eup %4847  ;;  %v1852_v41 = vadd.f32 1e-05, %v1850_v61 }
 0xbb7   : > { %v1854_v46 = vmul.f32 %v4848_v62, %v1851_v56  ;;  %vm1860_vm11 = vweird.f32 %v4848_v62 }
 0xbb8   : > { %4849 = vrsqrt.f32 %v1852_v41  ;;  %vm1861_vm13 = vmor %vm1859_vm12, %vm1860_vm11  ;;  %vm1869_vm15 = vweird.f32 %v1852_v41 }
 0xbb9   : > { %v1855_v54 = vmul.f32 %v4848_v62, %v1854_v46 }
 0xbbb   : > { %v1856_v63 = vmul.f32 0.5, %v1855_v54 }
 0xbbd   : > { %v1857_v1 = vsub.f32 1.5, %v1856_v63 }
 0xbbe   : > { %v4850_v2 = vpop.eup %4849 }
 0xbbf   : > { %v1858_v3 = vmul.f32 %v4848_v62, %v1857_v1  ;;  %v1864_v4 = vmul.f32 %v4850_v2, %v1852_v41  ;;  %vm1870_vm14 = vweird.f32 %v4850_v2 }
 0xbc0   : > { %vm1871_vm4 = vmor %vm1869_vm15, %vm1870_vm14 }
 0xbc1   : > { %v1865_v5 = vmul.f32 %v4850_v2, %v1864_v4  ;;  %v1862_v6 = vsel %vm1861_vm13, %v4848_v62, %v1858_v3 }
 0xbc2   : > { %v1873_v10 = vmul.f32 %v1862_v6, %v5531_v22  ;;  %v1933_v22 = vperm.slane %v5573_v21, 0 }
 0xbc3   : > { %v1866_v7 = vmul.f32 0.5, %v1865_v5 }
 0xbc4   : > { %v1876_v15 = vmul.f32 %v1875_v9, %v1873_v10 }
 0xbc5   : > { %v1867_v8 = vsub.f32 1.5, %v1866_v7 }
 0xbc6   : > { %v5564_v11 = vadd.f32 %v1878_v14, %v1876_v15 }
 0xbc7   : > { %v1868_v12 = vmul.f32 %v4850_v2, %v1867_v8 }
 0xbc9   : > { %v1872_v13 = vsel %vm1871_vm4, %v4850_v2, %v1868_v12  ;;  %vm2862_vm4 = vcmask 516096  }
 0xbca   : > { %v1874_v16 = vmul.f32 %v1872_v13, %v5537_v26 }
 0xbcc   : > { %v1877_v17 = vmul.f32 %v1875_v9, %v1874_v16 }
 0xbce   : > { %v5566_v18 = vadd.f32 %v1878_v14, %v1877_v17  ;;  %v4685_v17 = vld [vmem:[%s5380_s22 + $0x28] sm:$0xff] }
 0xbcf   : > { %2140 = vmatpush.bf16.msrb.mxu1 %v4685_v17 }
 0xbd0   : > { %v1931_v0 = vpack.c.bf16 %v5566_v18, %v5564_v11 }
 0xbd2   : > { %4390 = vmatmul.msk.bf16.vlgmr.msra.gmra.mxu3 %vm1001_vm0, %v1931_v0  ;;  %4391 = vmatmul.msk.bf16.vlgmr.msra.gmra.mxu2 %vm1001_vm0, %v1931_v0 }
 0xc55   : > { %v1989_v23 = vpop.f32.mrf.mxu3  ;;  %v2003_v39 = vpop.f32.mrf.mxu2 }
 0xc56   : > { %v1990_v20 = vadd.f32 %v1989_v23, %v1933_v22  ;;  %v2004_v25 = vadd.f32 %v2003_v39, %v1934_v19  ;;  %v4686_v23 = vld [vmem:[%s5380_s22 + $0x30] sm:$0xff]  ;;  %v4684_v39 = vld [vmem:[%s5380_s22 + $0x20] sm:$0xff] }
 0xc57   : > { %2242 = vmatpush.bf16.msra.mxu1 %v4686_v23 }
 0xc58   : > { %v5579_v26 = vpack.c.bf16 %v1990_v20, %v1990_v20  ;;  %v5581_v27 = vpack.c.bf16 %v2004_v25, %v2004_v25 }
 0xc5a   : > { %2170 = vrot.lane.b32.xlu1 %v5579_v26, %s5051_s0  ;;  %2065 = vrot.lane.b32.xlu2 %v5579_v26, %s5049_s3  ;;  %v2049_v28 = vsel %vm1075_vm1, %v5581_v27, 0 }
 0xc5b   : > { %2067 = vrot.lane.b32.xlu0 %v5579_v26, %s5052_s7  ;;  %2058 = vmatpush.bf16.msrb.mxu3 %v2049_v28 }
 0xc5d   : > { %v5602_v50 = vpop.f32.mrf.mxu2  ;;  %v1991_v49 = vpop.f32.mrf.mxu3 }
 0xc5e   : > { %v1992_v52 = vadd.f32 %v1991_v49, %v1933_v22 }
 0xc5f   : > { %2162 = vmatpush.bf16.msra.mxu3 %v4684_v39 }
 0xc60   : > { %v5608_v55 = vpack.c.bf16 %v1992_v52, %v1992_v52 }
 0xc62   : > { %2011 = vrot.lane.b32.xlu2 %v5579_v26, %s6163_s21 }
 0xc63   : > { %2168 = vrot.lane.b32.xlu0 %v5579_v26, %s6164_s29 }
 0xcb4   : > { %v2066_v29 = vpop.permute.xlu2 %2065 }
 0xcbc   : > { %v2012_v30 = vpop.permute.xlu2 %2011 }
 0xcbd   : > { %v2017_v31 = vsel %vm1038_vm2, %v2012_v30, 0 }
 0xcbe   : > { %2026 = vmatpush.bf16.xpose.msrb.mxu0 %v2017_v31 }
 0xcc5   : > { %4392 = vmatmul.msk.bf16.vlgmr.msrb.gmra.mxu0 %vm1038_vm2, %v5579_v26 }
 0xccc   : > { %v2171_v32 = vpop.permute.xlu1 %2170 }
 0xccd   : > { %v2176_v33 = vsel %vm1038_vm2, %v2171_v32, 0  ;;  %v2068_v34 = vpop.permute.xlu0 %2067 }
 0xcce   : > { %v2073_v38 = vsel %vm1038_vm2, %v2068_v34, 0 }
 0xccf   : > { %2082 = vmatpush.bf16.xpose.msrb.mxu2 %v2073_v38 }
 0xcd5   : > { %v2169_v35 = vpop.permute.xlu0 %2168 }
 0xcd6   : > { %4394 = vmatmul.msk.bf16.vlgmr.msrb.gmra.mxu2 %vm1038_vm2, %v2066_v29 }
 0xcd7   : > { %2185 = vmatpush.bf16.xpose.msra.mxu2 %v2176_v33 }
 0xce6   : > { %4406 = vmatmul.msk.bf16.vlgmr.msra.gmra.mxu2 %vm1038_vm2, %v2169_v35 }
 0xd42   : > { %v2028_v36 = vpop.f32.mrf.mxu0 }
 0xd43   : > { %v2032_v1 = vmul.f32 0.25, %v2028_v36 }
 0xd45   : > { %v2033_v2 = vsel %vm1059_vm3, %v2032_v1, -inf }
 0xd4a   : > { %v2030_v37 = vpop.f32.mrf.mxu0 }
 0xd59   : > { %v2084_v40 = vpop.f32.mrf.mxu2 }
 0xd5a   : > { %v2088_v42 = vmul.f32 0.25, %v2084_v40 }
 0xd5c   : > { %v2089_v24 = vsel %vm1059_vm3, %v2088_v42, -inf }
 0xd5d   : > { %2090 = vmax.xlane.f32.xlu0 %v2089_v24 }
 0xd61   : > { %v2086_v43 = vpop.f32.mrf.mxu2 }
 0xd69   : > { %v2187_v44 = vpop.f32.mrf.mxu2 }
 0xd6a   : > { %v2191_v45 = vmul.f32 0.25, %v2187_v44  ;;  %v2006_v44 = vadd.f32 %v5602_v50, %v1934_v19 }
 0xd6c   : > { %v2192_v47 = vsel %vm1059_vm3, %v2191_v45, -inf }
 0xd6d   : > { %2193 = vmax.xlane.f32.xlu1 %v2192_v47 }
 0xd71   : > { %2102 = vrot.lane.b32.xlu0 %v5581_v27, %s5049_s3  ;;  %v2189_v51 = vpop.f32.mrf.mxu2 }
 0xd79   : > { %2333 = vrot.lane.b32.xlu0 %v5608_v55, %s6163_s21 }
 0xd81   : > { %2249 = vrot.lane.b32.xlu0 %v5579_v26, %s6165_s23 }
 0xd86   : > { %2204 = vrot.lane.b32.xlu1 %v5581_v27, %s6164_s29 }
 0xdd0   : > { %v2091_v48 = vpop.xlane.xlu0 %2090 }
 0xdd1   : > { %v2092_v56 = vsub.f32 %v2088_v42, %v2091_v48 }
 0xdd3   : > { %v2093_v57 = vmul.f32 1.442695, %v2092_v56 }
 0xdd5   : > { %4851 = vpow2.f32 %v2093_v57 }
 0xddb   : > { %v4852_v58 = vpop.eup %4851 }
 0xddc   : > { %v2095_v59 = vsel %vm1059_vm3, %v4852_v58, 0.0 }
 0xddd   : > { %2096 = vadd.xlane.f32.xlu2 %v2095_v59 }
 0xde0   : > { %v2194_v60 = vpop.xlane.xlu1 %2193 }
 0xde1   : > { %v2195_v61 = vsub.f32 %v2191_v45, %v2194_v60  ;;  %v5643_v45 = vpack.c.bf16 %v2006_v44, %v2006_v44 }
 0xde3   : > { %v2196_v62 = vmul.f32 1.442695, %v2195_v61  ;;  %v2103_v41 = vpop.permute.xlu0 %2102  ;;  %v2371_v48 = vsel %vm1075_vm1, %v5643_v45, 0 }
 0xde4   : > { %v2108_v46 = vsel %vm1075_vm1, %v2103_v41, 0 }
 0xde5   : > { %4853 = vpow2.f32 %v2196_v62  ;;  %2117 = vmatpush.bf16.msra.mxu0 %v2108_v46 }
 0xdeb   : > { %v4854_v54 = vpop.eup %4853  ;;  %v2334_v20 = vpop.permute.xlu0 %2333 }
 0xdec   : > { %v2198_v63 = vsel %vm1059_vm3, %v4854_v54, 0.0  ;;  %v2339_v29 = vsel %vm1038_vm2, %v2334_v20, 0 }
 0xded   : > { %2199 = vadd.xlane.f32.xlu2 %v2198_v63 }
 0xdf3   : > { %v2250_v21 = vpop.permute.xlu0 %2249 }
 0xdf5   : > { %2034 = vmax.xlane.f32.xlu2 %v2033_v2 }
 0xdf8   : > { %v2205_v3 = vpop.permute.xlu1 %2204 }
 0xdf9   : > { %v2210_v4 = vsel %vm1075_vm1, %v2205_v3, 0 }
 0xdfa   : > { %2219 = vmatpush.bf16.msrb.mxu0 %v2210_v4 }
 0xe50   : > { %v2097_v5 = vpop.xlane.xlu2 %2096 }
 0xe51   : > { %4855 = vrcp.f32 %v2097_v5 }
 0xe57   : > { %v4856_v6 = vpop.eup %4855 }
 0xe58   : > { %v2099_v7 = vmul.f32 %v4856_v6, %v4852_v58 }
 0xe5a   : > { %v2100_v8 = vpack.c.bf16 %v2099_v7, %v2099_v7 }
 0xe5c   : > { %4395 = vmatmul.msk.bf16.vlgmr.msra.gmra.mxu0 %vm1059_vm3, %v2100_v8 }
 0xe60   : > { %v2200_v9 = vpop.xlane.xlu2 %2199 }
 0xe61   : > { %4857 = vrcp.f32 %v2200_v9 }
 0xe67   : > { %v4858_v10 = vpop.eup %4857 }
 0xe68   : > { %v2202_v12 = vmul.f32 %v4858_v10, %v4854_v54  ;;  %v2035_v13 = vpop.xlane.xlu2 %2034 }
 0xe69   : > { %v2036_v14 = vsub.f32 %v2032_v1, %v2035_v13 }
 0xe6a   : > { %v2203_v15 = vpack.c.bf16 %v2202_v12, %v2202_v12 }
 0xe6b   : > { %v2037_v16 = vmul.f32 1.442695, %v2036_v14 }
 0xe6c   : > { %4407 = vmatmul.msk.bf16.vlgmr.msrb.gmra.mxu0 %vm1059_vm3, %v2203_v15 }
 0xe6d   : > { %4859 = vpow2.f32 %v2037_v16 }
 0xe73   : > { %v4860_v0 = vpop.eup %4859 }
 0xe74   : > { %v2039_v22 = vsel %vm1059_vm3, %v4860_v0, 0.0 }
 0xe75   : > { %2040 = vadd.xlane.f32.xlu2 %v2039_v22 }
 0xe8d   : > { %2251 = vrot.lane.b32.xlu2 %v5579_v26, %s6166_s27 }
 0xed9   : > { %v2119_v25 = vpop.f32.mrf.mxu0 }
 0xeda   : > { %v2123_v28 = vpack.c.bf16 %v2119_v25, %v2119_v25 }
 0xedc   : > { %4400 = vmatmul.msk.bf16.vlgmr.msrb.gmra.mxu1 %vm1038_vm2, %v2123_v28 }
 0xedd   : > { %2348 = vmatpush.bf16.xpose.msrb.mxu1 %v2339_v29 }
 0xee1   : > { %v2121_v30 = vpop.f32.mrf.mxu0 }
 0xee8   : > { %v2041_v31 = vpop.xlane.xlu2 %2040 }
 0xee9   : > { %4861 = vrcp.f32 %v2041_v31  ;;  %v2221_v32 = vpop.f32.mrf.mxu0 }
 0xeea   : > { %v2225_v33 = vpack.c.bf16 %v2221_v32, %v2221_v32  ;;  %v5680_v32 = vld [vmem:[%s5380_s22 + $0x38] sm:$0xff] }
 0xeeb   : > { %2323 = vmatpush.bf16.msra.mxu0 %v5680_v32 }
 0xeec   : > { %4412 = vmatmul.msk.bf16.vlgmr.msra.gmra.mxu1 %vm1038_vm2, %v2225_v33 }
 0xeed   : > { %2456 = vmatpush.bf16.msra.mxu1 %v4685_v17 }
 0xeef   : > { %v4862_v26 = vpop.eup %4861 }
 0xef0   : > { %v2043_v34 = vmul.f32 %v4862_v26, %v4860_v0  ;;  %v2252_v38 = vpop.permute.xlu2 %2251 }
 0xef1   : > { %v2223_v35 = vpop.f32.mrf.mxu0  ;;  %v2257_v37 = vsel %vm1038_vm2, %v2252_v38, 0 }
 0xef2   : > { %v2044_v36 = vpack.c.bf16 %v2043_v34, %v2043_v34 }
 0xef4   : > { %4393 = vmatmul.msk.bf16.vlgmr.msrb.gmra.mxu3 %vm1059_vm3, %v2044_v36 }
 0xef5   : > { %2266 = vmatpush.bf16.xpose.msrb.mxu3 %v2257_v37 }
 0xefc   : > { %4420 = vmatmul.msk.bf16.vlgmr.msrb.gmra.mxu1 %vm1038_vm2, %v5608_v55 }
 0xefd   : > { %2546 = vmatpush.bf16.msrb.mxu1 %v4686_v23 }
 0xf59   : > { %v5636_v40 = vpop.f32.mrf.mxu1 }
 0xf61   : > { %v2144_v42 = vpop.f32.mrf.mxu1 }
 0xf69   : > { %v5638_v24 = vpop.f32.mrf.mxu1 }
 0xf71   : > { %v2246_v43 = vpop.f32.mrf.mxu1 }
 0xf77   : > { %v2060_v47 = vpop.f32.mrf.mxu3 }
 0xf78   : > { %v2064_v49 = vpack.c.bf16 %v2060_v47, %v2060_v47 }
 0xf79   : > { %v2350_v51 = vpop.f32.mrf.mxu1 }
 0xf7a   : > { %v2354_v52 = vmul.f32 0.25, %v2350_v51  ;;  %4405 = vmatmul.msk.bf16.vlgmr.msra.gmra.mxu3 %vm1038_vm2, %v2064_v49 }
 0xf7b   : > { %2380 = vmatpush.bf16.msra.mxu3 %v2371_v48 }
 0xf7c   : > { %v2355_v56 = vsel %vm1059_vm3, %v2354_v52, -inf }
 0xf7d   : > { %2356 = vmax.xlane.f32.xlu1 %v2355_v56 }
 0xf7f   : > { %v2062_v57 = vpop.f32.mrf.mxu3 }
 0xf81   : > { %v2352_v58 = vpop.f32.mrf.mxu1 }
 0xf8a   : > { %4413 = vmatmul.msk.bf16.vlgmr.msrb.gmra.mxu3 %vm1038_vm2, %v2250_v21 }
 0xf8b   : > { %2472 = vmatpush.bf16.msrb.mxu3 %v4684_v39 }
 0xff0   : > { %v2357_v19 = vpop.xlane.xlu1 %2356 }
 0xff1   : > { %v2358_v50 = vsub.f32 %v2354_v52, %v2357_v19 }
 0xff3   : > { %v2359_v59 = vmul.f32 1.442695, %v2358_v50  ;;  %v5694_v50 = vld [vmem:[%s5456_s4 + $0x8] sm:$0x3f] }
 0xff5   : > { %4863 = vpow2.f32 %v2359_v59 }
 0xffb   : > { %v4864_v60 = vpop.eup %4863 }
 0xffc   : > { %v2361_v61 = vsel %vm1059_vm3, %v4864_v60, 0.0 }
 0xffd   : > { %v5651_v62 = vpop.f32.mrf.mxu3  ;;  %2362 = vadd.xlane.f32.xlu0 %v2361_v61  ;;  %v2628_v61 = vperm.slane %v5694_v50, 0 }
 0xffe   : > { %v2165_v19 = vadd.f32 %v5651_v62, %v5636_v40 }
0x1005   : > { %v2166_v41 = vpop.f32.mrf.mxu3 }
0x100d   : > { %v2268_v46 = vpop.f32.mrf.mxu3 }
0x100e   : > { %v2272_v54 = vmul.f32 0.25, %v2268_v46 }
0x1010   : > { %v2273_v63 = vsel %vm1059_vm3, %v2272_v54, -inf }
0x1011   : > { %2285 = vrot.lane.b32.xlu0 %v5581_v27, %s6165_s23  ;;  %2274 = vmax.xlane.f32.xlu2 %v2273_v63 }
0x1015   : > { %v2270_v1 = vpop.f32.mrf.mxu3 }
0x1019   : > { %2555 = vrot.lane.b32.xlu0 %v5608_v55, %s6166_s27 }
0x1021   : > { %2553 = vrot.lane.b32.xlu0 %v5608_v55, %s6165_s23 }
0x1029   : > { %2387 = vrot.lane.b32.xlu2 %v5608_v55, %s5049_s3 }
0x1070   : > { %v2363_v2 = vpop.xlane.xlu0 %2362 }
0x1071   : > { %4865 = vrcp.f32 %v2363_v2 }
0x1077   : > { %v4866_v3 = vpop.eup %4865 }
0x1078   : > { %v2365_v4 = vmul.f32 %v4866_v3, %v4864_v60  ;;  %v2248_v60 = vadd.f32 %v5638_v24, %v2165_v19 }
0x107a   : > { %v2366_v5 = vpack.c.bf16 %v2365_v4, %v2365_v4 }
0x107c   : > { %4421 = vmatmul.msk.bf16.vlgmr.msra.gmra.mxu3 %vm1059_vm3, %v2366_v5 }
0x1083   : > { %v2286_v6 = vpop.permute.xlu0 %2285 }
0x1084   : > { %v2291_v27 = vsel %vm1075_vm1, %v2286_v6, 0  ;;  %v2275_v7 = vpop.xlane.xlu2 %2274 }
0x1085   : > { %v2276_v8 = vsub.f32 %v2272_v54, %v2275_v7  ;;  %2300 = vmatpush.bf16.msrb.mxu2 %v2291_v27 }
0x1087   : > { %v2277_v9 = vmul.f32 1.442695, %v2276_v8 }
0x1089   : > { %4867 = vpow2.f32 %v2277_v9 }
0x108b   : > { %v2556_v10 = vpop.permute.xlu0 %2555 }
0x108c   : > { %v2561_v12 = vsel %vm1038_vm2, %v2556_v10, 0 }
0x108d   : > { %2570 = vmatpush.bf16.xpose.msra.mxu3 %v2561_v12 }
0x108f   : > { %v4868_v13 = vpop.eup %4867 }
0x1090   : > { %v2279_v14 = vsel %vm1059_vm3, %v4868_v13, 0.0 }
0x1091   : > { %2280 = vadd.xlane.f32.xlu1 %v2279_v14 }
0x1093   : > { %v2554_v20 = vpop.permute.xlu0 %2553 }
0x10aa   : > { %2389 = vrot.lane.b32.xlu1 %v5608_v55, %s5052_s7  ;;  %s5060_s7 = smov (!%p4484_p7), 96  }
0x10b2   : > { %2480 = vrot.lane.b32.xlu1 %v5608_v55, %s5051_s0  ;;  %s5059_s0 = smov (!%p4484_p7), 32  }
0x10ba   : > { %2478 = vrot.lane.b32.xlu1 %v5608_v55, %s6164_s29  ;;  %v2388_v55 = vpop.permute.xlu2 %2387 }
0x10ff   : > { %v2382_v15 = vpop.f32.mrf.mxu3 }
0x1100   : > { %v2386_v16 = vpack.c.bf16 %v2382_v15, %v2382_v15 }
0x1102   : > { %4425 = vmatmul.msk.bf16.vlgmr.msrb.gmra.mxu3 %vm1038_vm2, %v2386_v16 }
0x1104   : > { %v2281_v17 = vpop.xlane.xlu1 %2280 }
0x1105   : > { %4869 = vrcp.f32 %v2281_v17 }
0x1107   : > { %v2384_v0 = vpop.f32.mrf.mxu3 }
0x110b   : > { %v4870_v22 = vpop.eup %4869 }
0x110c   : > { %v2283_v23 = vmul.f32 %v4870_v22, %v4868_v13 }
0x110e   : > { %v2284_v39 = vpack.c.bf16 %v2283_v23, %v2283_v23 }
0x1110   : > { %4414 = vmatmul.msk.bf16.vlgmr.msrb.gmra.mxu2 %vm1059_vm3, %v2284_v39 }
0x1112   : > { %4429 = vmatmul.msk.bf16.vlgmr.msra.gmra.mxu3 %vm1038_vm2, %v2554_v20 }
0x111c   : > { %v2390_v25 = vpop.permute.xlu1 %2389 }
0x111d   : > { %v2395_v28 = vsel %vm1038_vm2, %v2390_v25, 0 }
0x111e   : > { %2404 = vmatpush.bf16.xpose.msra.mxu2 %v2395_v28 }
0x1124   : > { %v2481_v29 = vpop.permute.xlu1 %2480 }
0x1125   : > { %v2486_v30 = vsel %vm1038_vm2, %v2481_v29, 0  ;;  %4422 = vmatmul.msk.bf16.vlgmr.msra.gmra.mxu2 %vm1038_vm2, %v2388_v55 }
0x1126   : > { %2495 = vmatpush.bf16.xpose.msrb.mxu2 %v2486_v30 }
0x112c   : > { %v2479_v31 = vpop.permute.xlu1 %2478 }
0x1135   : > { %4426 = vmatmul.msk.bf16.vlgmr.msrb.gmra.mxu2 %vm1038_vm2, %v2479_v31 }
0x1185   : > { %v5683_v33 = vpop.f32.mrf.mxu3 }
0x118d   : > { %v2476_v26 = vpop.f32.mrf.mxu3 }
0x1193   : > { %v2302_v34 = vpop.f32.mrf.mxu2 }
0x1194   : > { %v2306_v38 = vpack.c.bf16 %v2302_v34, %v2302_v34 }
0x1195   : > { %v2572_v35 = vpop.f32.mrf.mxu3 }
0x1196   : > { %v2576_v36 = vmul.f32 0.25, %v2572_v35  ;;  %4419 = vmatmul.msk.bf16.vlgmr.msra.gmra.mxu0 %vm1038_vm2, %v2306_v38 }
0x1198   : > { %v2577_v37 = vsel %vm1059_vm3, %v2576_v36, -inf }
0x1199   : > { %2578 = vmax.xlane.f32.xlu2 %v2577_v37 }
0x119b   : > { %v2304_v42 = vpop.f32.mrf.mxu2 }
0x119d   : > { %v2574_v43 = vpop.f32.mrf.mxu3 }
0x11a8   : > { %v2406_v44 = vpop.f32.mrf.mxu2 }
0x11a9   : > { %v2410_v47 = vmul.f32 0.25, %v2406_v44 }
0x11ab   : > { %v2411_v49 = vsel %vm1059_vm3, %v2410_v47, -inf }
0x11ac   : > { %2412 = vmax.xlane.f32.xlu0 %v2411_v49 }
0x11b0   : > { %v2408_v51 = vpop.f32.mrf.mxu2 }
0x11b1   : > { %2424 = vrot.lane.b32.xlu2 %v5643_v45, %s5049_s3  ;;  %s5057_s3 = smov (!%p4484_p7), 112  }
0x11b8   : > { %v2497_v52 = vpop.f32.mrf.mxu2 }
0x11b9   : > { %v2501_v48 = vmul.f32 0.25, %v2497_v52 }
0x11bb   : > { %v2502_v56 = vsel %vm1059_vm3, %v2501_v48, -inf }
0x11bc   : > { %2503 = vmax.xlane.f32.xlu1 %v2502_v56 }
0x11c0   : > { %v2499_v57 = vpop.f32.mrf.mxu2 }
0x120c   : > { %v2579_v58 = vpop.xlane.xlu2 %2578 }
0x120d   : > { %v2580_v21 = vsub.f32 %v2576_v36, %v2579_v58 }
0x120f   : > { %v2581_v59 = vmul.f32 1.442695, %v2580_v21 }
0x1211   : > { %4871 = vpow2.f32 %v2581_v59 }
0x1213   : > { %v2325_v41 = vpop.f32.mrf.mxu0 }
0x1214   : > { %v2329_v46 = vadd.f32 %v2325_v41, %v2248_v60  ;;  %v2425_v54 = vpop.permute.xlu2 %2424 }
0x1215   : > { %v2430_v63 = vsel %vm1075_vm1, %v2425_v54, 0 }
0x1216   : > { %v2629_v1 = vadd.f32 %v2628_v61, %v2329_v46  ;;  %2439 = vmatpush.bf16.msrb.mxu0 %v2430_v63 }
0x1217   : > { %v4872_v2 = vpop.eup %4871 }
0x1218   : > { %v2583_v40 = vsel %vm1059_vm3, %v4872_v2, 0.0  ;;  %v2631_v62 = vadd.f32 %v2629_v1, %v5564_v11 }
0x1219   : > { %2584 = vadd.xlane.f32.xlu1 %v2583_v40 }
0x121a   : > { %v2633_v3 = vsel %vm1001_vm0, %v2631_v62, 0.0 }
0x121b   : > { %v2327_v24 = vpop.f32.mrf.mxu0  ;;  %2634 = vadd.xlane.f32.xlu2 %v2633_v3  ;;  %v4691_v3 = vld [vmem:[%s5260_s19 + $0x38] sm:$0xff] }
0x121c   : > { %v4690_v24 = vld [vmem:[%s5260_s19 + $0x30] sm:$0xff] }
0x121f   : > { %v2413_v4 = vpop.xlane.xlu0 %2412 }
0x1220   : > { %v2414_v5 = vsub.f32 %v2410_v47, %v2413_v4  ;;  %v4689_v4 = vld [vmem:[%s5260_s19 + $0x28] sm:$0xff] }
0x1222   : > { %v2415_v6 = vmul.f32 1.442695, %v2414_v5 }
0x1224   : > { %4873 = vpow2.f32 %v2415_v6  ;;  %v4688_v6 = vld [vmem:[%s5260_s19 + $0x20] sm:$0xff]  ;;  %s4700_s19 = scalar_lea.vmem [#allocation2], %s5043_s1 }
0x122a   : > { %v4874_v27 = vpop.eup %4873 }
0x122b   : > { %v2417_v7 = vsel %vm1059_vm3, %v4874_v27, 0.0 }
0x122c   : > { %2418 = vadd.xlane.f32.xlu0 %v2417_v7  ;;  %v4699_v7 = vld [vmem:[%s5511_s30 + $0x78] sm:$0xff] }
0x122d   : > { %2780 = vmatpush.bf16.msrb.mxu3 %v4699_v7 }
0x122f   : > { %v2504_v8 = vpop.xlane.xlu1 %2503 }
0x1230   : > { %v2505_v9 = vsub.f32 %v2501_v48, %v2504_v8 }
0x1232   : > { %v2506_v10 = vmul.f32 1.442695, %v2505_v9  ;;  %2589 = vrot.lane.b32.xlu1 %v5643_v45, %s6165_s23 }
0x1234   : > { %4875 = vpow2.f32 %v2506_v10 }
0x123a   : > { %v4876_v11 = vpop.eup %4875 }
0x123b   : > { %v2508_v12 = vsel %vm1059_vm3, %v4876_v11, 0.0 }
0x123c   : > { %2509 = vadd.xlane.f32.xlu0 %v2508_v12 }
0x1250   : > { %2514 = vrot.lane.b32.xlu0 %v5643_v45, %s6164_s29 }
0x128c   : > { %v2585_v0 = vpop.xlane.xlu1 %2584 }
0x128d   : > { %4877 = vrcp.f32 %v2585_v0 }
0x128e   : > { %v2635_v13 = vpop.xlane.xlu2 %2634 }
0x128f   : > { %v2639_v14 = vmul.f32 %v2635_v13, %v5474_v53 }
0x1291   : > { %v5711_v15 = vsub.f32 %v2631_v62, %v2639_v14  ;;  %v4697_v14 = vld [vmem:[%s5511_s30 + $0x68] sm:$0xff] }
0x1293   : > { %v2643_v16 = vmul.f32 %v5711_v15, %v5711_v15  ;;  %v4878_v23 = vpop.eup %4877 }
0x1294   : > { %v2587_v39 = vmul.f32 %v4878_v23, %v4872_v2 }
0x1295   : > { %v2645_v17 = vsel %vm1001_vm0, %v2643_v16, 0.0 }
0x1296   : > { %2646 = vadd.xlane.f32.xlu1 %v2645_v17  ;;  %v2588_v28 = vpack.c.bf16 %v2587_v39, %v2587_v39  ;;  %v4696_v17 = vld [vmem:[%s5511_s30 + $0x60] sm:$0xff] }
0x129f   : > { %v2419_v22 = vpop.xlane.xlu0 %2418 }
0x12a0   : > { %4879 = vrcp.f32 %v2419_v22 }
0x12a4   : > { %v2590_v20 = vpop.permute.xlu1 %2589 }
0x12a5   : > { %v2595_v45 = vsel %vm1075_vm1, %v2590_v20, 0 }
0x12a6   : > { %v4880_v25 = vpop.eup %4879  ;;  %2604 = vmatpush.bf16.msra.mxu2 %v2595_v45 }
0x12a7   : > { %v2421_v55 = vmul.f32 %v4880_v25, %v4874_v27 }
0x12a9   : > { %v2422_v29 = vpack.c.bf16 %v2421_v55, %v2421_v55  ;;  %4430 = vmatmul.msk.bf16.vlgmr.msra.gmra.mxu2 %vm1059_vm3, %v2588_v28  ;;  %v2677_v28 = vperm.slane %v5694_v50, 1 }
0x12ab   : > { %4423 = vmatmul.msk.bf16.vlgmr.msrb.gmra.mxu0 %vm1059_vm3, %v2422_v29 }
0x12af   : > { %v2510_v30 = vpop.xlane.xlu0 %2509 }
0x12b0   : > { %4881 = vrcp.f32 %v2510_v30 }
0x12b6   : > { %v4882_v31 = vpop.eup %4881 }
0x12b7   : > { %v2512_v26 = vmul.f32 %v4882_v31, %v4876_v11  ;;  %v4698_v11 = vld [vmem:[%s5511_s30 + $0x70] sm:$0xff]  ;;  %v2680_v31 = vperm.slane %v5694_v50, 2 }
0x12b8   : > { %2781 = vmatpush.bf16.msrb.mxu3 %v4698_v11 }
0x12b9   : > { %v2513_v35 = vpack.c.bf16 %v2512_v26, %v2512_v26 }
0x12bc   : > { %2782 = vmatpush.bf16.msrb.mxu3 %v4697_v14 }
0x12c0   : > { %2783 = vmatpush.bf16.msrb.mxu3 %v4696_v17 }
0x12c2   : > { %v2515_v34 = vpop.permute.xlu0 %2514 }
0x12c3   : > { %v2520_v38 = vsel %vm1075_vm1, %v2515_v34, 0 }
0x12c4   : > { %2529 = vmatpush.bf16.msra.mxu0 %v2520_v38 }
0x12c7   : > { %4427 = vmatmul.msk.bf16.vlgmr.msra.gmra.mxu0 %vm1059_vm3, %v2513_v35 }
0x12c8   : > { %2621 = vmatpush.bf16.msrb.mxu0 %v5680_v32 }
0x1309   : > { %v2647_v62 = vpop.xlane.xlu1 %2646 }
0x1328   : > { %v2441_v36 = vpop.f32.mrf.mxu0 }
0x1329   : > { %v2445_v37 = vpack.c.bf16 %v2441_v36, %v2441_v36 }
0x132b   : > { %4424 = vmatmul.msk.bf16.vlgmr.msra.gmra.mxu1 %vm1038_vm2, %v2445_v37 }
0x132c   : > { %v2606_v42 = vpop.f32.mrf.mxu2  ;;  %2718 = vmatpush.bf16.msra.mxu1 %v4691_v3 }
0x132d   : > { %v2610_v43 = vpack.c.bf16 %v2606_v42, %v2606_v42  ;;  %v4695_v42 = vld [vmem:[%s5511_s30 + $0x58] sm:$0xff] }
0x132e   : > { %2784 = vmatpush.bf16.msrb.mxu3 %v4695_v42 }
0x132f   : > { %4431 = vmatmul.msk.bf16.vlgmr.msrb.gmra.mxu0 %vm1038_vm2, %v2610_v43  ;;  %v4693_v43 = vld [vmem:[%s5511_s30 + $0x48] sm:$0xff] }
0x1330   : > { %v2443_v44 = vpop.f32.mrf.mxu0  ;;  %2719 = vmatpush.bf16.msra.mxu1 %v4690_v24 }
0x1331   : > { %v4692_v44 = vld [vmem:[%s5511_s30 + $0x40] sm:$0xff] }
0x1334   : > { %v2608_v47 = vpop.f32.mrf.mxu2  ;;  %2720 = vmatpush.bf16.msra.mxu1 %v4689_v4 }
0x1338   : > { %2721 = vmatpush.bf16.msra.mxu1 %v4688_v6 }
0x1344   : > { %v2531_v49 = vpop.f32.mrf.mxu0 }
0x1345   : > { %v2535_v51 = vpack.c.bf16 %v2531_v49, %v2531_v49  ;;  %v4808_v49 = vld [vmem:[%s5499_s5 + $0x1] ss:$0 sm:$0xff] }
0x1347   : > { %4428 = vmatmul.msk.bf16.vlgmr.msrb.gmra.mxu1 %vm1038_vm2, %v2535_v51 }
0x134c   : > { %v2533_v52 = vpop.f32.mrf.mxu0 }
0x13a8   : > { %v2458_v48 = vpop.f32.mrf.mxu1 }
0x13a9   : > { %v2475_v58 = vadd.f32 %v5683_v33, %v2458_v48 }
0x13ac   : > { %v2623_v56 = vpop.f32.mrf.mxu0 }
0x13b0   : > { %v2460_v32 = vpop.f32.mrf.mxu1 }
0x13b4   : > { %v2625_v57 = vpop.f32.mrf.mxu0 }
0x13c4   : > { %v2548_v21 = vpop.f32.mrf.mxu1 }
0x13c5   : > { %v2552_v19 = vadd.f32 %v2548_v21, %v2475_v58  ;;  %v2731_v58 = vperm.slane %v5694_v50, 3 }
0x13c7   : > { %v2627_v59 = vadd.f32 %v2623_v56, %v2552_v19 }
0x13c9   : > { %v2630_v60 = vadd.f32 %v2628_v61, %v2627_v59  ;;  %v2651_v61 = vmul.f32 %v2647_v62, %v5474_v53 }
0x13cb   : > { %v2632_v41 = vadd.f32 %v2630_v60, %v5566_v18  ;;  %v2653_v18 = vadd.f32 1e-05, %v2651_v61 }
0x13cc   : > { %v2550_v46 = vpop.f32.mrf.mxu1 }
0x13cd   : > { %v2636_v54 = vsel %vm1001_vm0, %v2632_v41, 0.0  ;;  %4883 = vrsqrt.f32 %v2653_v18  ;;  %vm2661_vm3 = vweird.f32 %v2653_v18 }
0x13ce   : > { %2637 = vadd.xlane.f32.xlu0 %v2636_v54 }
0x13d3   : > { %v4884_v5 = vpop.eup %4883 }
0x13d4   : > { %v2656_v27 = vmul.f32 %v4884_v5, %v2653_v18  ;;  %vm2662_vm1 = vweird.f32 %v4884_v5 }
0x13d5   : > { %vm2663_vm5 = vmor %vm2661_vm3, %vm2662_vm1 }
0x13d6   : > { %v2657_v8 = vmul.f32 %v4884_v5, %v2656_v27 }
0x13d8   : > { %v2658_v13 = vmul.f32 0.5, %v2657_v8 }
0x13da   : > { %v2659_v16 = vsub.f32 1.5, %v2658_v13 }
0x13dc   : > { %v2660_v22 = vmul.f32 %v4884_v5, %v2659_v16 }
0x13de   : > { %v2664_v20 = vsel %vm2663_vm5, %v4884_v5, %v2660_v22 }
0x13df   : > { %v2675_v55 = vmul.f32 %v2664_v20, %v5711_v15  ;;  %v4694_v15 = vld [vmem:[%s5511_s30 + $0x50] sm:$0xff]  ;;  %s5064_s30 = smov (!%p4484_p7), 80  }
0x13e0   : > { %2785 = vmatpush.bf16.msrb.mxu3 %v4694_v15 }
0x13e1   : > { %v2678_v26 = vmul.f32 %v2677_v28, %v2675_v55 }
0x13e3   : > { %v2681_v35 = vadd.f32 %v2680_v31, %v2678_v26 }
0x13e4   : > { %2786 = vmatpush.bf16.msrb.mxu3 %v4693_v43 }
0x13e8   : > { %2787 = vmatpush.bf16.msrb.mxu3 %v4692_v44 }
0x1441   : > { %v2638_v63 = vpop.xlane.xlu0 %2637 }
0x1442   : > { %v2640_v1 = vmul.f32 %v2638_v63, %v5474_v53 }
0x1444   : > { %v2642_v33 = vsub.f32 %v2632_v41, %v2640_v1 }
0x1446   : > { %v2644_v2 = vmul.f32 %v2642_v33, %v2642_v33 }
0x1448   : > { %v2648_v40 = vsel %vm1001_vm0, %v2644_v2, 0.0 }
0x1449   : > { %2649 = vadd.xlane.f32.xlu2 %v2648_v40 }
0x14bc   : > { %v2650_v9 = vpop.xlane.xlu2 %2649 }
0x14bd   : > { %v2652_v10 = vmul.f32 %v2650_v9, %v5474_v53 }
0x14bf   : > { %v2654_v12 = vadd.f32 1e-05, %v2652_v10 }
0x14c1   : > { %4885 = vrsqrt.f32 %v2654_v12  ;;  %vm2671_vm7 = vweird.f32 %v2654_v12 }
0x14c7   : > { %v4886_v0 = vpop.eup %4885 }
0x14c8   : > { %v2666_v23 = vmul.f32 %v4886_v0, %v2654_v12  ;;  %vm2672_vm6 = vweird.f32 %v4886_v0  ;;  %v5056_v12 = vmov 8.0  }
0x14c9   : > { %vm2673_vm8 = vmor %vm2671_vm7, %vm2672_vm6 }
0x14ca   : > { %v2667_v39 = vmul.f32 %v4886_v0, %v2666_v23 }
0x14cc   : > { %v2668_v45 = vmul.f32 0.5, %v2667_v39  ;;  %v2840_v39 = vperm.slane %v5694_v50, 4 }
0x14ce   : > { %v2669_v25 = vsub.f32 1.5, %v2668_v45 }
0x14d0   : > { %v2670_v29 = vmul.f32 %v4886_v0, %v2669_v25  ;;  %v2843_v25 = vperm.slane %v5694_v50, 5 }
0x14d2   : > { %v2674_v30 = vsel %vm2673_vm8, %v4886_v0, %v2670_v29 }
0x14d3   : > { %v2676_v34 = vmul.f32 %v2674_v30, %v2642_v33 }
0x14d5   : > { %v2679_v38 = vmul.f32 %v2677_v28, %v2676_v34 }
0x14d7   : > { %v2682_v36 = vadd.f32 %v2680_v31, %v2679_v38 }
0x14d9   : > { %v2683_v37 = vpack.c.bf16 %v2682_v36, %v2681_v35 }
0x14db   : > { %4448 = vmatmul.msk.bf16.vlgmr.msra.gmra.mxu1 %vm1001_vm0, %v2683_v37 }
0x1558   : > { %v2723_v47 = vpop.f32.mrf.mxu1 }
0x1559   : > { %v2724_v51 = vadd.f32 %v4808_v49, %v2723_v47 }
0x155b   : > { %v2728_v56 = vmax.f32 %v2724_v51, 0.0 }
0x1560   : > { %v2725_v52 = vpop.f32.mrf.mxu1 }
0x1561   : > { %v2726_v48 = vadd.f32 %v4808_v49, %v2725_v52 }
0x1563   : > { %v2729_v32 = vmax.f32 %v2726_v48, 0.0 }
0x1565   : > { %v2730_v57 = vpack.c.bf16 %v2729_v32, %v2728_v56 }
0x1567   : > { %2788 = vmatmul.bf16.vlgmr.msrb.gmra.mxu3 %v2730_v57 }
0x15ea   : > { %v2789_v21 = vpop.f32.mrf.mxu3 }
0x15eb   : > { %v2790_v19 = vadd.f32 %v2789_v21, %v2731_v58 }
0x15ed   : > { %v2794_v59 = vadd.f32 %v2790_v19, %v2681_v35 }
0x15ef   : > { %v2796_v60 = vsel %vm1001_vm0, %v2794_v59, 0.0 }
0x15f0   : > { %2797 = vadd.xlane.f32.xlu2 %v2796_v60 }
0x15f2   : > { %v2791_v41 = vpop.f32.mrf.mxu3 }
0x15f3   : > { %v2792_v46 = vadd.f32 %v2791_v41, %v2731_v58 }
0x15f5   : > { %v2795_v54 = vadd.f32 %v2792_v46, %v2682_v36 }
0x15f7   : > { %v2799_v63 = vsel %vm1001_vm0, %v2795_v54, 0.0 }
0x15f8   : > { %2800 = vadd.xlane.f32.xlu0 %v2799_v63 }
0x1663   : > { %v2798_v1 = vpop.xlane.xlu2 %2797 }
0x1664   : > { %v2802_v33 = vmul.f32 %v2798_v1, %v5474_v53 }
0x1666   : > { %v2804_v2 = vsub.f32 %v2794_v59, %v2802_v33 }
0x1668   : > { %v2806_v40 = vmul.f32 %v2804_v2, %v2804_v2 }
0x166a   : > { %v2808_v62 = vsel %vm1001_vm0, %v2806_v40, 0.0 }
0x166b   : > { %v2801_v61 = vpop.xlane.xlu0 %2800  ;;  %2809 = vadd.xlane.f32.xlu1 %v2808_v62 }
0x166c   : > { %v2803_v18 = vmul.f32 %v2801_v61, %v5474_v53 }
0x166e   : > { %v2805_v3 = vsub.f32 %v2795_v54, %v2803_v18 }
0x1670   : > { %v2807_v24 = vmul.f32 %v2805_v3, %v2805_v3 }
0x1672   : > { %v2811_v4 = vsel %vm1001_vm0, %v2807_v24, 0.0 }
0x1673   : > { %2812 = vadd.xlane.f32.xlu2 %v2811_v4 }
0x16de   : > { %v2810_v5 = vpop.xlane.xlu1 %2809 }
0x16df   : > { %v2814_v6 = vmul.f32 %v2810_v5, %v5474_v53 }
0x16e1   : > { %v2816_v27 = vadd.f32 1e-05, %v2814_v6 }
0x16e3   : > { %4887 = vrsqrt.f32 %v2816_v27  ;;  %vm2824_vm10 = vweird.f32 %v2816_v27 }
0x16e6   : > { %v2813_v7 = vpop.xlane.xlu2 %2812 }
0x16e7   : > { %v2815_v8 = vmul.f32 %v2813_v7, %v5474_v53 }
0x16e9   : > { %v4888_v9 = vpop.eup %4887  ;;  %v2817_v10 = vadd.f32 1e-05, %v2815_v8 }
0x16ea   : > { %v2819_v11 = vmul.f32 %v4888_v9, %v2816_v27  ;;  %vm2825_vm9 = vweird.f32 %v4888_v9 }
0x16eb   : > { %4889 = vrsqrt.f32 %v2817_v10  ;;  %vm2826_vm11 = vmor %vm2824_vm10, %vm2825_vm9  ;;  %vm2834_vm13 = vweird.f32 %v2817_v10 }
0x16ec   : > { %4891 = vrcp.f32 %v5056_v12  ;;  %v2820_v13 = vmul.f32 %v4888_v9, %v2819_v11 }
0x16ee   : > { %v2821_v14 = vmul.f32 0.5, %v2820_v13 }
0x16f0   : > { %v2822_v16 = vsub.f32 1.5, %v2821_v14 }
0x16f1   : > { %v4890_v17 = vpop.eup %4889 }
0x16f2   : > { %v4892_v0 = vpop.eup %4891  ;;  %v2823_v22 = vmul.f32 %v4888_v9, %v2822_v16  ;;  %v2829_v23 = vmul.f32 %v4890_v17, %v2817_v10  ;;  %vm2835_vm12 = vweird.f32 %v4890_v17 }
0x16f3   : > { %v2854_v28 = vmul.f32 8.0, %v4892_v0  ;;  %vm2836_vm14 = vmor %vm2834_vm13, %vm2835_vm12  ;;  %vm2858_vm15 = vweird.f32 %v4892_v0 }
0x16f4   : > { %v2827_v20 = vsel %vm2826_vm11, %v4888_v9, %v2823_v22  ;;  %v2830_v45 = vmul.f32 %v4890_v17, %v2829_v23 }
0x16f5   : > { %v2838_v55 = vmul.f32 %v2827_v20, %v2804_v2  ;;  %v2855_v26 = vsub.f32 1.0, %v2854_v28 }
0x16f6   : > { %v2831_v29 = vmul.f32 0.5, %v2830_v45 }
0x16f7   : > { %v2841_v30 = vmul.f32 %v2840_v39, %v2838_v55  ;;  %v2856_v42 = vmul.f32 %v4892_v0, %v2855_v26 }
0x16f8   : > { %v2832_v31 = vsub.f32 1.5, %v2831_v29 }
0x16f9   : > { %v2844_v34 = vadd.f32 %v2843_v25, %v2841_v30  ;;  %v2857_v47 = vadd.f32 %v4892_v0, %v2856_v42 }
0x16fa   : > { %v2833_v38 = vmul.f32 %v4890_v17, %v2832_v31 }
0x16fb   : > { %v2846_v35 = vsel %vm1001_vm0, %v2844_v34, 0.0  ;;  %v2859_v32 = vsel %vm2858_vm15, %v4892_v0, %v2857_v47 }
0x16fc   : > { %v2847_v36 = vrot.slane %v2846_v35, 4  ;;  %v2837_v37 = vsel %vm2836_vm14, %v4890_v17, %v2833_v38 }
0x16fd   : > { %v2839_v15 = vmul.f32 %v2837_v37, %v2805_v3 }
0x16fe   : > { %v2848_v43 = vadd.f32 %v2847_v36, %v2846_v35 }
0x16ff   : > { %v2842_v50 = vmul.f32 %v2840_v39, %v2839_v15 }
0x1700   : > { %v2849_v44 = vrot.slane %v2848_v43, 2 }
0x1701   : > { %v2845_v49 = vadd.f32 %v2843_v25, %v2842_v50 }
0x1702   : > { %v2850_v51 = vadd.f32 %v2849_v44, %v2848_v43 }
0x1703   : > { %v2864_v52 = vsel %vm1001_vm0, %v2845_v49, 0.0 }
0x1704   : > { %v2851_v48 = vrot.slane %v2850_v51, 1  ;;  %v2865_v56 = vrot.slane %v2864_v52, 4 }
0x1706   : > { %v2852_v57 = vadd.f32 %v2851_v48, %v2850_v51  ;;  %v2866_v58 = vadd.f32 %v2865_v56, %v2864_v52 }
0x1708   : > { %v2860_v21 = vmul.f32 %v2859_v32, %v2852_v57  ;;  %v2867_v19 = vrot.slane %v2866_v58, 2 }
0x170a   : > { %4702 = vst.msk [vmem:[%s4700_s19 - $0x1] sm:$0x1] %vm2862_vm4, %v2860_v21  ;;  %v2868_v59 = vadd.f32 %v2867_v19, %v2866_v58 }
0x170c   : > { %v2869_v60 = vrot.slane %v2868_v59, 1 }
0x170e   : > { %v2870_v41 = vadd.f32 %v2869_v60, %v2868_v59  ;;  %2878 = sbr.rel (%p4484_p7) target bundleno = 9735 (0x2607), region = 120 }
0x1710   : > { %v2871_v46 = vmul.f32 %v2870_v41, %v2859_v32 }
0x1712   : > { %4706 = vst.msk [vmem:[%s4700_s19 + $0x2] sm:$0x1] %vm2862_vm4, %v2871_v46 }
0x1713   : > { %v4511_v54 = vld [vmem:[%s6103_s10 + $0x30] sm:$0xf]  ;;  %v4714_v63 = vld [vmem:[%s6103_s10 + $0x34] sm:$0xf0]  ;;  %v4503_v1 = vld [vmem:[%s6103_s10 + $0x20] sm:$0xf] }
0x1714   : > { %v4512_v33 = vor.u32 %v4714_v63, %v4511_v54  ;;  %v4712_v2 = vld [vmem:[%s6103_s10 + $0x24] sm:$0xf0]  ;;  %v4495_v62 = vld [vmem:[%s6103_s10 + $0x10] sm:$0xf]  ;;  %v4710_v61 = vld [vmem:[%s6103_s10 + $0x14] sm:$0xf0] }
0x1715   : > { %v4504_v40 = vor.u32 %v4712_v2, %v4503_v1  ;;  %v4496_v18 = vor.u32 %v4710_v61, %v4495_v62  ;;  %v4487_v3 = vld [vmem:[%s6103_s10] sm:$0xf]  ;;  %v4708_v24 = vld [vmem:[%s6103_s10 + $0x4] sm:$0xf0]  ;;  %v4713_v14 = vld [vmem:[%s6103_s10 + $0x34] sm:$0xf] }
0x1716   : > { %2976 = vmatpush.bf16.msra.mxu0 %v4512_v33  ;;  %v4488_v4 = vor.u32 %v4708_v24, %v4487_v3  ;;  %v2888_v27 = vld [vmem:[%s6104_s11] sm:$0x3]  ;;  %v4513_v16 = vld [vmem:[%s6103_s10 + $0x38] sm:$0xf0]  ;;  %v4711_v17 = vld [vmem:[%s6103_s10 + $0x24] sm:$0xf] }
0x1717   : > { %v2925_v7 = vperm.slane %v2888_v27, 0  ;;  %v4516_v0 = vor.u32 %v4713_v14, %v4513_v16  ;;  %v4505_v22 = vld [vmem:[%s6103_s10 + $0x28] sm:$0xf0]  ;;  %v4709_v39 = vld [vmem:[%s6103_s10 + $0x14] sm:$0xf]  ;;  %vm3023_vm1 = vcmask 18432  }
0x1718   : > { %v4508_v23 = vor.u32 %v4711_v17, %v4505_v22  ;;  %v4497_v20 = vld [vmem:[%s6103_s10 + $0x18] sm:$0xf0]  ;;  %v4707_v25 = vld [vmem:[%s6103_s10 + $0x4] sm:$0xf]  ;;  %v4489_v28 = vld [vmem:[%s6103_s10 + $0x8] sm:$0xf0] }
0x1719   : > { %v5790_v5 = vld [vmem:[#allocation2] sm:$0x3f]  ;;  %2989 = vmatpush.bf16.msra.mxu1 %v4516_v0  ;;  %v4500_v45 = vor.u32 %v4709_v39, %v4497_v20  ;;  %v4492_v55 = vor.u32 %v4707_v25, %v4489_v28  ;;  %v2926_v43 = vperm.slane %v2888_v27, 1  ;;  %vm3040_vm3 = vcmask 1040384   ;;  %v4716_v25 = vld [vmem:[%s6105_s12 + $0x8] sm:$0xff] }
0x171a   : > { %2977 = vmatpush.bf16.msra.mxu0 %v4504_v40  ;;  %v2923_v6 = vpack.c.bf16 %v5790_v5, %v5790_v5  ;;  %vm3041_vm5 = vcmask 1041408   ;;  %v5062_v47 = vmov 65535   ;;  %vm3036_vm6 = vcmask 23552   ;;  %v5855_v46 = vld [vmem:[%s6105_s12] sm:$0xff] }
0x171b   : > { %v3042_v49 = vsel %vm3040_vm3, 4294967295, %v5062_v47  ;;  %vm3637_vm7 = vcmask 1042432   ;;  %vm3871_vm14 = vcmask 2048   ;;  %vm3905_vm15 = vcmask 5123  }
0x171c   : > { %v5843_v51 = vsel %vm3041_vm5, %v3042_v49, 0  ;;  %vm3897_vm4 = vcmask 518144  }
0x171d   : > { %2990 = vmatpush.bf16.msra.mxu1 %v4508_v23 }
0x171e   : > { %2978 = vmatpush.bf16.msra.mxu0 %v4496_v18 }
0x1721   : > { %2991 = vmatpush.bf16.msra.mxu1 %v4500_v45 }
0x1722   : > { %2979 = vmatpush.bf16.msra.mxu0 %v4488_v4 }
0x1725   : > { %4517 = vmatmul.msk.bf16.vlgmr.msra.gmra.mxu0 %vm1001_vm0, %v2923_v6  ;;  %2992 = vmatpush.bf16.msra.mxu1 %v4492_v55 }
0x1726   : > { %3136 = vmatpush.bf16.msrb.mxu0 %v4716_v25 }
0x1728   : > { %4518 = vmatmul.msk.bf16.vlgmr.msra.gmra.mxu1 %vm1001_vm0, %v2923_v6 }
0x1729   : > { %3158 = vmatpush.bf16.msrb.mxu1 %v5855_v46 }
0x17a2   : > { %v2981_v8 = vpop.f32.mrf.mxu0 }
0x17a3   : > { %v2982_v9 = vadd.f32 %v2981_v8, %v2925_v7 }
0x17a5   : > { %v5798_v10 = vpack.c.bf16 %v2982_v9, %v2982_v9  ;;  %v2994_v36 = vpop.f32.mrf.mxu1 }
0x17a6   : > { %v2995_v50 = vadd.f32 %v2994_v36, %v2926_v43 }
0x17a7   : > { %3061 = vrot.lane.b32.xlu2 %v5798_v10, %s5057_s3  ;;  %3001 = vrot.lane.b32.xlu0 %v5798_v10, %s5058_s26  ;;  %v3326_v4 = vshrl.u32 %v5798_v10, 16  ;;  %v3329_v6 = vshll.u32 %v5798_v10, 16 }
0x17a8   : > { %v5840_v44 = vpack.c.bf16 %v2995_v50, %v2995_v50 }
0x17a9   : > { %v3328_v27 = vrot.slane %v3326_v4, 1  ;;  %v3331_v7 = vrot.slane %v3329_v6, 2 }
0x17aa   : > { %v2983_v11 = vpop.f32.mrf.mxu0  ;;  %v3045_v52 = vand.u32 %v5843_v51, %v5840_v44 }
0x17ab   : > { %v5863_v8 = vor.u32 %v3331_v7, %v3328_v27 }
0x17ac   : > { %3054 = vmatpush.bf16.msra.mxu3 %v3045_v52 }
0x17ad   : > { %v2996_v15 = vpop.f32.mrf.mxu1 }
0x17af   : > { %3166 = vrot.lane.b32.xlu2 %v5798_v10, %s5059_s0 }
0x17b7   : > { %3164 = vrot.lane.b32.xlu2 %v5798_v10, %s5060_s7 }
0x1801   : > { %v3062_v58 = vpop.permute.xlu2 %3061 }
0x1809   : > { %v3167_v21 = vpop.permute.xlu2 %3166 }
0x180a   : > { %v3172_v60 = vsel %vm1038_vm2, %v3167_v21, 0 }
0x1811   : > { %v3165_v41 = vpop.permute.xlu2 %3164 }
0x1819   : > { %v3002_v12 = vpop.permute.xlu0 %3001 }
0x181a   : > { %v3007_v13 = vsel %vm1038_vm2, %v3002_v12, 0 }
0x181b   : > { %3016 = vmatpush.bf16.xpose.msra.mxu2 %v3007_v13 }
0x1822   : > { %4519 = vmatmul.msk.bf16.vlgmr.msra.gmra.mxu2 %vm1038_vm2, %v5798_v10 }
0x18a5   : > { %v3018_v29 = vpop.f32.mrf.mxu2 }
0x18a6   : > { %v3022_v30 = vmul.f32 0.25, %v3018_v29  ;;  %v3367_v29 = vshrl.u32 %v5840_v44, 16 }
0x18a8   : > { %v3024_v31 = vsel %vm3023_vm1, %v3022_v30, -inf }
0x18a9   : > { %3025 = vmax.xlane.f32.xlu0 %v3024_v31 }
0x18ad   : > { %v3020_v26 = vpop.f32.mrf.mxu2 }
0x191c   : > { %v3026_v34 = vpop.xlane.xlu0 %3025 }
0x191d   : > { %v3027_v38 = vsub.f32 %v3022_v30, %v3026_v34  ;;  %v3370_v30 = vshll.u32 %v5840_v44, 16  ;;  %v3369_v34 = vrot.slane %v3367_v29, 1 }
0x191f   : > { %v3028_v35 = vmul.f32 1.442695, %v3027_v38  ;;  %v3372_v38 = vrot.slane %v3370_v30, 2 }
0x1921   : > { %4901 = vpow2.f32 %v3028_v35 }
0x1927   : > { %v4902_v37 = vpop.eup %4901 }
0x1928   : > { %v3030_v42 = vsel %vm3023_vm1, %v4902_v37, 0.0 }
0x1929   : > { %3031 = vadd.xlane.f32.xlu1 %v3030_v42 }
0x1942   : > { %3063 = vrot.lane.b32.xlu1 %v5798_v10, %s5061_s28 }
0x199c   : > { %v3032_v48 = vpop.xlane.xlu1 %3031 }
0x199d   : > { %4903 = vrcp.f32 %v3032_v48 }
0x19a3   : > { %v4904_v56 = vpop.eup %4903 }
0x19a4   : > { %v3034_v32 = vmul.f32 %v4904_v56, %v4902_v37  ;;  %v5885_v37 = vor.u32 %v3372_v38, %v3369_v34  ;;  %v4717_v56 = vld [vmem:[%s6105_s12 + $0x10] sm:$0xff] }
0x19a5   : > { %3238 = vmatpush.bf16.msra.mxu0 %v4717_v56 }
0x19a6   : > { %v3035_v57 = vpack.c.bf16 %v3034_v32, %v3034_v32  ;;  %v3378_v50 = vand.u32 %v5885_v37, %v5843_v51 }
0x19a8   : > { %4520 = vmatmul.msk.bf16.vlgmr.msra.gmra.mxu3 %vm3036_vm6, %v3035_v57 }
0x19b4   : > { %v3064_v19 = vpop.permute.xlu1 %3063 }
0x19b5   : > { %v3069_v59 = vsel %vm1038_vm2, %v3064_v19, 0 }
0x19b6   : > { %3078 = vmatpush.bf16.xpose.msrb.mxu3 %v3069_v59 }
0x19bd   : > { %4521 = vmatmul.msk.bf16.vlgmr.msrb.gmra.mxu3 %vm1038_vm2, %v3062_v58 }
0x19be   : > { %3181 = vmatpush.bf16.xpose.msra.mxu3 %v3172_v60 }
0x19cd   : > { %4533 = vmatmul.msk.bf16.vlgmr.msra.gmra.mxu3 %vm1038_vm2, %v3165_v41 }
0x1a2b   : > { %v3056_v54 = vpop.f32.mrf.mxu3 }
0x1a2c   : > { %v3060_v63 = vpack.c.bf16 %v3056_v54, %v3056_v54 }
0x1a2e   : > { %4532 = vmatmul.msk.bf16.vlgmr.msrb.gmra.mxu1 %vm1038_vm2, %v3060_v63 }
0x1a33   : > { %v3058_v1 = vpop.f32.mrf.mxu3 }
0x1a40   : > { %v3080_v33 = vpop.f32.mrf.mxu3 }
0x1a41   : > { %v3084_v2 = vmul.f32 0.25, %v3080_v33 }
0x1a43   : > { %v3085_v40 = vsel %vm3023_vm1, %v3084_v2, -inf }
0x1a44   : > { %3086 = vmax.xlane.f32.xlu2 %v3085_v40 }
0x1a48   : > { %v3082_v62 = vpop.f32.mrf.mxu3 }
0x1a50   : > { %v3183_v61 = vpop.f32.mrf.mxu3 }
0x1a51   : > { %v3187_v18 = vmul.f32 0.25, %v3183_v61 }
0x1a53   : > { %v3188_v3 = vsel %vm3023_vm1, %v3187_v18, -inf }
0x1a54   : > { %3189 = vmax.xlane.f32.xlu1 %v3188_v3 }
0x1a58   : > { %v3185_v24 = vpop.f32.mrf.mxu3 }
0x1a6d   : > { %3333 = vrot.lane.b32.xlu1 %v5863_v8, %s5058_s26  ;;  %s5063_s26 = smov 16  }
0x1aab   : > { %v5867_v9 = vpop.f32.mrf.mxu1 }
0x1ab3   : > { %v3162_v11 = vpop.f32.mrf.mxu1 }
0x1ab7   : > { %v3087_v12 = vpop.xlane.xlu2 %3086 }
0x1ab8   : > { %v3088_v13 = vsub.f32 %v3084_v2, %v3087_v12 }
0x1aba   : > { %v3089_v14 = vmul.f32 1.442695, %v3088_v13 }
0x1abc   : > { %4905 = vpow2.f32 %v3089_v14 }
0x1ac2   : > { %v4906_v16 = vpop.eup %4905 }
0x1ac3   : > { %v3091_v17 = vsel %vm3023_vm1, %v4906_v16, 0.0 }
0x1ac4   : > { %3092 = vadd.xlane.f32.xlu0 %v3091_v17 }
0x1ac7   : > { %v3190_v0 = vpop.xlane.xlu1 %3189 }
0x1ac8   : > { %v3191_v22 = vsub.f32 %v3187_v18, %v3190_v0 }
0x1aca   : > { %v3192_v23 = vmul.f32 1.442695, %v3191_v22 }
0x1acc   : > { %4907 = vpow2.f32 %v3192_v23 }
0x1ad2   : > { %v4908_v39 = vpop.eup %4907 }
0x1ad3   : > { %v3194_v20 = vsel %vm3023_vm1, %v4908_v39, 0.0 }
0x1ad4   : > { %3195 = vadd.xlane.f32.xlu2 %v3194_v20 }
0x1ad8   : > { %3098 = vrot.lane.b32.xlu0 %v5840_v44, %s5057_s3 }
0x1adf   : > { %v3334_v32 = vpop.permute.xlu1 %3333 }
0x1ae0   : > { %3247 = vrot.lane.b32.xlu0 %v5798_v10, %s5063_s26  ;;  %v3339_v21 = vsel %vm1038_vm2, %v3334_v32, 0 }
0x1ae8   : > { %3245 = vrot.lane.b32.xlu0 %v5798_v10, %s5064_s30 }
0x1aec   : > { %3200 = vrot.lane.b32.xlu2 %v5840_v44, %s5060_s7 }
0x1b37   : > { %v3093_v45 = vpop.xlane.xlu0 %3092 }
0x1b38   : > { %4909 = vrcp.f32 %v3093_v45 }
0x1b3e   : > { %v4910_v28 = vpop.eup %4909 }
0x1b3f   : > { %v3095_v31 = vmul.f32 %v4910_v28, %v4906_v16 }
0x1b41   : > { %v3096_v35 = vpack.c.bf16 %v3095_v31, %v3095_v31 }
0x1b47   : > { %v3196_v55 = vpop.xlane.xlu2 %3195 }
0x1b48   : > { %4911 = vrcp.f32 %v3196_v55 }
0x1b4a   : > { %v3099_v26 = vpop.permute.xlu0 %3098 }
0x1b4b   : > { %v3104_v10 = vand.u32 %v3099_v26, %v5843_v51 }
0x1b4d   : > { %3113 = vmatpush.bf16.msrb.mxu2 %v3104_v10 }
0x1b4e   : > { %v4912_v47 = vpop.eup %4911 }
0x1b4f   : > { %v3201_v36 = vpop.permute.xlu2 %3200  ;;  %v3198_v49 = vmul.f32 %v4912_v47, %v4908_v39 }
0x1b50   : > { %v3206_v42 = vand.u32 %v3201_v36, %v5843_v51  ;;  %4522 = vmatmul.msk.bf16.vlgmr.msrb.gmra.mxu2 %vm3036_vm6, %v3096_v35  ;;  %v5935_v36 = vld [vmem:[%s6105_s12 + $0x18] sm:$0xff] }
0x1b51   : > { %v3199_v48 = vpack.c.bf16 %v3198_v49, %v3198_v49 }
0x1b52   : > { %v3248_v15 = vpop.permute.xlu0 %3247  ;;  %3215 = vmatpush.bf16.msra.mxu2 %v3206_v42 }
0x1b53   : > { %v3253_v43 = vsel %vm1038_vm2, %v3248_v15, 0 }
0x1b54   : > { %3262 = vmatpush.bf16.xpose.msra.mxu1 %v3253_v43 }
0x1b56   : > { %3319 = vmatpush.bf16.msrb.mxu2 %v5935_v36 }
0x1b5a   : > { %v3246_v52 = vpop.permute.xlu0 %3245 }
0x1b5b   : > { %4540 = vmatmul.msk.bf16.vlgmr.msra.gmra.mxu1 %vm1038_vm2, %v3246_v52 }
0x1b5c   : > { %3387 = vmatpush.bf16.msrb.mxu1 %v3378_v50 }
0x1b60   : > { %3478 = vmatpush.bf16.msra.mxu1 %v5855_v46  ;;  %4534 = vmatmul.msk.bf16.vlgmr.msra.gmra.mxu2 %vm3036_vm6, %v3199_v48 }
0x1bd3   : > { %v3115_v57 = vpop.f32.mrf.mxu2 }
0x1bd4   : > { %v3119_v58 = vpack.c.bf16 %v3115_v57, %v3115_v57 }
0x1bd6   : > { %4527 = vmatmul.msk.bf16.vlgmr.msrb.gmra.mxu0 %vm1038_vm2, %v3119_v58 }
0x1bd7   : > { %3348 = vmatpush.bf16.xpose.msrb.mxu0 %v3339_v21 }
0x1bd8   : > { %v3264_v19 = vpop.f32.mrf.mxu1 }
0x1bd9   : > { %v3268_v59 = vmul.f32 0.25, %v3264_v19 }
0x1bdb   : > { %v3117_v60 = vpop.f32.mrf.mxu2  ;;  %v3269_v41 = vsel %vm3023_vm1, %v3268_v59, -inf }
0x1bdc   : > { %3270 = vmax.xlane.f32.xlu1 %v3269_v41 }
0x1be0   : > { %v3266_v46 = vpop.f32.mrf.mxu1 }
0x1be3   : > { %v3217_v54 = vpop.f32.mrf.mxu2 }
0x1be4   : > { %v3221_v63 = vpack.c.bf16 %v3217_v54, %v3217_v54 }
0x1be6   : > { %4539 = vmatmul.msk.bf16.vlgmr.msra.gmra.mxu0 %vm1038_vm2, %v3221_v63 }
0x1be7   : > { %3462 = vmatpush.bf16.msra.mxu0 %v4716_v25 }
0x1beb   : > { %v3219_v1 = vpop.f32.mrf.mxu2 }
0x1bf5   : > { %3396 = vrot.lane.b32.xlu1 %v5863_v8, %s5061_s28  ;;  %s6167_s28 = sld [smem:[#allocation21_spill]] }
0x1bf6   : > { %4547 = vmatmul.msk.bf16.vlgmr.msrb.gmra.mxu0 %vm1038_vm2, %v5863_v8 }
0x1bf7   : > { %3552 = vmatpush.bf16.msrb.mxu0 %v4717_v56 }
0x1bfd   : > { %3484 = vrot.lane.b32.xlu1 %v5863_v8, %s5060_s7 }
0x1c4f   : > { %v3271_v18 = vpop.xlane.xlu1 %3270 }
0x1c50   : > { %v3272_v24 = vsub.f32 %v3268_v59, %v3271_v18 }
0x1c52   : > { %v3273_v4 = vmul.f32 1.442695, %v3272_v24 }
0x1c53   : > { %v3138_v33 = vpop.f32.mrf.mxu0 }
0x1c54   : > { %v3161_v40 = vadd.f32 %v5867_v9, %v3138_v33  ;;  %4913 = vpow2.f32 %v3273_v4 }
0x1c5a   : > { %v4914_v11 = vpop.eup %4913 }
0x1c5b   : > { %v3140_v2 = vpop.f32.mrf.mxu0  ;;  %v3275_v13 = vsel %vm3023_vm1, %v4914_v11, 0.0 }
0x1c63   : > { %v3240_v62 = vpop.f32.mrf.mxu0 }
0x1c64   : > { %v5909_v61 = vadd.f32 %v3240_v62, %v3161_v40 }
0x1c67   : > { %v3397_v25 = vpop.permute.xlu1 %3396 }
0x1c68   : > { %v3402_v26 = vsel %vm1038_vm2, %v3397_v25, 0 }
0x1c6b   : > { %v3242_v3 = vpop.f32.mrf.mxu0 }
0x1c6f   : > { %v3485_v35 = vpop.permute.xlu1 %3484 }
0x1c73   : > { %v3350_v6 = vpop.f32.mrf.mxu0 }
0x1c74   : > { %v3354_v27 = vmul.f32 0.25, %v3350_v6 }
0x1c76   : > { %v3355_v7 = vsel %vm3023_vm1, %v3354_v27, -inf }
0x1c77   : > { %3356 = vmax.xlane.f32.xlu0 %v3355_v7 }
0x1c7b   : > { %v3352_v12 = vpop.f32.mrf.mxu0 }
0x1c7f   : > { %3276 = vadd.xlane.f32.xlu0 %v3275_v13 }
0x1c93   : > { %3394 = vrot.lane.b32.xlu0 %v5863_v8, %s5057_s3 }
0x1c9b   : > { %3561 = vrot.lane.b32.xlu0 %v5863_v8, %s5063_s26  ;;  %s6168_s26 = sld [smem:[#allocation22_spill]] }
0x1cea   : > { %v3357_v9 = vpop.xlane.xlu0 %3356 }
0x1ceb   : > { %v3358_v14 = vsub.f32 %v3354_v27, %v3357_v9 }
0x1ced   : > { %v3359_v16 = vmul.f32 1.442695, %v3358_v14 }
0x1cef   : > { %4915 = vpow2.f32 %v3359_v16 }
0x1cf2   : > { %v3277_v22 = vpop.xlane.xlu0 %3276 }
0x1cf3   : > { %4917 = vrcp.f32 %v3277_v22 }
0x1cf5   : > { %v4916_v17 = vpop.eup %4915 }
0x1cf6   : > { %v3361_v0 = vsel %vm3023_vm1, %v4916_v17, 0.0 }
0x1cf7   : > { %3362 = vadd.xlane.f32.xlu2 %v3361_v0 }
0x1cf9   : > { %v4918_v20 = vpop.eup %4917 }
0x1cfa   : > { %v3279_v28 = vmul.f32 %v4918_v20, %v4914_v11 }
0x1cfc   : > { %v3280_v10 = vpack.c.bf16 %v3279_v28, %v3279_v28 }
0x1d05   : > { %v3395_v23 = vpop.permute.xlu0 %3394 }
0x1d0d   : > { %v3562_v30 = vpop.permute.xlu0 %3561 }
0x1d0f   : > { %3281 = vrot.lane.b32.xlu2 %v5840_v44, %s5064_s30 }
0x1d17   : > { %3486 = vrot.lane.b32.xlu2 %v5863_v8, %s5059_s0 }
0x1d1f   : > { %3559 = vrot.lane.b32.xlu2 %v5863_v8, %s5064_s30  ;;  %v3567_v8 = vsel %vm1038_vm2, %v3562_v30, 0 }
0x1d6a   : > { %v3363_v39 = vpop.xlane.xlu2 %3362 }
0x1d6b   : > { %4919 = vrcp.f32 %v3363_v39 }
0x1d71   : > { %v4920_v45 = vpop.eup %4919 }
0x1d72   : > { %v3365_v55 = vmul.f32 %v4920_v45, %v4916_v17  ;;  %v3282_v29 = vpop.permute.xlu2 %3281 }
0x1d73   : > { %v3287_v44 = vand.u32 %v3282_v29, %v5843_v51 }
0x1d74   : > { %v3366_v31 = vpack.c.bf16 %v3365_v55, %v3365_v55 }
0x1d75   : > { %3296 = vmatpush.bf16.msrb.mxu3 %v3287_v44 }
0x1d76   : > { %4548 = vmatmul.msk.bf16.vlgmr.msrb.gmra.mxu1 %vm3036_vm6, %v3366_v31 }
0x1d77   : > { %3576 = vmatpush.bf16.xpose.msrb.mxu1 %v3567_v8 }
0x1d78   : > { %4541 = vmatmul.msk.bf16.vlgmr.msrb.gmra.mxu3 %vm3036_vm6, %v3280_v10 }
0x1d79   : > { %3411 = vmatpush.bf16.xpose.msra.mxu3 %v3402_v26 }
0x1d7a   : > { %v3487_v34 = vpop.permute.xlu2 %3486 }
0x1d7b   : > { %v3492_v38 = vsel %vm1038_vm2, %v3487_v34, 0 }
0x1d81   : > { %3501 = vmatpush.bf16.xpose.msrb.mxu3 %v3492_v38 }
0x1d82   : > { %v3560_v52 = vpop.permute.xlu2 %3559 }
0x1d88   : > { %4549 = vmatmul.msk.bf16.vlgmr.msra.gmra.mxu3 %vm1038_vm2, %v3395_v23 }
0x1d98   : > { %4553 = vmatmul.msk.bf16.vlgmr.msrb.gmra.mxu3 %vm1038_vm2, %v3485_v35 }
0x1df3   : > { %v3389_v42 = vpop.f32.mrf.mxu1 }
0x1df4   : > { %v3393_v15 = vpack.c.bf16 %v3389_v42, %v3389_v42 }
0x1df6   : > { %4552 = vmatmul.msk.bf16.vlgmr.msra.gmra.mxu1 %vm1038_vm2, %v3393_v15 }
0x1dfb   : > { %v3298_v43 = vpop.f32.mrf.mxu3  ;;  %v3391_v50 = vpop.f32.mrf.mxu1 }
0x1dfc   : > { %v3302_v47 = vpack.c.bf16 %v3298_v43, %v3298_v43 }
0x1dfe   : > { %4546 = vmatmul.msk.bf16.vlgmr.msrb.gmra.mxu2 %vm1038_vm2, %v3302_v47 }
0x1e03   : > { %v3300_v49 = vpop.f32.mrf.mxu3 }
0x1e06   : > { %4556 = vmatmul.msk.bf16.vlgmr.msrb.gmra.mxu1 %vm1038_vm2, %v3560_v52 }
0x1e0b   : > { %v3413_v48 = vpop.f32.mrf.mxu3 }
0x1e0c   : > { %v3417_v56 = vmul.f32 0.25, %v3413_v48 }
0x1e0e   : > { %v3418_v32 = vsel %vm3023_vm1, %v3417_v56, -inf }
0x1e0f   : > { %3419 = vmax.xlane.f32.xlu0 %v3418_v32 }
0x1e13   : > { %v3415_v57 = vpop.f32.mrf.mxu3 }
0x1e14   : > { %v5972_v57 = vld [vmem:[%s6106_s13] sm:$0x3f] }
0x1e1b   : > { %v3503_v58 = vpop.f32.mrf.mxu3 }
0x1e1c   : > { %v3507_v21 = vmul.f32 0.25, %v3503_v58 }
0x1e1e   : > { %v3508_v19 = vsel %vm3023_vm1, %v3507_v21, -inf }
0x1e1f   : > { %3509 = vmax.xlane.f32.xlu2 %v3508_v19  ;;  %v3639_v19 = vperm.slane %v5972_v57, 0 }
0x1e23   : > { %v3505_v59 = vpop.f32.mrf.mxu3 }
0x1e73   : > { %v5943_v60 = vpop.f32.mrf.mxu1 }
0x1e7b   : > { %v3482_v41 = vpop.f32.mrf.mxu1 }
0x1e81   : > { %v3321_v46 = vpop.f32.mrf.mxu2 }
0x1e82   : > { %v5946_v54 = vadd.f32 %v3321_v46, %v5909_v61  ;;  %v3420_v63 = vpop.xlane.xlu0 %3419 }
0x1e83   : > { %v3421_v1 = vsub.f32 %v3417_v56, %v3420_v63  ;;  %v3578_v33 = vpop.f32.mrf.mxu1 }
0x1e84   : > { %v3582_v2 = vmul.f32 0.25, %v3578_v33 }
0x1e85   : > { %v3422_v40 = vmul.f32 1.442695, %v3421_v1 }
0x1e86   : > { %v3583_v62 = vsel %vm3023_vm1, %v3582_v2, -inf }
0x1e87   : > { %4921 = vpow2.f32 %v3422_v40  ;;  %3584 = vmax.xlane.f32.xlu1 %v3583_v62 }
0x1e89   : > { %v3323_v18 = vpop.f32.mrf.mxu2 }
0x1e8b   : > { %v3580_v3 = vpop.f32.mrf.mxu1 }
0x1e8c   : > { %v4720_v3 = vld [vmem:[%s6107_s14 + $0x8] sm:$0xff] }
0x1e8d   : > { %v4922_v24 = vpop.eup %4921 }
0x1e8e   : > { %v3424_v4 = vsel %vm3023_vm1, %v4922_v24, 0.0 }
0x1e8f   : > { %3425 = vadd.xlane.f32.xlu0 %v3424_v4  ;;  %v4730_v4 = vld [vmem:[%s6109_s16 + $0x38] sm:$0xff] }
0x1e90   : > { %3764 = vmatpush.bf16.msra.mxu1 %v4730_v4 }
0x1e92   : > { %v3510_v6 = vpop.xlane.xlu2 %3509 }
0x1e93   : > { %v3511_v27 = vsub.f32 %v3507_v21, %v3510_v6 }
0x1e95   : > { %v3512_v7 = vmul.f32 1.442695, %v3511_v27 }
0x1e97   : > { %4923 = vpow2.f32 %v3512_v7  ;;  %v4729_v7 = vld [vmem:[%s6109_s16 + $0x30] sm:$0xff] }
0x1e98   : > { %3765 = vmatpush.bf16.msra.mxu1 %v4729_v7 }
0x1e9d   : > { %v4924_v61 = vpop.eup %4923 }
0x1e9e   : > { %v3514_v11 = vsel %vm3023_vm1, %v4924_v61, 0.0 }
0x1e9f   : > { %3515 = vadd.xlane.f32.xlu0 %v3514_v11  ;;  %v4728_v11 = vld [vmem:[%s6109_s16 + $0x28] sm:$0xff] }
0x1ea0   : > { %3430 = vrot.lane.b32.xlu1 %v5885_v37, %s5057_s3  ;;  %3766 = vmatpush.bf16.msra.mxu1 %v4728_v11  ;;  %v4899_v11 = vld [vmem:[#allocation3] ss:$0 sm:$0xff] }
0x1eb3   : > { %3520 = vrot.lane.b32.xlu0 %v5885_v37, %s5060_s7  ;;  %s6169_s7 = sld [smem:[#allocation23_spill]] }
0x1efa   : > { %v3585_v12 = vpop.xlane.xlu1 %3584 }
0x1efb   : > { %v3586_v13 = vsub.f32 %v3582_v2, %v3585_v12  ;;  %v4727_v12 = vld [vmem:[%s6109_s16 + $0x20] sm:$0xff] }
0x1efc   : > { %3767 = vmatpush.bf16.msra.mxu1 %v4727_v12 }
0x1efd   : > { %v3587_v9 = vmul.f32 1.442695, %v3586_v13 }
0x1eff   : > { %4925 = vpow2.f32 %v3587_v9 }
0x1f02   : > { %v3426_v16 = vpop.xlane.xlu0 %3425 }
0x1f03   : > { %4927 = vrcp.f32 %v3426_v16 }
0x1f05   : > { %v4926_v14 = vpop.eup %4925 }
0x1f06   : > { %v3589_v17 = vsel %vm3023_vm1, %v4926_v14, 0.0  ;;  %vm3998_vm1 = vcmask 9216  }
0x1f07   : > { %3590 = vadd.xlane.f32.xlu2 %v3589_v17 }
0x1f09   : > { %v4928_v0 = vpop.eup %4927 }
0x1f0a   : > { %v3428_v22 = vmul.f32 %v4928_v0, %v4922_v24  ;;  %v4719_v24 = vld [vmem:[%s6107_s14] sm:$0xff]  ;;  %v4725_v0 = vld [vmem:[%s6109_s16 + $0x10] sm:$0xff] }
0x1f0c   : > { %v3429_v20 = vpack.c.bf16 %v3428_v22, %v3428_v22 }
0x1f12   : > { %v3431_v23 = vpop.permute.xlu1 %3430  ;;  %v3516_v45 = vpop.xlane.xlu0 %3515 }
0x1f13   : > { %v3436_v39 = vand.u32 %v3431_v23, %v5843_v51  ;;  %4929 = vrcp.f32 %v3516_v45 }
0x1f15   : > { %3445 = vmatpush.bf16.msra.mxu2 %v3436_v39  ;;  %v3665_v39 = vperm.slane %v5972_v57, 1 }
0x1f18   : > { %4550 = vmatmul.msk.bf16.vlgmr.msra.gmra.mxu2 %vm3036_vm6, %v3429_v20 }
0x1f19   : > { %v4930_v25 = vpop.eup %4929 }
0x1f1a   : > { %v3518_v28 = vmul.f32 %v4930_v25, %v4924_v61  ;;  %v3667_v25 = vperm.slane %v5972_v57, 2 }
0x1f1c   : > { %v3519_v30 = vpack.c.bf16 %v3518_v28, %v3518_v28 }
0x1f1f   : > { %3595 = vrot.lane.b32.xlu2 %v5885_v37, %s5064_s30 }
0x1f25   : > { %v3521_v55 = vpop.permute.xlu0 %3520 }
0x1f26   : > { %v3526_v29 = vand.u32 %v3521_v55, %v5843_v51 }
0x1f28   : > { %3535 = vmatpush.bf16.msrb.mxu2 %v3526_v29 }
0x1f2b   : > { %4554 = vmatmul.msk.bf16.vlgmr.msrb.gmra.mxu2 %vm3036_vm6, %v3519_v30  ;;  %v4724_v30 = vld [vmem:[%s6109_s16 + $0x8] sm:$0xff] }
0x1f2c   : > { %3627 = vmatpush.bf16.msra.mxu2 %v5935_v36 }
0x1f7a   : > { %v3591_v44 = vpop.xlane.xlu2 %3590 }
0x1f7b   : > { %4931 = vrcp.f32 %v3591_v44  ;;  %v4723_v44 = vld [vmem:[%s6109_s16] sm:$0xff] }
0x1f81   : > { %v4932_v31 = vpop.eup %4931 }
0x1f82   : > { %v3593_v26 = vmul.f32 %v4932_v31, %v4926_v14  ;;  %v3596_v10 = vpop.permute.xlu2 %3595  ;;  %v4726_v14 = vld [vmem:[%s6109_s16 + $0x18] sm:$0xff]  ;;  %v4896_v31 = vld [vmem:[%s6108_s15] ss:$0 sm:$0xff] }
0x1f83   : > { %v3601_v8 = vand.u32 %v3596_v10, %v5843_v51  ;;  %3768 = vmatpush.bf16.msra.mxu1 %v4726_v14 }
0x1f84   : > { %v3594_v37 = vpack.c.bf16 %v3593_v26, %v3593_v26 }
0x1f85   : > { %3610 = vmatpush.bf16.msra.mxu3 %v3601_v8 }
0x1f87   : > { %3769 = vmatpush.bf16.msra.mxu1 %v4725_v0 }
0x1f88   : > { %4557 = vmatmul.msk.bf16.vlgmr.msra.gmra.mxu3 %vm3036_vm6, %v3594_v37 }
0x1f8b   : > { %3770 = vmatpush.bf16.msra.mxu1 %v4724_v30 }
0x1f8f   : > { %3771 = vmatpush.bf16.msra.mxu1 %v4723_v44 }
0x1f9b   : > { %v3447_v34 = vpop.f32.mrf.mxu2 }
0x1f9c   : > { %v3451_v38 = vpack.c.bf16 %v3447_v34, %v3447_v34 }
0x1f9e   : > { %4551 = vmatmul.msk.bf16.vlgmr.msra.gmra.mxu0 %vm1038_vm2, %v3451_v38  ;;  %v3715_v38 = vperm.slane %v5972_v57, 3 }
0x1fa3   : > { %v3449_v35 = vpop.f32.mrf.mxu2 }
0x1fae   : > { %v3537_v42 = vpop.f32.mrf.mxu2 }
0x1faf   : > { %v3541_v36 = vpack.c.bf16 %v3537_v42, %v3537_v42 }
0x1fb1   : > { %4555 = vmatmul.msk.bf16.vlgmr.msrb.gmra.mxu0 %vm1038_vm2, %v3541_v36 }
0x1fb6   : > { %v3539_v15 = vpop.f32.mrf.mxu2 }
0x200b   : > { %v3612_v43 = vpop.f32.mrf.mxu3 }
0x200c   : > { %v3616_v50 = vpack.c.bf16 %v3612_v43, %v3612_v43 }
0x200e   : > { %4558 = vmatmul.msk.bf16.vlgmr.msra.gmra.mxu2 %vm1038_vm2, %v3616_v50  ;;  %vm3642_vm2 = vcmask 521216  }
0x2013   : > { %v3614_v47 = vpop.f32.mrf.mxu3 }
0x201b   : > { %v3464_v51 = vpop.f32.mrf.mxu0 }
0x201c   : > { %v3481_v52 = vadd.f32 %v5943_v60, %v3464_v51 }
0x2023   : > { %v3466_v49 = vpop.f32.mrf.mxu0 }
0x202e   : > { %v3554_v48 = vpop.f32.mrf.mxu0 }
0x202f   : > { %v3558_v56 = vadd.f32 %v3554_v48, %v3481_v52  ;;  %v4734_v48 = vld [vmem:[%s6110_s17 + $0x18] sm:$0xff] }
0x2030   : > { %3848 = vmatpush.bf16.msrb.mxu3 %v4734_v48 }
0x2036   : > { %v3556_v32 = vpop.f32.mrf.mxu0 }
0x2037   : > { %v4732_v32 = vld [vmem:[%s6110_s17 + $0x8] sm:$0xff] }
0x2091   : > { %v3629_v58 = vpop.f32.mrf.mxu2 }
0x2092   : > { %v3633_v21 = vadd.f32 %v3629_v58, %v3558_v56  ;;  %v4733_v56 = vld [vmem:[%s6110_s17 + $0x10] sm:$0xff]  ;;  %v4731_v58 = vld [vmem:[%s6110_s17] sm:$0xff] }
0x2093   : > { %3849 = vmatpush.bf16.msrb.mxu3 %v4733_v56 }
0x2094   : > { %v3635_v59 = vrot.slane %v3633_v21, 5 }
0x2096   : > { %v3638_v41 = vsel %vm3637_vm7, %v5946_v54, %v3635_v59  ;;  %v4722_v54 = vld [vmem:[%s6107_s14 + $0x18] sm:$0xff] }
0x2097   : > { %v3640_v46 = vadd.f32 %v3639_v19, %v3638_v41  ;;  %3704 = vmatpush.bf16.msra.mxu0 %v4722_v54  ;;  %3850 = vmatpush.bf16.msrb.mxu3 %v4732_v32 }
0x2099   : > { %v3631_v63 = vpop.f32.mrf.mxu2  ;;  %v3641_v60 = vadd.f32 %v3640_v46, %v5790_v5  ;;  %v4721_v5 = vld [vmem:[%s6107_s14 + $0x10] sm:$0xff] }
0x209b   : > { %v3643_v1 = vsel %vm3642_vm2, %v3641_v60, 0.0  ;;  %3705 = vmatpush.bf16.msra.mxu0 %v4721_v5  ;;  %3851 = vmatpush.bf16.msrb.mxu3 %v4731_v58 }
0x209c   : > { %3644 = vadd.xlane.f32.xlu1 %v3643_v1 }
0x209f   : > { %3706 = vmatpush.bf16.msra.mxu0 %v4720_v3  ;;  %v4897_v3 = vld [vmem:[%s6111_s18] ss:$0 sm:$0xff] }
0x20a3   : > { %3707 = vmatpush.bf16.msra.mxu0 %v4719_v24 }
0x210f   : > { %v3645_v33 = vpop.xlane.xlu1 %3644 }
0x2110   : > { %v3646_v2 = vmul.f32 %v3645_v33, %v5474_v53 }
0x2112   : > { %v3647_v40 = vsub.f32 %v3641_v60, %v3646_v2  ;;  %v3800_v2 = vperm.slane %v5972_v57, 4 }
0x2114   : > { %v3648_v62 = vmul.f32 %v3647_v40, %v3647_v40 }
0x2116   : > { %v3649_v18 = vsel %vm3642_vm2, %v3648_v62, 0.0 }
0x2117   : > { %3650 = vadd.xlane.f32.xlu0 %v3649_v18  ;;  %v3802_v18 = vperm.slane %v5972_v57, 5 }
0x218a   : > { %v3651_v6 = vpop.xlane.xlu0 %3650 }
0x218b   : > { %v3652_v27 = vmul.f32 %v3651_v6, %v5474_v53  ;;  %v4898_v6 = vld [vmem:[%s6167_s28] ss:$0 sm:$0xff] }
0x218d   : > { %v3653_v61 = vadd.f32 1e-05, %v3652_v27 }
0x218f   : > { %4933 = vrsqrt.f32 %v3653_v61  ;;  %vm3660_vm9 = vweird.f32 %v3653_v61 }
0x2195   : > { %v4934_v13 = vpop.eup %4933 }
0x2196   : > { %v3655_v9 = vmul.f32 %v4934_v13, %v3653_v61  ;;  %vm3661_vm8 = vweird.f32 %v4934_v13 }
0x2197   : > { %vm3662_vm10 = vmor %vm3660_vm9, %vm3661_vm8 }
0x2198   : > { %v3656_v16 = vmul.f32 %v4934_v13, %v3655_v9  ;;  %v5065_v9 = vmov 0  }
0x2199   : > { %4894 = vset.pattern.permute.xlu2 %v5065_v9  ;;  %4893 = vset.pattern.permute.xlu1 %v5065_v9 }
0x219a   : > { %v3657_v17 = vmul.f32 0.5, %v3656_v16  ;;  %4895 = vset.pattern.permute.xlu0 %v5065_v9 }
0x219c   : > { %v3658_v22 = vsub.f32 1.5, %v3657_v17 }
0x219e   : > { %v3659_v23 = vmul.f32 %v4934_v13, %v3658_v22 }
0x21a0   : > { %v3663_v20 = vsel %vm3662_vm10, %v4934_v13, %v3659_v23 }
0x21a1   : > { %v3664_v45 = vmul.f32 %v3663_v20, %v3647_v40 }
0x21a3   : > { %v3666_v28 = vmul.f32 %v3665_v39, %v3664_v45 }
0x21a5   : > { %v3668_v55 = vadd.f32 %v3667_v25, %v3666_v28 }
0x21a7   : > { %v3669_v29 = vpack.c.bf16 %v3668_v55, %v3668_v55 }
0x21a9   : > { %4575 = vmatmul.msk.bf16.vlgmr.msra.gmra.mxu0 %vm1001_vm0, %v3669_v29 }
0x2226   : > { %v3709_v26 = vpop.f32.mrf.mxu0 }
0x2227   : > { %v3710_v10 = vadd.f32 %v4896_v31, %v3709_v26 }
0x2229   : > { %v3713_v8 = vmax.f32 %v3710_v10, 0.0 }
0x222b   : > { %v3714_v37 = vpack.c.bf16 %v3713_v8, %v3713_v8 }
0x222d   : > { %3772 = vmatmul.bf16.vlgmr.msra.gmra.mxu1 %v3714_v37 }
0x222e   : > { %v3711_v34 = vpop.f32.mrf.mxu0 }
0x22aa   : > { %v3773_v35 = vpop.f32.mrf.mxu1 }
0x22ab   : > { %v3774_v42 = vadd.f32 %v3773_v35, %v3715_v38 }
0x22ad   : > { %v3777_v36 = vadd.f32 %v3774_v42, %v3668_v55 }
0x22af   : > { %v3778_v15 = vsel %vm3642_vm2, %v3777_v36, 0.0 }
0x22b0   : > { %3779 = vadd.xlane.f32.xlu2 %v3778_v15 }
0x22b2   : > { %v3775_v43 = vpop.f32.mrf.mxu1 }
0x2323   : > { %v3780_v50 = vpop.xlane.xlu2 %3779 }
0x2324   : > { %v3781_v47 = vmul.f32 %v3780_v50, %v5474_v53 }
0x2326   : > { %v3782_v51 = vsub.f32 %v3777_v36, %v3781_v47 }
0x2328   : > { %v3783_v49 = vmul.f32 %v3782_v51, %v3782_v51 }
0x232a   : > { %v3784_v52 = vsel %vm3642_vm2, %v3783_v49, 0.0 }
0x232b   : > { %3785 = vadd.xlane.f32.xlu1 %v3784_v52 }
0x239e   : > { %v3786_v21 = vpop.xlane.xlu1 %3785 }
0x239f   : > { %v3787_v19 = vmul.f32 %v3786_v21, %v5474_v53 }
0x23a1   : > { %v3788_v59 = vadd.f32 1e-05, %v3787_v19 }
0x23a3   : > { %4935 = vrsqrt.f32 %v3788_v59  ;;  %vm3795_vm12 = vweird.f32 %v3788_v59 }
0x23a9   : > { %v4936_v41 = vpop.eup %4935 }
0x23aa   : > { %v3790_v46 = vmul.f32 %v4936_v41, %v3788_v59  ;;  %vm3796_vm11 = vweird.f32 %v4936_v41 }
0x23ab   : > { %vm3797_vm13 = vmor %vm3795_vm12, %vm3796_vm11 }
0x23ac   : > { %v3791_v63 = vmul.f32 %v4936_v41, %v3790_v46  ;;  %v4737_v46 = vld [vmem:[%s6168_s26 + $0x10] sm:$0xff] }
0x23ae   : > { %v3792_v60 = vmul.f32 0.5, %v3791_v63  ;;  %v4736_v63 = vld [vmem:[%s6168_s26 + $0x8] sm:$0xff] }
0x23b0   : > { %v3793_v1 = vsub.f32 1.5, %v3792_v60  ;;  %v4735_v60 = vld [vmem:[%s6168_s26] sm:$0xff] }
0x23b2   : > { %v3794_v33 = vmul.f32 %v4936_v41, %v3793_v1 }
0x23b4   : > { %v3798_v40 = vsel %vm3797_vm13, %v4936_v41, %v3794_v33  ;;  %v4738_v41 = vld [vmem:[%s6168_s26 + $0x18] sm:$0xff] }
0x23b5   : > { %v3799_v62 = vmul.f32 %v3798_v40, %v3782_v51  ;;  %3989 = vmatpush.bf16.msrb.mxu2 %v4738_v41 }
0x23b7   : > { %v3801_v54 = vmul.f32 %v3800_v2, %v3799_v62 }
0x23b9   : > { %v6042_v5 = vadd.f32 %v3802_v18, %v3801_v54  ;;  %3990 = vmatpush.bf16.msrb.mxu2 %v4737_v46 }
0x23bb   : > { %v3804_v53 = vpack.c.bf16 %v6042_v5, %v6042_v5 }
0x23bd   : > { %4624 = vmatmul.msk.bf16.vlgmr.msrb.gmra.mxu3 %vm1001_vm0, %v3804_v53  ;;  %3991 = vmatpush.bf16.msrb.mxu2 %v4736_v63 }
0x23c1   : > { %3992 = vmatpush.bf16.msrb.mxu2 %v4735_v60 }
0x2440   : > { %v3853_v24 = vpop.f32.mrf.mxu3 }
0x2441   : > { %v3854_v4 = vadd.f32 %v4897_v3, %v3853_v24 }
0x2443   : > { %4937 = vtanh.f32 %v3854_v4 }
0x2448   : > { %v3855_v57 = vpop.f32.mrf.mxu3 }
0x2449   : > { %v4938_v27 = vpop.eup %4937 }
0x244a   : > { %v3862_v7 = vmul.f32 %v4938_v27, %v4898_v6 }
0x244c   : > { %v3863_v61 = vsel %vm3642_vm2, %v3862_v7, 0.0 }
0x244d   : > { %3864 = vadd.xlane.f32.xlu0 %v3863_v61 }
0x24c0   : > { %v3865_v12 = vpop.xlane.xlu0 %3864 }
0x24c1   : > { %v3870_v13 = vadd.f32 %v4899_v11, %v3865_v12 }
0x24c3   : > { %v3872_v14 = vsel %vm3871_vm14, %v3870_v13, -inf  ;;  %v3906_v16 = vsel %vm3905_vm15, %v3870_v13, -inf }
0x24c4   : > { %v3873_v17 = vrot.slane %v3872_v14, 4  ;;  %v3907_v0 = vrot.slane %v3906_v16, 4 }
0x24c6   : > { %v3874_v22 = vmax.f32 %v3872_v14, %v3873_v17  ;;  %v3908_v23 = vmax.f32 %v3906_v16, %v3907_v0 }
0x24c8   : > { %v3875_v39 = vrot.slane %v3874_v22, 2  ;;  %v3909_v20 = vrot.slane %v3908_v23, 2 }
0x24ca   : > { %v3876_v45 = vmax.f32 %v3874_v22, %v3875_v39  ;;  %v3910_v25 = vmax.f32 %v3908_v23, %v3909_v20 }
0x24cc   : > { %v3877_v28 = vrot.slane %v3876_v45, 1  ;;  %v3911_v55 = vrot.slane %v3910_v25, 1 }
0x24ce   : > { %v3878_v29 = vmax.f32 %v3876_v45, %v3877_v28  ;;  %v3912_v30 = vmax.f32 %v3910_v25, %v3911_v55 }
0x24d0   : > { %v3879_v44 = vsub.f32 %v3870_v13, %v3878_v29  ;;  %v3913_v31 = vsub.f32 %v3870_v13, %v3912_v30 }
0x24d2   : > { %v3880_v26 = vmul.f32 1.442695, %v3879_v44  ;;  %v3914_v10 = vmul.f32 1.442695, %v3913_v31 }
0x24d4   : > { %4939 = vpow2.f32 %v3880_v26 }
0x24d5   : > { %4941 = vpow2.f32 %v3914_v10 }
0x24da   : > { %v4940_v8 = vpop.eup %4939 }
0x24db   : > { %v4942_v37 = vpop.eup %4941  ;;  %v3882_v34 = vsel %vm3871_vm14, %v4940_v8, 0.0 }
0x24dc   : > { %v3883_v38 = vrot.slane %v3882_v34, 4  ;;  %v3917_v35 = vrot.slane %v4942_v37, 3 }
0x24de   : > { %v3884_v42 = vadd.f32 %v3883_v38, %v3882_v34  ;;  %v3919_v36 = vsel %vm3871_vm14, %v3917_v35, 0.0 }
0x24df   : > { %v3920_v15 = vrot.slane %v3919_v36, 4 }
0x24e0   : > { %v3885_v43 = vrot.slane %v3884_v42, 2 }
0x24e1   : > { %v3921_v50 = vadd.f32 %v3920_v15, %v3919_v36 }
0x24e2   : > { %v3886_v47 = vadd.f32 %v3885_v43, %v3884_v42 }
0x24e3   : > { %v3922_v51 = vrot.slane %v3921_v50, 2 }
0x24e4   : > { %v3887_v49 = vrot.slane %v3886_v47, 1 }
0x24e5   : > { %v3923_v52 = vadd.f32 %v3922_v51, %v3921_v50 }
0x24e6   : > { %v3888_v48 = vadd.f32 %v3887_v49, %v3886_v47 }
0x24e7   : > { %v3924_v56 = vrot.slane %v3923_v52, 1 }
0x24e8   : > { %4943 = vrcp.f32 %v3888_v48 }
0x24e9   : > { %v3925_v32 = vadd.f32 %v3924_v56, %v3923_v52 }
0x24eb   : > { %4945 = vrcp.f32 %v3925_v32 }
0x24ee   : > { %v4944_v58 = vpop.eup %4943 }
0x24ef   : > { %v3890_v21 = vmul.f32 %v4944_v58, %v4940_v8 }
0x24f1   : > { %v4946_v19 = vpop.eup %4945  ;;  %3893 = vperm.xlu2 %4894, %v3890_v21  }
0x24f2   : > { %v3927_v59 = vmul.f32 %v4946_v19, %v4942_v37 }
0x24f4   : > { %3930 = vperm.xlu1 %4893, %v3927_v59  }
0x254b   : > { %v3894_v1 = vpop.permute.xlu2 %3893 }
0x254c   : > { %v3896_v33 = vmul.f32 %v3894_v1, %v6042_v5 }
0x254e   : > { %v3898_v2 = vsel %vm3897_vm4, %v3896_v33, 0.0 }
0x254f   : > { %v3899_v40 = vrot.slane %v3898_v2, 4 }
0x2551   : > { %v3900_v62 = vadd.f32 %v3899_v40, %v3898_v2 }
0x2553   : > { %v3901_v3 = vrot.slane %v3900_v62, 2 }
0x2555   : > { %v3902_v6 = vadd.f32 %v3901_v3, %v3900_v62 }
0x2557   : > { %v3903_v7 = vrot.slane %v3902_v6, 1 }
0x2559   : > { %v3904_v12 = vadd.f32 %v3903_v7, %v3902_v6 }
0x2566   : > { %v3931_v18 = vpop.permute.xlu1 %3930 }
0x2567   : > { %v3933_v54 = vmul.f32 %v3931_v18, %v6042_v5  ;;  %v4900_v5 = vld [vmem:[%s6169_s7] ss:$0 sm:$0xff] }
0x2569   : > { %v3935_v53 = vrot.slane %v3933_v54, 3 }
0x256b   : > { %v3937_v24 = vsel %vm3897_vm4, %v3935_v53, 0.0 }
0x256c   : > { %v3938_v4 = vrot.slane %v3937_v24, 4 }
0x256e   : > { %v3939_v57 = vadd.f32 %v3938_v4, %v3937_v24 }
0x2570   : > { %v3940_v27 = vrot.slane %v3939_v57, 2 }
0x2572   : > { %v3941_v61 = vadd.f32 %v3940_v27, %v3939_v57 }
0x2574   : > { %v3942_v11 = vrot.slane %v3941_v61, 1 }
0x2576   : > { %v3943_v13 = vadd.f32 %v3942_v11, %v3941_v61 }
0x2578   : > { %v3944_v9 = vsel %vm3040_vm3, %v3904_v12, %v3943_v13 }
0x2579   : > { %v3945_v14 = vpack.c.bf16 %v3944_v9, %v3944_v9 }
0x257b   : > { %4641 = vmatmul.msk.bf16.vlgmr.msrb.gmra.mxu2 %vm1001_vm0, %v3945_v14 }
0x25fe   : > { %v3994_v16 = vpop.f32.mrf.mxu2 }
0x25ff   : > { %v3995_v17 = vadd.f32 %v4900_v5, %v3994_v16 }
0x2601   : > { %3999 = vst.msk [vmem:[#allocation7] sm:$0x3] %vm3998_vm1, %v3995_v17 }
0x2606   : > { %v3996_v0 = vpop.f32.mrf.mxu2 }
0x2607 PF: > { %p4750_p8 = scmp.eq.s32.totalorder %s5209_s20, 2  ;;  %s5066_s22 = smov [#allocation7]  }
0x2608   : > { %s4006_s4 = sshll.u32 %s5066_s22, 4  ;;  %s6170_s28 = sld [smem:[#allocation24_spill]]  ;;  %s4007_s4 = int_to_ptr.vmem [resolvable:$true] %s4006_s4 }
0x260e   : > { %s4008_s6 = sshll.u32 %s6170_s28, 4  ;;  %s4009_s6 = int_to_ptr.hbm [resolvable:$true] %s4008_s6 }
0x260f   : > { %4742 = dma.vmem_to_hbm [thread:$0]  (%p4750_p8), %s4007_s4, 32, %s4009_s6, [#allocation6]  }
0x2610   : > { %5026 = dma.done.wait (%p4750_p8), [#allocation6], 32  }
0x2611   : > { %5028 = vsyncadd (%p4750_p8), [#allocation6], 4294967264 }
0x2612 PF: > { %s6171_s1 = sld [smem:[#allocation11_spill]]  ;;  %s6174_s24 = smov %s5035_s25 }
0x2613   : > { %s6172_s5 = sld [smem:[#allocation10_spill]] }
0x2614   : > { %s6173_s30 = sld [smem:[#allocation12_spill]] }
0x2618   : > { %p36_p9 = scmp.ge.s32.totalorder %s6171_s1, 5  }
0x2619   : > { %s6175_s25 = smov %s6172_s5 }
0x261a   : > { %s6176_s5 = smov %s6173_s30  ;;  %38 = sbr.rel (!%p36_p9) target bundleno = 17 (0x11), region = 189 }
0x261f   :  { %4022 = vsyncpa [#allocation5], 1 }
0x2620   :  { %4024 = vsyncpa [#allocation5 + $0x1], 1 }
0x2621   :  { %4025 = vsyncpa [#allocation6], 1 }
0x2622   :  { %4027 = vsyncpa [#allocation6 + $0x1], 1 }

</bundles_post_ra>
